<compile_context>
chip_gen: v6e
topology: v6e:2x2x1
jax: 0.10.0
libtpu: 0.0.40
codegen_flags: <defaults>
</compile_context>

<pallas_src>
import functools

import jax
import jax.numpy as jnp
from jax import lax
from jax.experimental import pallas as pl
from jax.experimental.pallas import tpu as pltpu

_LANE = 128


# ----------------------------------------------------------------------------
# Fused kernel: conv1 -> bn1 -> relu -> conv2 -> bn2 -> (+x) -> relu
# One batch image per grid step; all FLOPs of the block live here.
# ----------------------------------------------------------------------------
def _fused_basic_block_kernel(x_ref, w1_ref, w2_ref, s1_ref, b1_ref,
                              s2_ref, b2_ref, o_ref, mid_ref):
    """Block shapes:
      x_ref  : (1, H+2, W+2, Cp)  spatially pre-padded, channel-padded input
      w1_ref : (3, 3*Cp, Cp)      conv1 weight, layout (kh, kw*cin, cout)
      w2_ref : (3, 3*Cp, Cp)      conv2 weight
      s*/b*  : (1, Cp)            folded BatchNorm scale / bias (f32)
      o_ref  : (1, H, W, Cp)      output block
      mid_ref: VMEM (H+2, W+2, Cp) conv1 activation with zero halo (scratch)
    """
    Hp, Wp = x_ref.shape[1], x_ref.shape[2]
    H, W = Hp - 2, Wp - 2
    Cp = o_ref.shape[3]
    M = H * W

    x = x_ref[0]                                        # (H+2, W+2, Cp)

    def conv3x3(src, w_ref):
        # Implicit GEMM: one MXU dot per kernel row, kw folded into K=3*Cp.
        acc = jnp.zeros((M, Cp), jnp.float32)
        for kh in range(3):
            col = jnp.concatenate(
                [src[kh:kh + H, kw:kw + W, :].reshape(M, Cp)
                 for kw in range(3)],
                axis=1)                                 # (M, 3*Cp) lane concat
            acc = acc + jnp.dot(col, w_ref[kh],
                                preferred_element_type=jnp.float32)
        return acc

    # ---- conv1 -> bn1 -> relu ----
    act1 = jnp.maximum(conv3x3(x, w1_ref) * s1_ref[...] + b1_ref[...], 0.0)

    # Keep conv1 activation resident in VMEM with a zero 1-pixel halo.
    mid_ref[...] = jnp.zeros_like(mid_ref)
    mid_ref[1:H + 1, 1:W + 1, :] = act1.reshape(H, W, Cp).astype(mid_ref.dtype)

    # ---- conv2 -> bn2 -> + identity -> relu ----
    acc2 = conv3x3(mid_ref[...], w2_ref)
    residual = x[1:H + 1, 1:W + 1, :].reshape(M, Cp).astype(jnp.float32)
    out = jnp.maximum(acc2 * s2_ref[...] + b2_ref[...] + residual, 0.0)
    o_ref[...] = out.reshape(1, H, W, Cp).astype(o_ref.dtype)


# ----------------------------------------------------------------------------
# Glue (plain JAX: per-channel folding + layout prep only)
# ----------------------------------------------------------------------------
def _fold_bn(gamma, beta, mean, var, eps=1e-5):
    scale = gamma / jnp.sqrt(var + eps)
    bias = beta - mean * scale
    return scale.astype(jnp.float32), bias.astype(jnp.float32)


def _pad_to_lane(c):
    return -(-c // _LANE) * _LANE


def basic_block_forward_nhwc(x_nhwc, params, stride=1, down_sample=False,
                             compute_dtype=None):
    """Fused BasicBlock forward on an NHWC input."""
    if down_sample or stride != 1:
        # TODO(synk): stride>1 / down_sample (1x1 projection shortcut) path.
        raise NotImplementedError("only stride=1, down_sample=False supported")

    N, H, W, Cin = x_nhwc.shape
    Cout = params["conv1_w"].shape[0]
    if Cin != Cout:
        raise ValueError("identity residual requires Cin == Cout")

    compute_dtype = compute_dtype or x_nhwc.dtype
    Cp = _pad_to_lane(max(Cin, Cout))                 # lane-dense channels

    # Input: +1 spatial pad (conv padding=1) and channel pad to lane multiple.
    xp = jnp.pad(x_nhwc, ((0, 0), (1, 1), (1, 1), (0, Cp - Cin)))
    xp = xp.astype(compute_dtype)

    # Weights: (Cout, Cin, 3, 3) -> (3, 3, Cin, Cout) -> pad -> (3, 3*Cp, Cp).
    def prep_w(w):
        w = jnp.transpose(w, (2, 3, 1, 0))
        w = jnp.pad(w, ((0, 0), (0, 0),
                        (0, Cp - w.shape[2]), (0, Cp - w.shape[3])))
        return w.reshape(3, 3 * Cp, Cp).astype(compute_dtype)

    w1 = prep_w(params["conv1_w"])
    w2 = prep_w(params["conv2_w"])

    def prep_sb(g, b, m, v):
        s, bb = _fold_bn(g, b, m, v)
        return (jnp.pad(s, (0, Cp - Cout))[None, :],
                jnp.pad(bb, (0, Cp - Cout))[None, :])

    s1, b1 = prep_sb(params["bn1_gamma"], params["bn1_beta"],
                     params["bn1_mean"], params["bn1_var"])
    s2, b2 = prep_sb(params["bn2_gamma"], params["bn2_beta"],
                     params["bn2_mean"], params["bn2_var"])

    itemsize = jnp.dtype(compute_dtype).itemsize
    flops = 4 * N * H * W * 9 * Cp * Cp               # two 3x3 convs
    bytes_accessed = int((xp.size + w1.size + w2.size) * itemsize
                         + 4 * Cp * 4
                         + N * H * W * Cp * jnp.dtype(x_nhwc.dtype).itemsize)

    x_spec = pl.BlockSpec((1, H + 2, W + 2, Cp), lambda n: (n, 0, 0, 0))
    w_spec = pl.BlockSpec((3, 3 * Cp, Cp), lambda n: (0, 0, 0))
    sb_spec = pl.BlockSpec((1, Cp), lambda n: (0, 0))
    o_spec = pl.BlockSpec((1, H, W, Cp), lambda n: (n, 0, 0, 0))

    out = pl.pallas_call(
        _fused_basic_block_kernel,
        out_shape=jax.ShapeDtypeStruct((N, H, W, Cp), x_nhwc.dtype),
        grid_spec=pltpu.PrefetchScalarGridSpec(
            num_scalar_prefetch=0,
            grid=(N,),
            in_specs=[x_spec, w_spec, w_spec, sb_spec, sb_spec, sb_spec, sb_spec],
            out_specs=o_spec,
            scratch_shapes=[pltpu.VMEM((H + 2, W + 2, Cp), compute_dtype)],
        ),
        compiler_params=pltpu.CompilerParams(
            dimension_semantics=("parallel",),
        ),
        cost_estimate=pl.CostEstimate(
            flops=flops, transcendentals=0, bytes_accessed=bytes_accessed),
    )(xp, w1, w2, s1, b1, s2, b2)

    return out[..., :Cout]


def basic_block_forward(x_nchw, params, stride=1, down_sample=False,
                        compute_dtype=None):
    """NCHW wrapper matching the PyTorch BasicBlock interface."""
    x_nhwc = jnp.transpose(x_nchw, (0, 2, 3, 1))
    out = basic_block_forward_nhwc(x_nhwc, params, stride=stride,
                                   down_sample=down_sample,
                                   compute_dtype=compute_dtype)
    return jnp.transpose(out, (0, 3, 1, 2))


# ----------------------------------------------------------------------------
# Pure-JAX reference (lax.conv) for correctness checking.
# ----------------------------------------------------------------------------
def _ref_basic_block(x, params, stride=1):
    dn = ("NCHW", "OIHW", "NCHW")

    def bn(o, g, b, m, v, eps=1e-5):
        s = g / jnp.sqrt(v + eps)
        return o * s[None, :, None, None] + (b - m * s)[None, :, None, None]

    out = lax.conv_general_dilated(x, params["conv1_w"], (stride, stride),
                                   ((1, 1), (1, 1)), dimension_numbers=dn)
    out = jnp.maximum(bn(out, params["bn1_gamma"], params["bn1_beta"],
                         params["bn1_mean"], params["bn1_var"]), 0.0)
    out = lax.conv_general_dilated(out, params["conv2_w"], (1, 1),
                                   ((1, 1), (1, 1)), dimension_numbers=dn)
    out = bn(out, params["bn2_gamma"], params["bn2_beta"],
             params["bn2_mean"], params["bn2_var"])
    out = out + x
    return jnp.maximum(out, 0.0)


if __name__ == "__main__":
    key = jax.random.PRNGKey(0)
    N, Cin, Cout, H, W = 2, 4, 4, 16, 16
    stride = 1

    keys = jax.random.split(key, 9)
    params = {
        "conv1_w": 0.1 * jax.random.normal(keys[0], (Cout, Cin, 3, 3), jnp.float32),
        "conv2_w": 0.1 * jax.random.normal(keys[1], (Cout, Cout, 3, 3), jnp.float32),
        "bn1_gamma": 1.0 + 0.1 * jax.random.normal(keys[2], (Cout,), jnp.float32),
        "bn1_beta": 0.1 * jax.random.normal(keys[3], (Cout,), jnp.float32),
        "bn1_mean": 0.05 * jax.random.normal(keys[4], (Cout,), jnp.float32),
        "bn1_var": jnp.ones((Cout,), jnp.float32) * 1.2,
        "bn2_gamma": 1.0 + 0.1 * jax.random.normal(keys[5], (Cout,), jnp.float32),
        "bn2_beta": 0.1 * jax.random.normal(keys[6], (Cout,), jnp.float32),
        "bn2_mean": 0.05 * jax.random.normal(keys[7], (Cout,), jnp.float32),
        "bn2_var": jnp.ones((Cout,), jnp.float32) * 0.9,
    }
    x = jax.random.normal(keys[8], (N, Cin, H, W), jnp.float32)

    fwd = jax.jit(functools.partial(basic_block_forward, stride=stride,
                                    down_sample=False))
    out = jax.block_until_ready(fwd(x, params))

    ref = _ref_basic_block(x, params, stride=stride)
    assert out.shape == (N, Cout, H, W), out.shape
    max_err = float(jnp.max(jnp.abs(out - ref)))
    assert max_err < 5e-4, max_err

    print("KERNEL_OK")
</pallas_src>

<mosaic_0001>
module attributes {stable_mosaic.version = 11 : i64} {
  func.func @_fused_basic_block_kernel(%arg0: i32, %arg1: memref<1x18x18x128xf32, #tpu.memory_space<vmem>>, %arg2: memref<3x384x128xf32, #tpu.memory_space<vmem>>, %arg3: memref<3x384x128xf32, #tpu.memory_space<vmem>>, %arg4: memref<1x128xf32, #tpu.memory_space<vmem>>, %arg5: memref<1x128xf32, #tpu.memory_space<vmem>>, %arg6: memref<1x128xf32, #tpu.memory_space<vmem>>, %arg7: memref<1x128xf32, #tpu.memory_space<vmem>>, %arg8: memref<1x16x16x128xf32, #tpu.memory_space<vmem>>, %arg9: memref<18x18x128xf32, #tpu.memory_space<vmem>>) attributes {dimension_semantics = [#tpu.dimension_semantics<parallel>], iteration_bounds = array<i64: 2>, scalar_prefetch = 0 : i64, scratch_operands = 1 : i64, tpu.core_type = #tpu.core_type<tc>, window_params = [{transform_indices = @transform_0, window_bounds = array<i64: 1, 18, 18, 128>}, {pipeline_mode = #tpu.pipeline_mode<synchronous>, transform_indices = @transform_1, window_bounds = array<i64: 3, 384, 128>}, {pipeline_mode = #tpu.pipeline_mode<synchronous>, transform_indices = @transform_2, window_bounds = array<i64: 3, 384, 128>}, {pipeline_mode = #tpu.pipeline_mode<synchronous>, transform_indices = @transform_3, window_bounds = array<i64: 1, 128>}, {pipeline_mode = #tpu.pipeline_mode<synchronous>, transform_indices = @transform_4, window_bounds = array<i64: 1, 128>}, {pipeline_mode = #tpu.pipeline_mode<synchronous>, transform_indices = @transform_5, window_bounds = array<i64: 1, 128>}, {pipeline_mode = #tpu.pipeline_mode<synchronous>, transform_indices = @transform_6, window_bounds = array<i64: 1, 128>}, {transform_indices = @transform_7, window_bounds = array<i64: 1, 16, 16, 128>}]} {
    %c0 = arith.constant 0 : index
    %c0_0 = arith.constant 0 : index
    %c0_1 = arith.constant 0 : index
    %c0_2 = arith.constant 0 : index
    %0 = vector.load %arg1[%c0, %c0_0, %c0_1, %c0_2] : memref<1x18x18x128xf32, #tpu.memory_space<vmem>>, vector<1x18x18x128xf32>
    %1 = vector.shape_cast %0 : vector<1x18x18x128xf32> to vector<18x18x128xf32>
    %cst = arith.constant 0.000000e+00 : f32
    %2 = vector.broadcast %cst : f32 to vector<256x128xf32>
    %3 = vector.extract_strided_slice %1 {offsets = [0, 0, 0], sizes = [16, 16, 128], strides = [1, 1, 1]} : vector<18x18x128xf32> to vector<16x16x128xf32>
    %4 = vector.shape_cast %3 : vector<16x16x128xf32> to vector<256x128xf32>
    %5 = vector.extract_strided_slice %1 {offsets = [0, 1, 0], sizes = [16, 16, 128], strides = [1, 1, 1]} : vector<18x18x128xf32> to vector<16x16x128xf32>
    %6 = vector.shape_cast %5 : vector<16x16x128xf32> to vector<256x128xf32>
    %7 = vector.extract_strided_slice %1 {offsets = [0, 2, 0], sizes = [16, 16, 128], strides = [1, 1, 1]} : vector<18x18x128xf32> to vector<16x16x128xf32>
    %8 = vector.shape_cast %7 : vector<16x16x128xf32> to vector<256x128xf32>
    %9 = tpu.concatenate %4, %6, %8 in 1 : vector<256x128xf32>, vector<256x128xf32>, vector<256x128xf32> -> vector<256x384xf32>
    %c0_3 = arith.constant 0 : index
    %c0_4 = arith.constant 0 : index
    %c0_5 = arith.constant 0 : index
    %10 = vector.load %arg2[%c0_3, %c0_4, %c0_5] : memref<3x384x128xf32, #tpu.memory_space<vmem>>, vector<1x384x128xf32>
    %11 = vector.shape_cast %10 : vector<1x384x128xf32> to vector<384x128xf32>
    %cst_6 = arith.constant dense<0.000000e+00> : vector<256x128xf32>
    %12 = tpu.matmul %9, %11, %cst_6 {dimension_numbers = #tpu.dot_dimension_numbers<[1], [0], [0], [1], [0, 0, 1, 1], [], []>} : vector<256x384xf32>, vector<384x128xf32>, vector<256x128xf32> -> vector<256x128xf32>
    %13 = arith.addf %2, %12 : vector<256x128xf32>
    %14 = vector.extract_strided_slice %1 {offsets = [1, 0, 0], sizes = [16, 16, 128], strides = [1, 1, 1]} : vector<18x18x128xf32> to vector<16x16x128xf32>
    %15 = vector.shape_cast %14 : vector<16x16x128xf32> to vector<256x128xf32>
    %16 = vector.extract_strided_slice %1 {offsets = [1, 1, 0], sizes = [16, 16, 128], strides = [1, 1, 1]} : vector<18x18x128xf32> to vector<16x16x128xf32>
    %17 = vector.shape_cast %16 : vector<16x16x128xf32> to vector<256x128xf32>
    %18 = vector.extract_strided_slice %1 {offsets = [1, 2, 0], sizes = [16, 16, 128], strides = [1, 1, 1]} : vector<18x18x128xf32> to vector<16x16x128xf32>
    %19 = vector.shape_cast %18 : vector<16x16x128xf32> to vector<256x128xf32>
    %20 = tpu.concatenate %15, %17, %19 in 1 : vector<256x128xf32>, vector<256x128xf32>, vector<256x128xf32> -> vector<256x384xf32>
    %c1 = arith.constant 1 : index
    %c0_7 = arith.constant 0 : index
    %c0_8 = arith.constant 0 : index
    %21 = vector.load %arg2[%c1, %c0_7, %c0_8] : memref<3x384x128xf32, #tpu.memory_space<vmem>>, vector<1x384x128xf32>
    %22 = vector.shape_cast %21 : vector<1x384x128xf32> to vector<384x128xf32>
    %cst_9 = arith.constant dense<0.000000e+00> : vector<256x128xf32>
    %23 = tpu.matmul %20, %22, %cst_9 {dimension_numbers = #tpu.dot_dimension_numbers<[1], [0], [0], [1], [0, 0, 1, 1], [], []>} : vector<256x384xf32>, vector<384x128xf32>, vector<256x128xf32> -> vector<256x128xf32>
    %24 = arith.addf %13, %23 : vector<256x128xf32>
    %25 = vector.extract_strided_slice %1 {offsets = [2, 0, 0], sizes = [16, 16, 128], strides = [1, 1, 1]} : vector<18x18x128xf32> to vector<16x16x128xf32>
    %26 = vector.shape_cast %25 : vector<16x16x128xf32> to vector<256x128xf32>
    %27 = vector.extract_strided_slice %1 {offsets = [2, 1, 0], sizes = [16, 16, 128], strides = [1, 1, 1]} : vector<18x18x128xf32> to vector<16x16x128xf32>
    %28 = vector.shape_cast %27 : vector<16x16x128xf32> to vector<256x128xf32>
    %29 = vector.extract_strided_slice %1 {offsets = [2, 2, 0], sizes = [16, 16, 128], strides = [1, 1, 1]} : vector<18x18x128xf32> to vector<16x16x128xf32>
    %30 = vector.shape_cast %29 : vector<16x16x128xf32> to vector<256x128xf32>
    %31 = tpu.concatenate %26, %28, %30 in 1 : vector<256x128xf32>, vector<256x128xf32>, vector<256x128xf32> -> vector<256x384xf32>
    %c2 = arith.constant 2 : index
    %c0_10 = arith.constant 0 : index
    %c0_11 = arith.constant 0 : index
    %32 = vector.load %arg2[%c2, %c0_10, %c0_11] : memref<3x384x128xf32, #tpu.memory_space<vmem>>, vector<1x384x128xf32>
    %33 = vector.shape_cast %32 : vector<1x384x128xf32> to vector<384x128xf32>
    %cst_12 = arith.constant dense<0.000000e+00> : vector<256x128xf32>
    %34 = tpu.matmul %31, %33, %cst_12 {dimension_numbers = #tpu.dot_dimension_numbers<[1], [0], [0], [1], [0, 0, 1, 1], [], []>} : vector<256x384xf32>, vector<384x128xf32>, vector<256x128xf32> -> vector<256x128xf32>
    %35 = arith.addf %24, %34 : vector<256x128xf32>
    %c0_13 = arith.constant 0 : index
    %c0_14 = arith.constant 0 : index
    %36 = vector.load %arg4[%c0_13, %c0_14] : memref<1x128xf32, #tpu.memory_space<vmem>>, vector<1x128xf32>
    %37 = vector.broadcast %36 : vector<1x128xf32> to vector<256x128xf32>
    %38 = arith.mulf %35, %37 : vector<256x128xf32>
    %c0_15 = arith.constant 0 : index
    %c0_16 = arith.constant 0 : index
    %39 = vector.load %arg5[%c0_15, %c0_16] : memref<1x128xf32, #tpu.memory_space<vmem>>, vector<1x128xf32>
    %40 = vector.broadcast %39 : vector<1x128xf32> to vector<256x128xf32>
    %41 = arith.addf %38, %40 : vector<256x128xf32>
    %cst_17 = arith.constant 0.000000e+00 : f32
    %42 = vector.broadcast %cst_17 : f32 to vector<256x128xf32>
    %43 = arith.maximumf %41, %42 : vector<256x128xf32>
    %cst_18 = arith.constant 0.000000e+00 : f32
    %44 = vector.broadcast %cst_18 : f32 to vector<18x18x128xf32>
    %c0_19 = arith.constant 0 : index
    %c0_20 = arith.constant 0 : index
    %c0_21 = arith.constant 0 : index
    %45 = vector.load %arg9[%c0_19, %c0_20, %c0_21] : memref<18x18x128xf32, #tpu.memory_space<vmem>>, vector<18x18x128xf32>
    tpu.vector_store %arg9[%c0_19, %c0_20, %c0_21], %44 {strides = array<i32>} : memref<18x18x128xf32, #tpu.memory_space<vmem>>, vector<18x18x128xf32>,
    %46 = vector.shape_cast %43 : vector<256x128xf32> to vector<16x16x128xf32>
    %c1_22 = arith.constant 1 : index
    %c1_23 = arith.constant 1 : index
    %c0_24 = arith.constant 0 : index
    %47 = vector.load %arg9[%c1_22, %c1_23, %c0_24] : memref<18x18x128xf32, #tpu.memory_space<vmem>>, vector<16x16x128xf32>
    tpu.vector_store %arg9[%c1_22, %c1_23, %c0_24], %46 {strides = array<i32>} : memref<18x18x128xf32, #tpu.memory_space<vmem>>, vector<16x16x128xf32>,
    %c0_25 = arith.constant 0 : index
    %c0_26 = arith.constant 0 : index
    %c0_27 = arith.constant 0 : index
    %48 = vector.load %arg9[%c0_25, %c0_26, %c0_27] : memref<18x18x128xf32, #tpu.memory_space<vmem>>, vector<18x18x128xf32>
    %cst_28 = arith.constant 0.000000e+00 : f32
    %49 = vector.broadcast %cst_28 : f32 to vector<256x128xf32>
    %50 = vector.extract_strided_slice %48 {offsets = [0, 0, 0], sizes = [16, 16, 128], strides = [1, 1, 1]} : vector<18x18x128xf32> to vector<16x16x128xf32>
    %51 = vector.shape_cast %50 : vector<16x16x128xf32> to vector<256x128xf32>
    %52 = vector.extract_strided_slice %48 {offsets = [0, 1, 0], sizes = [16, 16, 128], strides = [1, 1, 1]} : vector<18x18x128xf32> to vector<16x16x128xf32>
    %53 = vector.shape_cast %52 : vector<16x16x128xf32> to vector<256x128xf32>
    %54 = vector.extract_strided_slice %48 {offsets = [0, 2, 0], sizes = [16, 16, 128], strides = [1, 1, 1]} : vector<18x18x128xf32> to vector<16x16x128xf32>
    %55 = vector.shape_cast %54 : vector<16x16x128xf32> to vector<256x128xf32>
    %56 = tpu.concatenate %51, %53, %55 in 1 : vector<256x128xf32>, vector<256x128xf32>, vector<256x128xf32> -> vector<256x384xf32>
    %c0_29 = arith.constant 0 : index
    %c0_30 = arith.constant 0 : index
    %c0_31 = arith.constant 0 : index
    %57 = vector.load %arg3[%c0_29, %c0_30, %c0_31] : memref<3x384x128xf32, #tpu.memory_space<vmem>>, vector<1x384x128xf32>
    %58 = vector.shape_cast %57 : vector<1x384x128xf32> to vector<384x128xf32>
    %cst_32 = arith.constant dense<0.000000e+00> : vector<256x128xf32>
    %59 = tpu.matmul %56, %58, %cst_32 {dimension_numbers = #tpu.dot_dimension_numbers<[1], [0], [0], [1], [0, 0, 1, 1], [], []>} : vector<256x384xf32>, vector<384x128xf32>, vector<256x128xf32> -> vector<256x128xf32>
    %60 = arith.addf %49, %59 : vector<256x128xf32>
    %61 = vector.extract_strided_slice %48 {offsets = [1, 0, 0], sizes = [16, 16, 128], strides = [1, 1, 1]} : vector<18x18x128xf32> to vector<16x16x128xf32>
    %62 = vector.shape_cast %61 : vector<16x16x128xf32> to vector<256x128xf32>
    %63 = vector.extract_strided_slice %48 {offsets = [1, 1, 0], sizes = [16, 16, 128], strides = [1, 1, 1]} : vector<18x18x128xf32> to vector<16x16x128xf32>
    %64 = vector.shape_cast %63 : vector<16x16x128xf32> to vector<256x128xf32>
    %65 = vector.extract_strided_slice %48 {offsets = [1, 2, 0], sizes = [16, 16, 128], strides = [1, 1, 1]} : vector<18x18x128xf32> to vector<16x16x128xf32>
    %66 = vector.shape_cast %65 : vector<16x16x128xf32> to vector<256x128xf32>
    %67 = tpu.concatenate %62, %64, %66 in 1 : vector<256x128xf32>, vector<256x128xf32>, vector<256x128xf32> -> vector<256x384xf32>
    %c1_33 = arith.constant 1 : index
    %c0_34 = arith.constant 0 : index
    %c0_35 = arith.constant 0 : index
    %68 = vector.load %arg3[%c1_33, %c0_34, %c0_35] : memref<3x384x128xf32, #tpu.memory_space<vmem>>, vector<1x384x128xf32>
    %69 = vector.shape_cast %68 : vector<1x384x128xf32> to vector<384x128xf32>
    %cst_36 = arith.constant dense<0.000000e+00> : vector<256x128xf32>
    %70 = tpu.matmul %67, %69, %cst_36 {dimension_numbers = #tpu.dot_dimension_numbers<[1], [0], [0], [1], [0, 0, 1, 1], [], []>} : vector<256x384xf32>, vector<384x128xf32>, vector<256x128xf32> -> vector<256x128xf32>
    %71 = arith.addf %60, %70 : vector<256x128xf32>
    %72 = vector.extract_strided_slice %48 {offsets = [2, 0, 0], sizes = [16, 16, 128], strides = [1, 1, 1]} : vector<18x18x128xf32> to vector<16x16x128xf32>
    %73 = vector.shape_cast %72 : vector<16x16x128xf32> to vector<256x128xf32>
    %74 = vector.extract_strided_slice %48 {offsets = [2, 1, 0], sizes = [16, 16, 128], strides = [1, 1, 1]} : vector<18x18x128xf32> to vector<16x16x128xf32>
    %75 = vector.shape_cast %74 : vector<16x16x128xf32> to vector<256x128xf32>
    %76 = vector.extract_strided_slice %48 {offsets = [2, 2, 0], sizes = [16, 16, 128], strides = [1, 1, 1]} : vector<18x18x128xf32> to vector<16x16x128xf32>
    %77 = vector.shape_cast %76 : vector<16x16x128xf32> to vector<256x128xf32>
    %78 = tpu.concatenate %73, %75, %77 in 1 : vector<256x128xf32>, vector<256x128xf32>, vector<256x128xf32> -> vector<256x384xf32>
    %c2_37 = arith.constant 2 : index
    %c0_38 = arith.constant 0 : index
    %c0_39 = arith.constant 0 : index
    %79 = vector.load %arg3[%c2_37, %c0_38, %c0_39] : memref<3x384x128xf32, #tpu.memory_space<vmem>>, vector<1x384x128xf32>
    %80 = vector.shape_cast %79 : vector<1x384x128xf32> to vector<384x128xf32>
    %cst_40 = arith.constant dense<0.000000e+00> : vector<256x128xf32>
    %81 = tpu.matmul %78, %80, %cst_40 {dimension_numbers = #tpu.dot_dimension_numbers<[1], [0], [0], [1], [0, 0, 1, 1], [], []>} : vector<256x384xf32>, vector<384x128xf32>, vector<256x128xf32> -> vector<256x128xf32>
    %82 = arith.addf %71, %81 : vector<256x128xf32>
    %83 = vector.extract_strided_slice %1 {offsets = [1, 1, 0], sizes = [16, 16, 128], strides = [1, 1, 1]} : vector<18x18x128xf32> to vector<16x16x128xf32>
    %84 = vector.shape_cast %83 : vector<16x16x128xf32> to vector<256x128xf32>
    %c0_41 = arith.constant 0 : index
    %c0_42 = arith.constant 0 : index
    %85 = vector.load %arg6[%c0_41, %c0_42] : memref<1x128xf32, #tpu.memory_space<vmem>>, vector<1x128xf32>
    %86 = vector.broadcast %85 : vector<1x128xf32> to vector<256x128xf32>
    %87 = arith.mulf %82, %86 : vector<256x128xf32>
    %c0_43 = arith.constant 0 : index
    %c0_44 = arith.constant 0 : index
    %88 = vector.load %arg7[%c0_43, %c0_44] : memref<1x128xf32, #tpu.memory_space<vmem>>, vector<1x128xf32>
    %89 = vector.broadcast %88 : vector<1x128xf32> to vector<256x128xf32>
    %90 = arith.addf %87, %89 : vector<256x128xf32>
    %91 = arith.addf %90, %84 : vector<256x128xf32>
    %cst_45 = arith.constant 0.000000e+00 : f32
    %92 = vector.broadcast %cst_45 : f32 to vector<256x128xf32>
    %93 = arith.maximumf %91, %92 : vector<256x128xf32>
    %94 = vector.shape_cast %93 : vector<256x128xf32> to vector<1x16x16x128xf32>
    %c0_46 = arith.constant 0 : index
    %c0_47 = arith.constant 0 : index
    %c0_48 = arith.constant 0 : index
    %c0_49 = arith.constant 0 : index
    %95 = vector.load %arg8[%c0_46, %c0_47, %c0_48, %c0_49] : memref<1x16x16x128xf32, #tpu.memory_space<vmem>>, vector<1x16x16x128xf32>
    tpu.vector_store %arg8[%c0_46, %c0_47, %c0_48, %c0_49], %94 {strides = array<i32>} : memref<1x16x16x128xf32, #tpu.memory_space<vmem>>, vector<1x16x16x128xf32>,
    return
  }
  func.func @transform_0(%arg0: i32) -> (i32, i32, i32, i32) {
    %c0_i32 = arith.constant 0 : i32
    %c0_i32_0 = arith.constant 0 : i32
    %c0_i32_1 = arith.constant 0 : i32
    %c0_i32_2 = arith.constant 0 : i32
    return %arg0, %c0_i32, %c0_i32_0, %c0_i32_1 : i32, i32, i32, i32
  }
  func.func @transform_1(%arg0: i32) -> (i32, i32, i32) {
    %c0_i32 = arith.constant 0 : i32
    %c0_i32_0 = arith.constant 0 : i32
    %c0_i32_1 = arith.constant 0 : i32
    %c0_i32_2 = arith.constant 0 : i32
    return %c0_i32, %c0_i32_0, %c0_i32_1 : i32, i32, i32
  }
  func.func @transform_2(%arg0: i32) -> (i32, i32, i32) {
    %c0_i32 = arith.constant 0 : i32
    %c0_i32_0 = arith.constant 0 : i32
    %c0_i32_1 = arith.constant 0 : i32
    %c0_i32_2 = arith.constant 0 : i32
    return %c0_i32, %c0_i32_0, %c0_i32_1 : i32, i32, i32
  }
  func.func @transform_3(%arg0: i32) -> (i32, i32) {
    %c0_i32 = arith.constant 0 : i32
    %c0_i32_0 = arith.constant 0 : i32
    %c0_i32_1 = arith.constant 0 : i32
    return %c0_i32, %c0_i32_0 : i32, i32
  }
  func.func @transform_4(%arg0: i32) -> (i32, i32) {
    %c0_i32 = arith.constant 0 : i32
    %c0_i32_0 = arith.constant 0 : i32
    %c0_i32_1 = arith.constant 0 : i32
    return %c0_i32, %c0_i32_0 : i32, i32
  }
  func.func @transform_5(%arg0: i32) -> (i32, i32) {
    %c0_i32 = arith.constant 0 : i32
    %c0_i32_0 = arith.constant 0 : i32
    %c0_i32_1 = arith.constant 0 : i32
    return %c0_i32, %c0_i32_0 : i32, i32
  }
  func.func @transform_6(%arg0: i32) -> (i32, i32) {
    %c0_i32 = arith.constant 0 : i32
    %c0_i32_0 = arith.constant 0 : i32
    %c0_i32_1 = arith.constant 0 : i32
    return %c0_i32, %c0_i32_0 : i32, i32
  }
  func.func @transform_7(%arg0: i32) -> (i32, i32, i32, i32) {
    %c0_i32 = arith.constant 0 : i32
    %c0_i32_0 = arith.constant 0 : i32
    %c0_i32_1 = arith.constant 0 : i32
    %c0_i32_2 = arith.constant 0 : i32
    return %arg0, %c0_i32, %c0_i32_0, %c0_i32_1 : i32, i32, i32, i32
  }
}

</mosaic_0001>

<bundles_post_ra>
// kernel: basic_block_forward.1
= control target key start
LH: loop header
LB: loop body
LE: loop exit
PB: predicated region body
PF: predicated region fallthrough
CT: control target
= control target key end

     0   :  { %s5585_s24 = smov 0   ;;  %s9026_s0 = inlined_call_operand.vmem [shape: f32[2,18,18,128], index: 0, kind: input, shape index: {}]   ;;  %s9027_s1 = inlined_call_operand.vmem [shape: f32[3,384,128], index: 1, kind: input, shape index: {}]   ;;  %s9028_s2 = inlined_call_operand.vmem [shape: f32[3,384,128], index: 2, kind: input, shape index: {}]   ;;  %s9029_s3 = inlined_call_operand.vmem [shape: f32[1,128], index: 3, kind: input, shape index: {}]   ;;  %s9030_s4 = inlined_call_operand.vmem [shape: f32[1,128], index: 4, kind: input, shape index: {}]   ;;  %s9031_s5 = inlined_call_operand.vmem [shape: f32[1,128], index: 5, kind: input, shape index: {}]   ;;  %s9032_s6 = inlined_call_operand.vmem [shape: f32[1,128], index: 6, kind: input, shape index: {}]   ;;  %s9033_s7 = inlined_call_operand.vmem [shape: f32[2,16,16,128], index: 7, kind: output, shape index: {}]  }
   0x1 LB: > { %s4483_s25 = sadd.s32 4294967295, %s5542_s24   ;;  %p4487_p0 = scmp.ge.s32.totalorder %s5542_s24, 1  ;;  %s5542_s24 = sphi %s5585_s24, %s17_s24  }
   0x2   : > { %p237_p1 = scmp.lt.s32.totalorder %s5542_s24, 3 }
   0x4   : > { %p238_p2 = pnand %p4487_p0, %p237_p1 }
   0x6   : > { %241 = sbr.rel (%p238_p2) target bundleno = 1022 (0x3fe), region = 48 }
   0xb   : > { %v4538_v0 = vld [vmem:[%s9027_s1 + $0x2f8] sm:$0xff]  ;;  %v4537_v2 = vld [vmem:[%s9027_s1 + $0x2f0] sm:$0xff]  ;;  %v9048_v3 = vmov 0.0   ;;  %v4536_v5 = vld [vmem:[%s9027_s1 + $0x2e8] sm:$0xff]  ;;  %p269_p3 = scmp.lt.s32.totalorder %s4483_s25, 1  ;;  %vm494_vm0 = vcmask 1045504  }
   0xc   : > { %v4506_v1 = vld [vmem:[%s9027_s1 + $0x1f8] sm:$0xff]  ;;  %721 = vmatprep.subr.mxu0 %v9048_v3  ;;  %2279 = vst [vmem:[#allocation2] sm:$0xff] %v9048_v3  ;;  %2281 = vst [vmem:[#allocation2 + $0x10] sm:$0x3] %v9048_v3  ;;  %4978 = vmatprep.subr.mxu1 %v4538_v0  ;;  %v4505_v4 = vld [vmem:[%s9027_s1 + $0x1f0] sm:$0xff]  ;;  %vm381_vm1 = vcmask 1046528  }
   0xd   : > { %2282 = vst [vmem:[#allocation2 + $0x18] sm:$0xff] %v9048_v3  ;;  %2283 = vst [vmem:[#allocation2 + $0x20] sm:$0xff] %v9048_v3  ;;  %722 = vmatpush1.msra.mxu0 %v4506_v1  ;;  %4979 = vmatpush3.msra.mxu1 %v4538_v0  ;;  %v4504_v6 = vld [vmem:[%s9027_s1 + $0x1e8] sm:$0xff]  ;;  %v4535_v7 = vld [vmem:[%s9027_s1 + $0x2e0] sm:$0xff]  ;;  %s9456_s25 = smov (!%p269_p3, %s4483_s25), 1 }
   0xe   : > { %2284 = vst [vmem:[#allocation2 + $0x28] sm:$0x3] %v9048_v3  ;;  %2285 = vst [vmem:[#allocation2 + $0x30] sm:$0xff] %v9048_v3  ;;  %723 = vmatprep.subr.mxu0 %v9048_v3  ;;  %4980 = vmatprep.subr.mxu1 %v4537_v2  ;;  %v4503_v8 = vld [vmem:[%s9027_s1 + $0x1e0] sm:$0xff]  ;;  %v4534_v9 = vld [vmem:[%s9027_s1 + $0x2d8] sm:$0xff]  ;;  %s5458_s20 = smul.u32 432, %s9456_s25 }
   0xf   : > { %2286 = vst [vmem:[#allocation2 + $0x38] sm:$0xff] %v9048_v3  ;;  %2287 = vst [vmem:[#allocation2 + $0x40] sm:$0x3] %v9048_v3  ;;  %724 = vmatpush1.msra.mxu0 %v4505_v4  ;;  %4981 = vmatpush3.msra.mxu1 %v4537_v2  ;;  %v4502_v10 = vld [vmem:[%s9027_s1 + $0x1d8] sm:$0xff]  ;;  %v4533_v11 = vld [vmem:[%s9027_s1 + $0x2d0] sm:$0xff]  ;;  %s4689_s22 = sshll.u32 %s9456_s25, 8 }
  0x10   : > { %2288 = vst [vmem:[#allocation2 + $0x48] sm:$0xff] %v9048_v3  ;;  %2289 = vst [vmem:[#allocation2 + $0x50] sm:$0xff] %v9048_v3  ;;  %725 = vmatprep.subr.mxu0 %v9048_v3  ;;  %4982 = vmatprep.subr.mxu1 %v4536_v5  ;;  %v4501_v12 = vld [vmem:[%s9027_s1 + $0x1d0] sm:$0xff]  ;;  %v4532_v13 = vld [vmem:[%s9027_s1 + $0x2c8] sm:$0xff]  ;;  %s5733_s10 = scalar_lea.vmem %s9026_s0, %s5458_s20  ;;  %s8870_s25 = scalar_lea.vmem %s9033_s7, %s4689_s22 }
  0x11   : > { %2290 = vst [vmem:[#allocation2 + $0x58] sm:$0x3] %v9048_v3  ;;  %2291 = vst [vmem:[#allocation2 + $0x60] sm:$0xff] %v9048_v3  ;;  %726 = vmatpush1.msra.mxu0 %v4504_v6  ;;  %4983 = vmatpush3.msra.mxu1 %v4536_v5  ;;  %v4500_v14 = vld [vmem:[%s9027_s1 + $0x1c8] sm:$0xff]  ;;  %v4531_v15 = vld [vmem:[%s9027_s1 + $0x2c0] sm:$0xff] }
  0x12   : > { %2292 = vst [vmem:[#allocation2 + $0x68] sm:$0xff] %v9048_v3  ;;  %2293 = vst [vmem:[#allocation2 + $0x70] sm:$0x3] %v9048_v3  ;;  %727 = vmatprep.subr.mxu0 %v9048_v3  ;;  %4984 = vmatprep.subr.mxu1 %v4535_v7  ;;  %v4499_v16 = vld [vmem:[%s9027_s1 + $0x1c0] sm:$0xff]  ;;  %v4530_v17 = vld [vmem:[%s9027_s1 + $0x2b8] sm:$0xff] }
  0x13   : > { %2294 = vst [vmem:[#allocation2 + $0x78] sm:$0xff] %v9048_v3  ;;  %2295 = vst [vmem:[#allocation2 + $0x80] sm:$0xff] %v9048_v3  ;;  %728 = vmatpush1.msra.mxu0 %v4503_v8  ;;  %4985 = vmatpush3.msra.mxu1 %v4535_v7  ;;  %v4498_v18 = vld [vmem:[%s9027_s1 + $0x1b8] sm:$0xff]  ;;  %v4529_v19 = vld [vmem:[%s9027_s1 + $0x2b0] sm:$0xff] }
  0x14   : > { %2296 = vst [vmem:[#allocation2 + $0x88] sm:$0x3] %v9048_v3  ;;  %2297 = vst [vmem:[#allocation2 + $0x90] sm:$0xff] %v9048_v3  ;;  %729 = vmatprep.subr.mxu0 %v9048_v3  ;;  %4986 = vmatprep.subr.mxu1 %v4534_v9  ;;  %v4497_v20 = vld [vmem:[%s9027_s1 + $0x1b0] sm:$0xff]  ;;  %v4528_v21 = vld [vmem:[%s9027_s1 + $0x2a8] sm:$0xff] }
  0x15   : > { %2298 = vst [vmem:[#allocation2 + $0x98] sm:$0xff] %v9048_v3  ;;  %2299 = vst [vmem:[#allocation2 + $0xa0] sm:$0x3] %v9048_v3  ;;  %730 = vmatpush1.msra.mxu0 %v4502_v10  ;;  %4987 = vmatpush3.msra.mxu1 %v4534_v9  ;;  %v4496_v22 = vld [vmem:[%s9027_s1 + $0x1a8] sm:$0xff]  ;;  %v4527_v23 = vld [vmem:[%s9027_s1 + $0x2a0] sm:$0xff] }
  0x16   : > { %2300 = vst [vmem:[#allocation2 + $0xa8] sm:$0xff] %v9048_v3  ;;  %2301 = vst [vmem:[#allocation2 + $0xb0] sm:$0xff] %v9048_v3  ;;  %731 = vmatprep.subr.mxu0 %v9048_v3  ;;  %4988 = vmatprep.subr.mxu1 %v4533_v11  ;;  %v4495_v24 = vld [vmem:[%s9027_s1 + $0x1a0] sm:$0xff]  ;;  %v4526_v25 = vld [vmem:[%s9027_s1 + $0x298] sm:$0xff] }
  0x17   : > { %2302 = vst [vmem:[#allocation2 + $0xb8] sm:$0x3] %v9048_v3  ;;  %2303 = vst [vmem:[#allocation2 + $0xc0] sm:$0xff] %v9048_v3  ;;  %732 = vmatpush1.msra.mxu0 %v4501_v12  ;;  %4989 = vmatpush3.msra.mxu1 %v4533_v11  ;;  %v4494_v26 = vld [vmem:[%s9027_s1 + $0x198] sm:$0xff]  ;;  %v5750_v28 = vld [vmem:[%s5733_s10 + $0x20] sm:$0xff] }
  0x18   : > { %2304 = vst [vmem:[#allocation2 + $0xc8] sm:$0xff] %v9048_v3  ;;  %2305 = vst [vmem:[#allocation2 + $0xd0] sm:$0x3] %v9048_v3  ;;  %733 = vmatprep.subr.mxu0 %v9048_v3  ;;  %4990 = vmatprep.subr.mxu1 %v4532_v13  ;;  %v5747_v27 = vld [vmem:[%s5733_s10 + $0x18] sm:$0xff]  ;;  %v4525_v29 = vld [vmem:[%s9027_s1 + $0x290] sm:$0xff]  ;;  %v501_v34 = vrot.slane %v5750_v28, 2 }
  0x19   : > { %2306 = vst [vmem:[#allocation2 + $0xd8] sm:$0xff] %v9048_v3  ;;  %2307 = vst [vmem:[#allocation2 + $0xe0] sm:$0xff] %v9048_v3  ;;  %734 = vmatpush1.msra.mxu0 %v4500_v14  ;;  %4991 = vmatpush3.msra.mxu1 %v4532_v13  ;;  %v5756_v30 = vld [vmem:[%s5733_s10 + $0x28] sm:$0x3]  ;;  %v4493_v31 = vld [vmem:[%s9027_s1 + $0x190] sm:$0xff]  ;;  %v500_v33 = vrot.slane %v5747_v27, 2 }
  0x1a   : > { %2308 = vst [vmem:[#allocation2 + $0xe8] sm:$0x3] %v9048_v3  ;;  %2309 = vst [vmem:[#allocation2 + $0xf0] sm:$0xff] %v9048_v3  ;;  %735 = vmatprep.subr.mxu0 %v9048_v3  ;;  %4992 = vmatprep.subr.mxu1 %v4531_v15  ;;  %v4524_v32 = vld [vmem:[%s9027_s1 + $0x288] sm:$0xff]  ;;  %v503_v36 = vrot.slane %v5756_v30, 2  ;;  %v5773_v37 = vld [vmem:[%s5733_s10 + $0x30] sm:$0xff] }
  0x1b   : > { %2310 = vst [vmem:[#allocation2 + $0xf8] sm:$0xff] %v9048_v3  ;;  %2311 = vst [vmem:[#allocation2 + $0x100] sm:$0x3] %v9048_v3  ;;  %736 = vmatpush1.msra.mxu0 %v4499_v16  ;;  %4993 = vmatpush3.msra.mxu1 %v4531_v15  ;;  %v4492_v35 = vld [vmem:[%s9027_s1 + $0x188] sm:$0xff]  ;;  %v5776_v38 = vld [vmem:[%s5733_s10 + $0x38] sm:$0xff]  ;;  %v5789_v42 = vsel %vm494_vm0, %v500_v33, %v501_v34  ;;  %v505_v43 = vrot.slane %v5773_v37, 2 }
  0x1c   : > { %2312 = vst [vmem:[#allocation2 + $0x108] sm:$0xff] %v9048_v3  ;;  %2313 = vst [vmem:[#allocation2 + $0x110] sm:$0xff] %v9048_v3  ;;  %737 = vmatprep.subr.mxu0 %v9048_v3  ;;  %4994 = vmatprep.subr.mxu1 %v4530_v17  ;;  %v4523_v39 = vld [vmem:[%s9027_s1 + $0x280] sm:$0xff]  ;;  %v506_v44 = vrot.slane %v5776_v38, 2  ;;  %v5795_v45 = vsel %vm494_vm0, %v501_v34, %v503_v36  ;;  %v4522_v46 = vld [vmem:[%s9027_s1 + $0x278] sm:$0xff] }
  0x1d   : > { %2314 = vst [vmem:[#allocation2 + $0x118] sm:$0x3] %v9048_v3  ;;  %2315 = vst [vmem:[#allocation2 + $0x120] sm:$0xff] %v9048_v3  ;;  %738 = vmatpush1.msra.mxu0 %v4498_v18  ;;  %4995 = vmatpush3.msra.mxu1 %v4530_v17  ;;  %v4491_v40 = vld [vmem:[%s9027_s1 + $0x180] sm:$0xff]  ;;  %v622_v47 = vld [vmem:[%s9027_s1 + $0x78] sm:$0xff] }
  0x1e   : > { %2316 = vst [vmem:[#allocation2 + $0x128] sm:$0xff] %v9048_v3  ;;  %2317 = vst [vmem:[#allocation2 + $0x130] sm:$0x3] %v9048_v3  ;;  %739 = vmatprep.subr.mxu0 %v9048_v3  ;;  %4996 = vmatprep.subr.mxu1 %v4529_v19  ;;  %v5786_v41 = vld [vmem:[%s5733_s10 + $0x40] sm:$0x3]  ;;  %v5805_v49 = vld [vmem:[%s5733_s10 + $0x48] sm:$0xff]  ;;  %v5818_v52 = vsel %vm494_vm0, %v505_v43, %v506_v44 }
  0x1f   : > { %2318 = vst [vmem:[#allocation2 + $0x138] sm:$0xff] %v9048_v3  ;;  %2319 = vst [vmem:[#allocation2 + $0x140] sm:$0xff] %v9048_v3  ;;  %740 = vmatpush1.msra.mxu0 %v4497_v20  ;;  %4997 = vmatpush3.msra.mxu1 %v4529_v19  ;;  %v508_v48 = vrot.slane %v5786_v41, 2  ;;  %v5808_v50 = vld [vmem:[%s5733_s10 + $0x50] sm:$0xff]  ;;  %v5821_v53 = vld [vmem:[%s5733_s10 + $0x58] sm:$0x3] }
  0x20   : > { %2320 = vst [vmem:[#allocation2 + $0x148] sm:$0x3] %v9048_v3  ;;  %2321 = vst [vmem:[#allocation2 + $0x150] sm:$0xff] %v9048_v3  ;;  %741 = vmatprep.subr.mxu0 %v9048_v3  ;;  %4998 = vmatprep.subr.mxu1 %v4528_v21  ;;  %v4521_v51 = vld [vmem:[%s9027_s1 + $0x270] sm:$0xff]  ;;  %v510_v55 = vrot.slane %v5805_v49, 2  ;;  %v511_v56 = vrot.slane %v5808_v50, 2 }
  0x21   : > { %2322 = vst [vmem:[#allocation2 + $0x158] sm:$0xff] %v9048_v3  ;;  %2323 = vst [vmem:[#allocation2 + $0x160] sm:$0x3] %v9048_v3  ;;  %742 = vmatpush1.msra.mxu0 %v4496_v22  ;;  %4999 = vmatpush3.msra.mxu1 %v4528_v21  ;;  %v621_v54 = vld [vmem:[%s9027_s1 + $0x70] sm:$0xff]  ;;  %v5831_v57 = vsel %vm494_vm0, %v506_v44, %v508_v48  ;;  %v4520_v58 = vld [vmem:[%s9027_s1 + $0x268] sm:$0xff]  ;;  %v513_v60 = vrot.slane %v5821_v53, 2 }
  0x22   : > { %2324 = vst [vmem:[#allocation2 + $0x168] sm:$0xff] %v9048_v3  ;;  %2325 = vst [vmem:[#allocation2 + $0x170] sm:$0xff] %v9048_v3  ;;  %743 = vmatprep.subr.mxu0 %v9048_v3  ;;  %5000 = vmatprep.subr.mxu1 %v4527_v23  ;;  %v620_v59 = vld [vmem:[%s9027_s1 + $0x68] sm:$0xff]  ;;  %v5842_v61 = vld [vmem:[%s5733_s10 + $0x60] sm:$0xff]  ;;  %v5854_v0 = vsel %vm494_vm0, %v510_v55, %v511_v56 }
  0x23   : > { %2326 = vst [vmem:[#allocation2 + $0x178] sm:$0x3] %v9048_v3  ;;  %2327 = vst [vmem:[#allocation2 + $0x180] sm:$0xff] %v9048_v3  ;;  %744 = vmatpush1.msra.mxu0 %v4495_v24  ;;  %5001 = vmatpush3.msra.mxu1 %v4527_v23  ;;  %v5845_v62 = vld [vmem:[%s5733_s10 + $0x68] sm:$0xff]  ;;  %v4519_v63 = vld [vmem:[%s9027_s1 + $0x260] sm:$0xff]  ;;  %v515_v4 = vrot.slane %v5842_v61, 2  ;;  %v5867_v6 = vsel %vm494_vm0, %v511_v56, %v513_v60 }
  0x24   : > { %2328 = vst [vmem:[#allocation2 + $0x188] sm:$0xff] %v9048_v3  ;;  %2329 = vst [vmem:[#allocation2 + $0x190] sm:$0x3] %v9048_v3  ;;  %745 = vmatprep.subr.mxu0 %v9048_v3  ;;  %5002 = vmatprep.subr.mxu1 %v4526_v25  ;;  %v5857_v1 = vld [vmem:[%s5733_s10 + $0x70] sm:$0x3]  ;;  %v619_v2 = vld [vmem:[%s9027_s1 + $0x60] sm:$0xff] }
  0x25   : > { %2332 = vst [vmem:[#allocation2 + $0x1a8] sm:$0x3] %v9048_v3  ;;  %746 = vmatpush1.msra.mxu0 %v4494_v26  ;;  %5003 = vmatpush3.msra.mxu1 %v4526_v25  ;;  %9201 = vst [vmem:[#allocation3_spill] sm:$0xff] %v5789_v42  ;;  %v516_v5 = vrot.slane %v5845_v62, 2  ;;  %v4518_v7 = vld [vmem:[%s9027_s1 + $0x258] sm:$0xff]  ;;  %v518_v9 = vrot.slane %v5857_v1, 2 }
  0x26   : > { %747 = vmatprep.subr.mxu0 %v9048_v3  ;;  %5004 = vmatprep.subr.mxu1 %v4525_v29  ;;  %9202 = vst [vmem:[#allocation4_spill] sm:$0xff] %v5795_v45  ;;  %9203 = vst [vmem:[#allocation5_spill] sm:$0xff] %v5818_v52  ;;  %v618_v8 = vld [vmem:[%s9027_s1 + $0x58] sm:$0xff]  ;;  %v5881_v11 = vld [vmem:[%s5733_s10 + $0x80] sm:$0xff] }
  0x27   : > { %748 = vmatpush1.msra.mxu0 %v4493_v31  ;;  %5005 = vmatpush3.msra.mxu1 %v4525_v29  ;;  %9204 = vst [vmem:[#allocation6_spill] sm:$0xff] %v5831_v57  ;;  %9205 = vst [vmem:[#allocation7_spill] sm:$0xff] %v5854_v0  ;;  %v5878_v10 = vld [vmem:[%s5733_s10 + $0x78] sm:$0xff]  ;;  %v4517_v12 = vld [vmem:[%s9027_s1 + $0x250] sm:$0xff]  ;;  %v5890_v13 = vsel %vm494_vm0, %v515_v4, %v516_v5  ;;  %v521_v17 = vrot.slane %v5881_v11, 2  ;;  %v5903_v18 = vsel %vm494_vm0, %v516_v5, %v518_v9 }
  0x28   : > { %749 = vmatprep.subr.mxu0 %v9048_v3  ;;  %5006 = vmatprep.subr.mxu1 %v4524_v32  ;;  %9206 = vst [vmem:[#allocation8_spill] sm:$0xff] %v5867_v6  ;;  %9207 = vst [vmem:[#allocation9_spill] sm:$0xff] %v5890_v13  ;;  %v5893_v14 = vld [vmem:[%s5733_s10 + $0x88] sm:$0x3]  ;;  %v617_v15 = vld [vmem:[%s9027_s1 + $0x50] sm:$0xff]  ;;  %v520_v16 = vrot.slane %v5878_v10, 2 }
  0x29   : > { %750 = vmatpush1.msra.mxu0 %v4492_v35  ;;  %5007 = vmatpush3.msra.mxu1 %v4524_v32  ;;  %9208 = vst [vmem:[#allocation10_spill] sm:$0xff] %v5903_v18  ;;  %v4516_v19 = vld [vmem:[%s9027_s1 + $0x248] sm:$0xff]  ;;  %v523_v21 = vrot.slane %v5893_v14, 2  ;;  %v5914_v22 = vld [vmem:[%s5733_s10 + $0x90] sm:$0xff]  ;;  %v5917_v23 = vld [vmem:[%s5733_s10 + $0x98] sm:$0xff] }
  0x2a   : > { %751 = vmatprep.subr.mxu0 %v9048_v3  ;;  %5008 = vmatprep.subr.mxu1 %v4523_v39  ;;  %v616_v20 = vld [vmem:[%s9027_s1 + $0x48] sm:$0xff]  ;;  %v4515_v24 = vld [vmem:[%s9027_s1 + $0x240] sm:$0xff]  ;;  %v5926_v25 = vsel %vm494_vm0, %v520_v16, %v521_v17  ;;  %v525_v31 = vrot.slane %v5914_v22, 2  ;;  %v526_v32 = vrot.slane %v5917_v23, 2  ;;  %v4514_v34 = vld [vmem:[%s9027_s1 + $0x238] sm:$0xff] }
  0x2b   : > { %752 = vmatpush1.msra.mxu0 %v4491_v40  ;;  %5009 = vmatpush3.msra.mxu1 %v4523_v39  ;;  %9209 = vst [vmem:[#allocation11_spill] sm:$0xff] %v5926_v25  ;;  %v5929_v26 = vld [vmem:[%s5733_s10 + $0xa0] sm:$0x3]  ;;  %v5939_v33 = vsel %vm494_vm0, %v521_v17, %v523_v21  ;;  %v614_v35 = vld [vmem:[%s9027_s1 + $0x38] sm:$0xff]  ;;  %v5950_v39 = vld [vmem:[%s5733_s10 + $0xa8] sm:$0xff] }
  0x2c   : > { %5010 = vmatprep.mubr.f32.mxu1 %v5789_v42  ;;  %753 = vmatprep.subr.mxu0 %v9048_v3  ;;  %v615_v29 = vld [vmem:[%s9027_s1 + $0x40] sm:$0xff]  ;;  %9210 = vst [vmem:[#allocation12_spill] sm:$0xff] %v5939_v33  ;;  %v528_v36 = vrot.slane %v5929_v26, 2  ;;  %v5953_v40 = vld [vmem:[%s5733_s10 + $0xb0] sm:$0xff]  ;;  %v5962_v44 = vsel %vm494_vm0, %v525_v31, %v526_v32  ;;  %v530_v48 = vrot.slane %v5950_v39, 2  ;;  %v4512_v55 = vld [vmem:[%s9027_s1 + $0x228] sm:$0xff] }
  0x2d   : > { %5011 = vmatmul.mubr.f32.vlgmr.msra.gmra.mxu1 %v5795_v45  ;;  %1171 = vmatprep.subr.mxu1 %v9048_v3  ;;  %v4513_v43 = vld [vmem:[%s9027_s1 + $0x230] sm:$0xff]  ;;  %9211 = vst [vmem:[#allocation13_spill] sm:$0xff] %v5962_v44  ;;  %v612_v56 = vld [vmem:[%s9027_s1 + $0x28] sm:$0xff]  ;;  %v611_v5 = vld [vmem:[%s9027_s1 + $0x20] sm:$0xff]  ;;  %v387_v31 = vrot.slane %v5747_v27, 1 }
  0x2e   : > { %754 = vmatpush2.msra.mxu0 %v4522_v46  ;;  %1172 = vmatpush1.msra.mxu1 %v622_v47  ;;  %v5965_v46 = vld [vmem:[%s5733_s10 + $0xb8] sm:$0x3]  ;;  %v613_v47 = vld [vmem:[%s9027_s1 + $0x30] sm:$0xff]  ;;  %v5989_v60 = vld [vmem:[%s5733_s10 + $0xc8] sm:$0xff] }
  0x2f   : > { %755 = vmatprep.subr.mxu0 %v9048_v3  ;;  %1173 = vmatprep.subr.mxu1 %v9048_v3  ;;  %v6001_v4 = vld [vmem:[%s5733_s10 + $0xd0] sm:$0x3]  ;;  %v6023_v17 = vld [vmem:[%s5733_s10 + $0xd8] sm:$0xff]  ;;  %v6282_v42 = vld [vmem:[%s5733_s10 + $0x188] sm:$0xff] }
  0x30   : > { %756 = vmatpush2.msra.mxu0 %v4521_v51  ;;  %5013 = vmatprep.mubr.f32.mxu1 %v5818_v52  ;;  %v531_v51 = vrot.slane %v5953_v40, 2  ;;  %v538_v16 = vrot.slane %v6001_v4, 2  ;;  %v403_v52 = vrot.slane %v5845_v62, 1  ;;  %9241 = vst [vmem:[#allocation42_spill] sm:$0xff] %v6282_v42 }
  0x31   : > { %1174 = vmatpush1.msra.mxu1 %v621_v54  ;;  %757 = vmatprep.subr.mxu0 %v9048_v3  ;;  %v5975_v54 = vsel %vm494_vm0, %v526_v32, %v528_v36  ;;  %v388_v32 = vrot.slane %v5750_v28, 1 }
  0x32   : > { %5014 = vmatmul.mubr.f32.gmra.mxu1 %v5831_v57  ;;  %1175 = vmatprep.subr.mxu1 %v9048_v3  ;;  %9212 = vst [vmem:[#allocation14_spill] sm:$0xff] %v5975_v54  ;;  %v402_v57 = vrot.slane %v5842_v61, 1 }
  0x33   : > { %758 = vmatpush2.msra.mxu0 %v4520_v58  ;;  %1176 = vmatpush1.msra.mxu1 %v620_v59  ;;  %v533_v58 = vrot.slane %v5965_v46, 2  ;;  %v5986_v59 = vld [vmem:[%s5733_s10 + $0xc0] sm:$0xff] }
  0x34   : > { %759 = vmatprep.subr.mxu0 %v9048_v3  ;;  %1177 = vmatprep.subr.mxu1 %v9048_v3 }
  0x35   : > { %760 = vmatpush2.msra.mxu0 %v4519_v63  ;;  %5016 = vmatprep.mubr.f32.mxu1 %v5854_v0  ;;  %v4511_v63 = vld [vmem:[%s9027_s1 + $0x220] sm:$0xff]  ;;  %v6011_v9 = vsel %vm494_vm0, %v531_v51, %v533_v58  ;;  %v6072_v58 = vsel %vm381_vm1, %v387_v31, %v388_v32  ;;  %v630_v0 = vld [vmem:[%s9027_s1 + $0xb8] sm:$0xff] }
  0x36   : > { %1178 = vmatpush1.msra.mxu1 %v619_v2  ;;  %761 = vmatprep.subr.mxu0 %v9048_v3  ;;  %v5998_v2 = vsel %vm494_vm0, %v530_v48, %v531_v51  ;;  %9214 = vst [vmem:[#allocation16_spill] sm:$0xff] %v6011_v9  ;;  %v6061_v51 = vld [vmem:[%s5733_s10 + $0xf0] sm:$0xff]  ;;  %9217 = vst [vmem:[#allocation19_spill] sm:$0xff] %v6072_v58 }
  0x37   : > { %5017 = vmatmul.mubr.f32.gmra.mxu1 %v5867_v6  ;;  %1179 = vmatprep.subr.mxu1 %v9048_v3  ;;  %9213 = vst [vmem:[#allocation15_spill] sm:$0xff] %v5998_v2 }
  0x38   : > { %762 = vmatpush2.msra.mxu0 %v4518_v7  ;;  %1180 = vmatpush1.msra.mxu1 %v618_v8  ;;  %v535_v7 = vrot.slane %v5986_v59, 2  ;;  %v536_v8 = vrot.slane %v5989_v60, 2 }
  0x39   : > { %763 = vmatprep.subr.mxu0 %v9048_v3  ;;  %1181 = vmatprep.subr.mxu1 %v9048_v3 }
  0x3a   : > { %764 = vmatpush2.msra.mxu0 %v4517_v12  ;;  %5019 = vmatprep.mubr.f32.mxu1 %v5890_v13  ;;  %v4510_v12 = vld [vmem:[%s9027_s1 + $0x218] sm:$0xff]  ;;  %v6034_v21 = vsel %vm494_vm0, %v535_v7, %v536_v8  ;;  %v607_v7 = vld [vmem:[%s9027_s1] sm:$0xff]  ;;  %v6236_v13 = vld [vmem:[%s5733_s10 + $0x168] sm:$0xff] }
  0x3b   : > { %1182 = vmatpush1.msra.mxu1 %v617_v15  ;;  %765 = vmatprep.subr.mxu0 %v9048_v3  ;;  %v610_v15 = vld [vmem:[%s9027_s1 + $0x18] sm:$0xff]  ;;  %9215 = vst [vmem:[#allocation17_spill] sm:$0xff] %v6034_v21  ;;  %9232 = vst [vmem:[#allocation33_spill] sm:$0xff] %v6236_v13 }
  0x3c   : > { %5020 = vmatmul.mubr.f32.gmra.mxu1 %v5903_v18  ;;  %1183 = vmatprep.subr.mxu1 %v9048_v3  ;;  %v6210_v18 = vld [vmem:[%s5733_s10 + $0x158] sm:$0xff] }
  0x3d   : > { %766 = vmatpush2.msra.mxu0 %v4516_v19  ;;  %1184 = vmatpush1.msra.mxu1 %v616_v20  ;;  %v6026_v19 = vld [vmem:[%s5733_s10 + $0xe0] sm:$0xff]  ;;  %v4509_v20 = vld [vmem:[%s9027_s1 + $0x210] sm:$0xff] }
  0x3e   : > { %767 = vmatprep.subr.mxu0 %v9048_v3  ;;  %1185 = vmatprep.subr.mxu1 %v9048_v3  ;;  %v541_v36 = vrot.slane %v6026_v19, 2 }
  0x3f   : > { %768 = vmatpush2.msra.mxu0 %v4515_v24  ;;  %5022 = vmatprep.mubr.f32.mxu1 %v5926_v25  ;;  %v6037_v24 = vld [vmem:[%s5733_s10 + $0xe8] sm:$0x3] }
  0x40   : > { %1186 = vmatpush1.msra.mxu1 %v615_v29  ;;  %769 = vmatprep.subr.mxu0 %v9048_v3  ;;  %v609_v29 = vld [vmem:[%s9027_s1 + $0x10] sm:$0xff]  ;;  %v543_v48 = vrot.slane %v6037_v24, 2 }
  0x41   : > { %5023 = vmatmul.mubr.f32.gmra.mxu1 %v5939_v33  ;;  %1187 = vmatprep.subr.mxu1 %v9048_v3  ;;  %v398_v33 = vrot.slane %v5808_v50, 1 }
  0x42   : > { %770 = vmatpush2.msra.mxu0 %v4514_v34  ;;  %1188 = vmatpush1.msra.mxu1 %v614_v35  ;;  %v6047_v34 = vsel %vm494_vm0, %v536_v8, %v538_v16  ;;  %v540_v35 = vrot.slane %v6023_v17, 2  ;;  %v390_v8 = vrot.slane %v5756_v30, 1  ;;  %v654_v30 = vld [vmem:[%s9027_s1 + $0x178] sm:$0xff] }
  0x43   : > { %771 = vmatprep.subr.mxu0 %v9048_v3  ;;  %1189 = vmatprep.subr.mxu1 %v9048_v3  ;;  %9216 = vst [vmem:[#allocation18_spill] sm:$0xff] %v6047_v34 }
  0x44   : > { %772 = vmatpush2.msra.mxu0 %v4513_v43  ;;  %5025 = vmatprep.mubr.f32.mxu1 %v5962_v44  ;;  %v4508_v43 = vld [vmem:[%s9027_s1 + $0x208] sm:$0xff]  ;;  %v397_v44 = vrot.slane %v5805_v49, 1 }
  0x45   : > { %1190 = vmatpush1.msra.mxu1 %v613_v47  ;;  %773 = vmatprep.subr.mxu0 %v9048_v3  ;;  %v608_v47 = vld [vmem:[%s9027_s1 + $0x8] sm:$0xff] }
  0x46   : > { %5026 = vmatmul.mubr.f32.gmra.mxu1 %v5975_v54  ;;  %1191 = vmatprep.subr.mxu1 %v9048_v3  ;;  %v634_v54 = vld [vmem:[%s9027_s1 + $0xd8] sm:$0xff] }
  0x47   : > { %774 = vmatpush2.msra.mxu0 %v4512_v55  ;;  %1192 = vmatpush1.msra.mxu1 %v612_v56  ;;  %v6064_v55 = vld [vmem:[%s5733_s10 + $0xf8] sm:$0xff]  ;;  %v4507_v56 = vld [vmem:[%s9027_s1 + $0x200] sm:$0xff] }
  0x48   : > { %775 = vmatprep.subr.mxu0 %v9048_v3  ;;  %1193 = vmatprep.subr.mxu1 %v9048_v3  ;;  %v546_v16 = vrot.slane %v6064_v55, 2 }
  0x49   : > { %776 = vmatpush2.msra.mxu0 %v4511_v63  ;;  %5028 = vmatprep.mubr.f32.mxu1 %v5998_v2  ;;  %v6075_v63 = vld [vmem:[%s5733_s10 + $0x100] sm:$0x3]  ;;  %v9226_v2 = vmov 0.0  }
  0x4a   : > { %1194 = vmatpush1.msra.mxu1 %v611_v5  ;;  %777 = vmatprep.subr.mxu0 %v9048_v3  ;;  %v6078_v5 = vsel %vm494_vm0, %v540_v35, %v541_v36  ;;  %v548_v31 = vrot.slane %v6075_v63, 2  ;;  %v638_v35 = vld [vmem:[%s9027_s1 + $0xf8] sm:$0xff] }
  0x4b   : > { %5029 = vmatmul.mubr.f32.gmra.mxu1 %v6011_v9  ;;  %1195 = vmatprep.subr.mxu1 %v9048_v3  ;;  %9218 = vst [vmem:[#allocation20_spill] sm:$0xff] %v6078_v5  ;;  %v6164_v9 = vld [vmem:[%s5733_s10 + $0x138] sm:$0xff] }
  0x4c   : > { %778 = vmatpush2.msra.mxu0 %v4510_v12  ;;  %1196 = vmatpush1.msra.mxu1 %v610_v15  ;;  %v6087_v12 = vsel %vm494_vm0, %v541_v36, %v543_v48  ;;  %v545_v15 = vrot.slane %v6061_v51, 2  ;;  %v392_v36 = vrot.slane %v5773_v37, 1 }
  0x4d   : > { %779 = vmatprep.subr.mxu0 %v9048_v3  ;;  %1197 = vmatprep.subr.mxu1 %v9048_v3  ;;  %9219 = vst [vmem:[#allocation21_spill] sm:$0xff] %v6087_v12 }
  0x4e   : > { %780 = vmatpush2.msra.mxu0 %v4509_v20  ;;  %5031 = vmatprep.mubr.f32.mxu1 %v6034_v21  ;;  %v6092_v20 = vld [vmem:[%s5733_s10 + $0x108] sm:$0xff] }
  0x4f   : > { %1198 = vmatpush1.msra.mxu1 %v609_v29  ;;  %781 = vmatprep.subr.mxu0 %v9048_v3  ;;  %v6095_v29 = vld [vmem:[%s5733_s10 + $0x110] sm:$0xff]  ;;  %v550_v48 = vrot.slane %v6092_v20, 2  ;;  %v6138_v21 = vld [vmem:[%s5733_s10 + $0x128] sm:$0xff] }
  0x50   : > { %5032 = vmatmul.mubr.f32.gmra.mxu1 %v6047_v34  ;;  %1199 = vmatprep.subr.mxu1 %v9048_v3 }
  0x51   : > { %782 = vmatpush2.msra.mxu0 %v4508_v43  ;;  %1200 = vmatpush1.msra.mxu1 %v608_v47  ;;  %v393_v43 = vrot.slane %v5776_v38, 1  ;;  %v6111_v47 = vsel %vm381_vm1, %v388_v32, %v390_v8  ;;  %v6126_v32 = vsel %vm494_vm0, %v546_v16, %v548_v31  ;;  %v6148_v31 = vld [vmem:[%s5733_s10 + $0x130] sm:$0x3] }
  0x52   : > { %783 = vmatprep.subr.mxu0 %v9048_v3  ;;  %1201 = vmatprep.subr.mxu1 %v9048_v3  ;;  %9220 = vst [vmem:[#allocation22_spill] sm:$0xff] %v6111_v47  ;;  %9222 = vst [vmem:[#allocation24_spill] sm:$0xff] %v6126_v32 }
  0x53   : > { %784 = vmatpush2.msra.mxu0 %v4507_v56  ;;  %785 = vmatprep.mubr.f32.mxu0 %v6072_v58  ;;  %v551_v56 = vrot.slane %v6095_v29, 2  ;;  %v6131_v8 = vsel %vm381_vm1, %v392_v36, %v393_v43  ;;  %v395_v36 = vrot.slane %v5786_v41, 1 }
  0x54   : > { %5034 = vmatprep.mubr.f32.mxu1 %v6078_v5  ;;  %1202 = vmatpush1.msra.mxu1 %v607_v7  ;;  %v6116_v7 = vld [vmem:[%s5733_s10 + $0x118] sm:$0x3]  ;;  %v6120_v5 = vsel %vm494_vm0, %v545_v15, %v546_v16  ;;  %9223 = vst [vmem:[#allocation25_spill] sm:$0xff] %v6131_v8  ;;  %v6135_v15 = vld [vmem:[%s5733_s10 + $0x120] sm:$0xff]  ;;  %v636_v16 = vld [vmem:[%s9027_s1 + $0xe8] sm:$0xff] }
  0x55   : > { %786 = vmatmul.mubr.f32.vlgmr.msra.gmra.mxu0 %v5747_v27  ;;  %5035 = vmatmul.mubr.f32.gmra.mxu1 %v6087_v12  ;;  %9221 = vst [vmem:[#allocation23_spill] sm:$0xff] %v6120_v5  ;;  %v637_v12 = vld [vmem:[%s9027_s1 + $0xf0] sm:$0xff]  ;;  %v553_v34 = vrot.slane %v6116_v7, 2 }
  0x56   : > { %1203 = vmatprep.subr.mxu1 %v9048_v3  ;;  %5058 = vmatprep.subr.mxu0 %v654_v30 }
  0x57   : > { %1204 = vmatpush2.msra.mxu1 %v638_v35  ;;  %5059 = vmatpush3.msra.mxu0 %v654_v30  ;;  %v6145_v30 = vsel %vm494_vm0, %v550_v48, %v551_v56  ;;  %v653_v35 = vld [vmem:[%s9027_s1 + $0x170] sm:$0xff]  ;;  %v555_v48 = vrot.slane %v6135_v15, 2  ;;  %v6171_v41 = vsel %vm494_vm0, %v551_v56, %v553_v34  ;;  %v6182_v34 = vsel %vm381_vm1, %v393_v43, %v395_v36 }
  0x58   : > { %1205 = vmatprep.subr.mxu1 %v9048_v3  ;;  %790 = vmatprep.mubr.f32.mxu0 %v6111_v47  ;;  %9224 = vst [vmem:[#allocation26_spill] sm:$0xff] %v6145_v30  ;;  %9225 = vst [vmem:[#allocation27_spill] sm:$0xff] %v6171_v41  ;;  %v560_v56 = vrot.slane %v6164_v9, 2  ;;  %v633_v43 = vld [vmem:[%s9027_s1 + $0xd0] sm:$0xff] }
  0x59   : > { %5037 = vmatprep.mubr.f32.mxu1 %v6120_v5  ;;  %1206 = vmatpush2.msra.mxu1 %v637_v12  ;;  %v635_v12 = vld [vmem:[%s9027_s1 + $0xe0] sm:$0xff]  ;;  %v556_v5 = vrot.slane %v6138_v21, 2  ;;  %9227 = vst [vmem:[#allocation28_spill] sm:$0xff] %v6182_v34 }
  0x5a   : > { %791 = vmatmul.mubr.f32.gmra.mxu0 %v5750_v28  ;;  %5038 = vmatmul.mubr.f32.gmra.mxu1 %v6126_v32  ;;  %v6167_v32 = vld [vmem:[%s5733_s10 + $0x140] sm:$0xff] }
  0x5b   : > { %1207 = vmatprep.subr.mxu1 %v9048_v3  ;;  %795 = vmatprep.mubr.f32.mxu0 %v6131_v8  ;;  %v558_v3 = vrot.slane %v6148_v31, 2 }
  0x5c   : > { %1208 = vmatpush2.msra.mxu1 %v636_v16  ;;  %5040 = vmatprep.mubr.f32.mxu1 %v6145_v30  ;;  %v561_v16 = vrot.slane %v6167_v32, 2  ;;  %v6187_v30 = vld [vmem:[%s5733_s10 + $0x148] sm:$0x3] }
  0x5d   : > { %1209 = vmatprep.subr.mxu1 %v9226_v2  ;;  %5060 = vmatprep.subr.mxu0 %v653_v35  ;;  %v6198_v36 = vsel %vm494_vm0, %v556_v5, %v558_v3  ;;  %v563_v25 = vrot.slane %v6187_v30, 2  ;;  %v632_v3 = vld [vmem:[%s9027_s1 + $0xc8] sm:$0xff] }
  0x5e   : > { %1210 = vmatpush2.msra.mxu1 %v635_v12  ;;  %796 = vmatmul.mubr.f32.gmra.mxu0 %v5773_v37  ;;  %v6192_v12 = vsel %vm494_vm0, %v555_v48, %v556_v5  ;;  %9229 = vst [vmem:[#allocation30_spill] sm:$0xff] %v6198_v36  ;;  %v6207_v48 = vld [vmem:[%s5733_s10 + $0x150] sm:$0xff]  ;;  %v652_v5 = vld [vmem:[%s9027_s1 + $0x168] sm:$0xff] }
  0x5f   : > { %5041 = vmatmul.mubr.f32.gmra.mxu1 %v6171_v41  ;;  %1211 = vmatprep.subr.mxu1 %v9226_v2  ;;  %9228 = vst [vmem:[#allocation29_spill] sm:$0xff] %v6192_v12  ;;  %v6203_v41 = vsel %vm381_vm1, %v397_v44, %v398_v33  ;;  %v6220_v44 = vld [vmem:[%s5733_s10 + $0x160] sm:$0x3] }
  0x60   : > { %1212 = vmatpush2.msra.mxu1 %v634_v54  ;;  %5061 = vmatpush3.msra.mxu0 %v653_v35  ;;  %9230 = vst [vmem:[#allocation31_spill] sm:$0xff] %v6203_v41  ;;  %v6217_v54 = vsel %vm494_vm0, %v560_v56, %v561_v16  ;;  %v400_v35 = vrot.slane %v5821_v53, 1  ;;  %v631_v56 = vld [vmem:[%s9027_s1 + $0xc0] sm:$0xff]  ;;  %v6243_v53 = vsel %vm494_vm0, %v561_v16, %v563_v25  ;;  %v568_v6 = vrot.slane %v6220_v44, 2 }
  0x61   : > { %1213 = vmatprep.subr.mxu1 %v9226_v2  ;;  %800 = vmatprep.mubr.f32.mxu0 %v6182_v34  ;;  %9231 = vst [vmem:[#allocation32_spill] sm:$0xff] %v6217_v54  ;;  %9234 = vst [vmem:[#allocation35_spill] sm:$0xff] %v6243_v53  ;;  %v570_v16 = vrot.slane %v6236_v13, 2  ;;  %v408_v13 = vrot.slane %v5881_v11, 1 }
  0x62   : > { %5043 = vmatprep.mubr.f32.mxu1 %v6192_v12  ;;  %1214 = vmatpush2.msra.mxu1 %v633_v43  ;;  %v565_v43 = vrot.slane %v6207_v48, 2  ;;  %v566_v12 = vrot.slane %v6210_v18, 2  ;;  %v6254_v25 = vsel %vm381_vm1, %v398_v33, %v400_v35  ;;  %v629_v33 = vld [vmem:[%s9027_s1 + $0xb0] sm:$0xff] }
  0x63   : > { %801 = vmatmul.mubr.f32.gmra.mxu0 %v5776_v38  ;;  %5044 = vmatmul.mubr.f32.gmra.mxu1 %v6198_v36  ;;  %v6239_v36 = vld [vmem:[%s5733_s10 + $0x170] sm:$0xff]  ;;  %9235 = vst [vmem:[#allocation36_spill] sm:$0xff] %v6254_v25 }
  0x64   : > { %1215 = vmatprep.subr.mxu1 %v9226_v2  ;;  %805 = vmatprep.mubr.f32.mxu0 %v6203_v41  ;;  %9233 = vst [vmem:[#allocation34_spill] sm:$0xff] %v6239_v36  ;;  %v6270_v35 = vsel %vm494_vm0, %v566_v12, %v568_v6 }
  0x65   : > { %1216 = vmatpush2.msra.mxu1 %v632_v3  ;;  %5046 = vmatprep.mubr.f32.mxu1 %v6217_v54  ;;  %v571_v3 = vrot.slane %v6239_v36, 2  ;;  %v6259_v54 = vld [vmem:[%s5733_s10 + $0x178] sm:$0x3]  ;;  %9238 = vst [vmem:[#allocation39_spill] sm:$0xff] %v6270_v35 }
  0x66   : > { %1217 = vmatprep.subr.mxu1 %v9226_v2  ;;  %5062 = vmatprep.subr.mxu0 %v652_v5  ;;  %9236 = vst [vmem:[#allocation37_spill] sm:$0xff] %v6259_v54  ;;  %v573_v45 = vrot.slane %v6259_v54, 2  ;;  %v6308_v54 = vld [vmem:[%s5733_s10] sm:$0xff] }
  0x67   : > { %1218 = vmatpush2.msra.mxu1 %v631_v56  ;;  %806 = vmatmul.mubr.f32.gmra.mxu0 %v5805_v49  ;;  %v6264_v56 = vsel %vm494_vm0, %v565_v43, %v566_v12  ;;  %v6279_v43 = vld [vmem:[%s5733_s10 + $0x180] sm:$0xff]  ;;  %v6289_v6 = vsel %vm494_vm0, %v570_v16, %v571_v3 }
  0x68   : > { %5047 = vmatmul.mubr.f32.gmra.mxu1 %v6243_v53  ;;  %1219 = vmatprep.subr.mxu1 %v9226_v2  ;;  %9237 = vst [vmem:[#allocation38_spill] sm:$0xff] %v6264_v56  ;;  %v6275_v53 = vsel %vm381_vm1, %v402_v57, %v403_v52  ;;  %9240 = vst [vmem:[#allocation41_spill] sm:$0xff] %v6279_v43  ;;  %v6292_v57 = vld [vmem:[%s5733_s10 + $0x190] sm:$0x3]  ;;  %v651_v12 = vld [vmem:[%s9027_s1 + $0x160] sm:$0xff] }
  0x69   : > { %1220 = vmatpush2.msra.mxu1 %v630_v0  ;;  %5063 = vmatpush3.msra.mxu0 %v652_v5  ;;  %9239 = vst [vmem:[#allocation40_spill] sm:$0xff] %v6275_v53  ;;  %v628_v0 = vld [vmem:[%s9027_s1 + $0xa8] sm:$0xff]  ;;  %9242 = vst [vmem:[#allocation43_spill] sm:$0xff] %v6289_v6  ;;  %v405_v5 = vrot.slane %v5857_v1, 1  ;;  %v627_v16 = vld [vmem:[%s9027_s1 + $0xa0] sm:$0xff]  ;;  %v6315_v1 = vsel %vm494_vm0, %v571_v3, %v573_v45  ;;  %v668_v36 = vrot.slane %v6292_v57, 2 }
  0x6a   : > { %1221 = vmatprep.subr.mxu1 %v9226_v2  ;;  %810 = vmatprep.mubr.f32.mxu0 %v6254_v25  ;;  %9243 = vst [vmem:[#allocation44_spill] sm:$0xff] %v6292_v57  ;;  %v382_v3 = vrot.slane %v6308_v54, 1  ;;  %v6339_v57 = vld [vmem:[%s5733_s10 + $0x10] sm:$0x3] }
  0x6b   : > { %5049 = vmatprep.mubr.f32.mxu1 %v6264_v56  ;;  %1222 = vmatpush2.msra.mxu1 %v629_v33  ;;  %v665_v33 = vrot.slane %v6279_v43, 2  ;;  %v666_v56 = vrot.slane %v6282_v42, 2  ;;  %v626_v42 = vld [vmem:[%s9027_s1 + $0x98] sm:$0xff]  ;;  %v407_v43 = vrot.slane %v5878_v10, 1  ;;  %v6326_v45 = vsel %vm381_vm1, %v403_v52, %v405_v5 }
  0x6c   : > { %811 = vmatmul.mubr.f32.gmra.mxu0 %v5808_v50  ;;  %5050 = vmatmul.mubr.f32.gmra.mxu1 %v6270_v35  ;;  %v6311_v35 = vld [vmem:[%s5733_s10 + $0x8] sm:$0xff]  ;;  %9244 = vst [vmem:[#allocation45_spill] sm:$0xff] %v6326_v45 }
  0x6d   : > { %1223 = vmatprep.subr.mxu1 %v9226_v2  ;;  %815 = vmatprep.mubr.f32.mxu0 %v6275_v53  ;;  %v6342_v52 = vsel %vm494_vm0, %v666_v56, %v668_v36  ;;  %v6347_v5 = vsel %vm381_vm1, %v407_v43, %v408_v13  ;;  %v385_v36 = vrot.slane %v6339_v57, 1  ;;  %v623_v43 = vld [vmem:[%s9027_s1 + $0x80] sm:$0xff] }
  0x6e   : > { %1224 = vmatpush2.msra.mxu1 %v628_v0  ;;  %5052 = vmatprep.mubr.f32.mxu1 %v6289_v6  ;;  %v383_v0 = vrot.slane %v6311_v35, 1  ;;  %v6333_v6 = vsel %vm494_vm0, %v665_v33, %v666_v56  ;;  %9246 = vst [vmem:[#allocation47_spill] sm:$0xff] %v6342_v52  ;;  %9247 = vst [vmem:[#allocation48_spill] sm:$0xff] %v6347_v5  ;;  %v624_v33 = vld [vmem:[%s9027_s1 + $0x88] sm:$0xff]  ;;  %v650_v56 = vld [vmem:[%s9027_s1 + $0x158] sm:$0xff] }
  0x6f   : > { %1225 = vmatprep.subr.mxu1 %v9226_v2  ;;  %5064 = vmatprep.subr.mxu0 %v651_v12  ;;  %9245 = vst [vmem:[#allocation46_spill] sm:$0xff] %v6333_v6 }
  0x70   : > { %1226 = vmatpush2.msra.mxu1 %v627_v16  ;;  %816 = vmatmul.mubr.f32.gmra.mxu0 %v5842_v61  ;;  %v625_v16 = vld [vmem:[%s9027_s1 + $0x90] sm:$0xff] }
  0x71   : > { %5053 = vmatmul.mubr.f32.gmra.mxu1 %v6315_v1  ;;  %1227 = vmatprep.subr.mxu1 %v9226_v2 }
  0x72   : > { %1228 = vmatpush2.msra.mxu1 %v626_v42  ;;  %5065 = vmatpush3.msra.mxu0 %v651_v12  ;;  %v384_v42 = vsel %vm381_vm1, %v382_v3, %v383_v0  ;;  %v410_v12 = vrot.slane %v5893_v14, 1  ;;  %v412_v14 = vrot.slane %v5914_v22, 1  ;;  %v413_v3 = vrot.slane %v5917_v23, 1 }
  0x73   : > { %1229 = vmatprep.subr.mxu1 %v9226_v2  ;;  %820 = vmatprep.mubr.f32.mxu0 %v6326_v45 }
  0x74   : > { %5055 = vmatprep.mubr.f32.mxu1 %v6333_v6  ;;  %1230 = vmatpush2.msra.mxu1 %v625_v16  ;;  %v6368_v16 = vld [vmem:[#allocation2] sm:$0xff] }
  0x75   : > { %821 = vmatmul.mubr.f32.gmra.mxu0 %v5845_v62  ;;  %5056 = vmatmul.mubr.f32.gmra.mxu1 %v6342_v52  ;;  %v6372_v52 = vsel %vm381_vm1, %v408_v13, %v410_v12  ;;  %v6385_v13 = vsel %vm381_vm1, %v412_v14, %v413_v3  ;;  %v648_v12 = vld [vmem:[%s9027_s1 + $0x148] sm:$0xff]  ;;  %v647_v14 = vld [vmem:[%s9027_s1 + $0x140] sm:$0xff] }
  0x76   : > { %1231 = vmatprep.subr.mxu1 %v9226_v2  ;;  %825 = vmatprep.mubr.f32.mxu0 %v6347_v5  ;;  %9248 = vst [vmem:[#allocation49_spill] sm:$0xff] %v6372_v52  ;;  %v386_v2 = vsel %vm381_vm1, %v383_v0, %v385_v36  ;;  %9249 = vst [vmem:[#allocation50_spill] sm:$0xff] %v6385_v13  ;;  %v415_v0 = vrot.slane %v5929_v26, 1  ;;  %v4553_v36 = vld [vmem:[%s9027_s1 + $0x370] sm:$0xff] }
  0x77   : > { %1232 = vmatpush2.msra.mxu1 %v624_v33  ;;  %1235 = vmatprep.mubr.f32.mxu1 %v384_v42  ;;  %v649_v33 = vld [vmem:[%s9027_s1 + $0x150] sm:$0xff]  ;;  %v4554_v42 = vld [vmem:[%s9027_s1 + $0x378] sm:$0xff] }
  0x78   : > { %1233 = vmatprep.subr.mxu1 %v6368_v16  ;;  %5066 = vmatprep.subr.mxu0 %v650_v56  ;;  %v6400_v26 = vsel %vm381_vm1, %v413_v3, %v415_v0  ;;  %v4552_v3 = vld [vmem:[%s9027_s1 + $0x368] sm:$0xff]  ;;  %v422_v0 = vrot.slane %v5986_v59, 1 }
  0x79   : > { %1234 = vmatpush2.msra.mxu1 %v623_v43  ;;  %826 = vmatmul.mubr.f32.gmra.mxu0 %v5878_v10  ;;  %9250 = vst [vmem:[#allocation51_spill] sm:$0xff] %v6400_v26  ;;  %v418_v43 = vrot.slane %v5953_v40, 1 }
  0x7a   : > { %1236 = vmatmul.mubr.f32.vlgmr.msra.gmra.mxu1 %v6308_v54  ;;  %5067 = vmatpush3.msra.mxu0 %v650_v56  ;;  %v417_v56 = vrot.slane %v5950_v39, 1 }
  0x7b   : > { %830 = vmatprep.mubr.f32.mxu0 %v6372_v52  ;;  %1240 = vmatprep.mubr.f32.mxu1 %v386_v2 }
  0x7c   : > { %5068 = vmatprep.subr.mxu0 %v649_v33  ;;  %1687 = vmatprep.subr.mxu1 %v6368_v16  ;;  %v6416_v2 = vsel %vm381_vm1, %v417_v56, %v418_v43 }
  0x7d   : > { %831 = vmatmul.mubr.f32.gmra.mxu0 %v5881_v11  ;;  %1688 = vmatpush1.msra.mxu1 %v4554_v42  ;;  %9251 = vst [vmem:[#allocation52_spill] sm:$0xff] %v6416_v2  ;;  %v4551_v42 = vld [vmem:[%s9027_s1 + $0x360] sm:$0xff] }
  0x7e   : > { %1241 = vmatmul.mubr.f32.gmra.mxu1 %v6311_v35  ;;  %835 = vmatprep.mubr.f32.mxu0 %v6385_v13 }
  0x7f   : > { %1245 = vmatprep.mubr.f32.mxu1 %v6072_v58  ;;  %5069 = vmatpush3.msra.mxu0 %v649_v33  ;;  %v420_v33 = vrot.slane %v5965_v46, 1  ;;  %v5471_v58 = vld [vmem:[%s5733_s10 + $0x48] sm:$0xff] }
  0x80   : > { %5070 = vmatprep.subr.mxu0 %v648_v12  ;;  %1689 = vmatprep.subr.mxu1 %v6368_v16 }
  0x81   : > { %836 = vmatmul.mubr.f32.gmra.mxu0 %v5914_v22  ;;  %1690 = vmatpush1.msra.mxu1 %v4553_v36  ;;  %v6431_v46 = vsel %vm381_vm1, %v418_v43, %v420_v33  ;;  %v4550_v36 = vld [vmem:[%s9027_s1 + $0x358] sm:$0xff]  ;;  %v425_v43 = vrot.slane %v6001_v4, 1  ;;  %v428_v33 = vrot.slane %v6026_v19, 1 }
  0x82   : > { %1246 = vmatmul.mubr.f32.gmra.mxu1 %v5747_v27  ;;  %840 = vmatprep.mubr.f32.mxu0 %v6400_v26  ;;  %v646_v27 = vld [vmem:[%s9027_s1 + $0x138] sm:$0xff]  ;;  %9252 = vst [vmem:[#allocation53_spill] sm:$0xff] %v6431_v46 }
  0x83   : > { %1250 = vmatprep.mubr.f32.mxu1 %v6111_v47  ;;  %5071 = vmatpush3.msra.mxu0 %v648_v12  ;;  %v423_v12 = vrot.slane %v5989_v60, 1  ;;  %v4574_v47 = vld [vmem:[%s9027_s1 + $0x418] sm:$0xff] }
  0x84   : > { %5072 = vmatprep.subr.mxu0 %v647_v14  ;;  %1691 = vmatprep.subr.mxu1 %v6368_v16 }
  0x85   : > { %841 = vmatmul.mubr.f32.gmra.mxu0 %v5917_v23  ;;  %1692 = vmatpush1.msra.mxu1 %v4552_v3  ;;  %v6447_v56 = vsel %vm381_vm1, %v422_v0, %v423_v12  ;;  %v6462_v4 = vsel %vm381_vm1, %v423_v12, %v425_v43  ;;  %v427_v3 = vrot.slane %v6023_v17, 1  ;;  %v430_v0 = vrot.slane %v6037_v24, 1  ;;  %v4547_v12 = vld [vmem:[%s9027_s1 + $0x340] sm:$0xff] }
  0x86   : > { %1251 = vmatmul.mubr.f32.gmra.mxu1 %v5750_v28  ;;  %845 = vmatprep.mubr.f32.mxu0 %v6416_v2  ;;  %v645_v28 = vld [vmem:[%s9027_s1 + $0x130] sm:$0xff]  ;;  %9253 = vst [vmem:[#allocation54_spill] sm:$0xff] %v6447_v56  ;;  %9254 = vst [vmem:[#allocation55_spill] sm:$0xff] %v6462_v4 }
  0x87   : > { %1255 = vmatprep.mubr.f32.mxu1 %v6131_v8  ;;  %5073 = vmatpush3.msra.mxu0 %v647_v14  ;;  %v4549_v14 = vld [vmem:[%s9027_s1 + $0x350] sm:$0xff]  ;;  %v6493_v24 = vsel %vm381_vm1, %v428_v33, %v430_v0 }
  0x88   : > { %5074 = vmatprep.subr.mxu0 %v646_v27  ;;  %1693 = vmatprep.subr.mxu1 %v6368_v16  ;;  %9256 = vst [vmem:[#allocation57_spill] sm:$0xff] %v6493_v24 }
  0x89   : > { %846 = vmatmul.mubr.f32.gmra.mxu0 %v5950_v39  ;;  %1694 = vmatpush1.msra.mxu1 %v4551_v42  ;;  %v6478_v42 = vsel %vm381_vm1, %v427_v3, %v428_v33  ;;  %v437_v33 = vrot.slane %v6092_v20, 1 }
  0x8a   : > { %1256 = vmatmul.mubr.f32.gmra.mxu1 %v5773_v37  ;;  %850 = vmatprep.mubr.f32.mxu0 %v6431_v46  ;;  %v644_v37 = vld [vmem:[%s9027_s1 + $0x128] sm:$0xff]  ;;  %9255 = vst [vmem:[#allocation56_spill] sm:$0xff] %v6478_v42 }
  0x8b   : > { %1260 = vmatprep.mubr.f32.mxu1 %v6182_v34  ;;  %5075 = vmatpush3.msra.mxu0 %v646_v27  ;;  %v4548_v27 = vld [vmem:[%s9027_s1 + $0x348] sm:$0xff] }
  0x8c   : > { %5076 = vmatprep.subr.mxu0 %v645_v28  ;;  %1695 = vmatprep.subr.mxu1 %v6368_v16 }
  0x8d   : > { %851 = vmatmul.mubr.f32.gmra.mxu0 %v5953_v40  ;;  %1696 = vmatpush1.msra.mxu1 %v4550_v36  ;;  %v433_v36 = vrot.slane %v6064_v55, 1 }
  0x8e   : > { %1261 = vmatmul.mubr.f32.gmra.mxu1 %v5776_v38  ;;  %855 = vmatprep.mubr.f32.mxu0 %v6447_v56  ;;  %v643_v38 = vld [vmem:[%s9027_s1 + $0x120] sm:$0xff] }
  0x8f   : > { %1265 = vmatprep.mubr.f32.mxu1 %v6203_v41  ;;  %5077 = vmatpush3.msra.mxu0 %v645_v28  ;;  %v432_v28 = vrot.slane %v6061_v51, 1 }
  0x90   : > { %5078 = vmatprep.subr.mxu0 %v644_v37  ;;  %1697 = vmatprep.subr.mxu1 %v6368_v16 }
  0x91   : > { %856 = vmatmul.mubr.f32.gmra.mxu0 %v5986_v59  ;;  %1698 = vmatpush1.msra.mxu1 %v4549_v14  ;;  %v6506_v43 = vsel %vm381_vm1, %v432_v28, %v433_v36  ;;  %v4545_v14 = vld [vmem:[%s9027_s1 + $0x330] sm:$0xff]  ;;  %v443_v28 = vrot.slane %v6138_v21, 1 }
  0x92   : > { %1266 = vmatmul.mubr.f32.gmra.mxu1 %v5805_v49  ;;  %860 = vmatprep.mubr.f32.mxu0 %v6462_v4  ;;  %v642_v49 = vld [vmem:[%s9027_s1 + $0x118] sm:$0xff]  ;;  %9257 = vst [vmem:[#allocation58_spill] sm:$0xff] %v6506_v43 }
  0x93   : > { %1270 = vmatprep.mubr.f32.mxu1 %v6254_v25  ;;  %5079 = vmatpush3.msra.mxu0 %v644_v37  ;;  %v435_v37 = vrot.slane %v6075_v63, 1  ;;  %v4544_v63 = vld [vmem:[%s9027_s1 + $0x328] sm:$0xff] }
  0x94   : > { %1699 = vmatprep.subr.mxu1 %v6368_v16  ;;  %5080 = vmatprep.subr.mxu0 %v643_v38 }
  0x95   : > { %861 = vmatmul.mubr.f32.gmra.mxu0 %v5989_v60  ;;  %1700 = vmatpush1.msra.mxu1 %v4548_v27  ;;  %v6525_v3 = vsel %vm381_vm1, %v433_v36, %v435_v37  ;;  %v4543_v27 = vld [vmem:[%s9027_s1 + $0x320] sm:$0xff]  ;;  %v4541_v36 = vld [vmem:[%s9027_s1 + $0x310] sm:$0xff] }
  0x96   : > { %1271 = vmatmul.mubr.f32.gmra.mxu1 %v5808_v50  ;;  %865 = vmatprep.mubr.f32.mxu0 %v6478_v42  ;;  %v4546_v50 = vld [vmem:[%s9027_s1 + $0x338] sm:$0xff]  ;;  %9258 = vst [vmem:[#allocation59_spill] sm:$0xff] %v6525_v3 }
  0x97   : > { %1275 = vmatprep.mubr.f32.mxu1 %v6275_v53  ;;  %5081 = vmatpush3.msra.mxu0 %v643_v38  ;;  %v438_v38 = vrot.slane %v6095_v29, 1 }
  0x98   : > { %1701 = vmatprep.subr.mxu1 %v6368_v16  ;;  %5082 = vmatprep.subr.mxu0 %v642_v49 }
  0x99   : > { %866 = vmatmul.mubr.f32.gmra.mxu0 %v6023_v17  ;;  %1702 = vmatpush1.msra.mxu1 %v4547_v12  ;;  %v6541_v0 = vsel %vm381_vm1, %v437_v33, %v438_v38  ;;  %v448_v33 = vrot.slane %v6167_v32, 1 }
  0x9a   : > { %1276 = vmatmul.mubr.f32.gmra.mxu1 %v5842_v61  ;;  %870 = vmatprep.mubr.f32.mxu0 %v6493_v24  ;;  %v641_v61 = vld [vmem:[%s9027_s1 + $0x110] sm:$0xff]  ;;  %9259 = vst [vmem:[#allocation60_spill] sm:$0xff] %v6541_v0 }
  0x9b   : > { %1280 = vmatprep.mubr.f32.mxu1 %v6326_v45  ;;  %1703 = vmatprep.subr.mxu1 %v6368_v16 }
  0x9c   : > { %1704 = vmatpush1.msra.mxu1 %v4546_v50  ;;  %5083 = vmatpush3.msra.mxu0 %v642_v49  ;;  %v440_v49 = vrot.slane %v6116_v7, 1  ;;  %v442_v7 = vrot.slane %v6135_v15, 1  ;;  %v4540_v50 = vld [vmem:[%s9027_s1 + $0x308] sm:$0xff] }
  0x9d   : > { %871 = vmatmul.mubr.f32.gmra.mxu0 %v6026_v19  ;;  %1705 = vmatprep.subr.mxu1 %v6368_v16 }
  0x9e   : > { %1281 = vmatmul.mubr.f32.gmra.mxu1 %v5845_v62  ;;  %875 = vmatprep.mubr.f32.mxu0 %v6506_v43  ;;  %v640_v62 = vld [vmem:[%s9027_s1 + $0x108] sm:$0xff]  ;;  %v6553_v12 = vsel %vm381_vm1, %v438_v38, %v440_v49  ;;  %v6573_v37 = vsel %vm381_vm1, %v442_v7, %v443_v28  ;;  %v452_v49 = vrot.slane %v6207_v48, 1 }
  0x9f   : > { %1285 = vmatprep.mubr.f32.mxu1 %v6347_v5  ;;  %1706 = vmatpush1.msra.mxu1 %v4545_v14  ;;  %9260 = vst [vmem:[#allocation61_spill] sm:$0xff] %v6553_v12  ;;  %9261 = vst [vmem:[#allocation62_spill] sm:$0xff] %v6573_v37  ;;  %v445_v14 = vrot.slane %v6148_v31, 1  ;;  %v4539_v31 = vld [vmem:[%s9027_s1 + $0x300] sm:$0xff] }
  0xa0   : > { %1707 = vmatprep.subr.mxu1 %v6368_v16  ;;  %5084 = vmatprep.subr.mxu0 %v641_v61 }
  0xa1   : > { %876 = vmatmul.mubr.f32.gmra.mxu0 %v6061_v51  ;;  %1708 = vmatpush1.msra.mxu1 %v4544_v63  ;;  %v447_v63 = vrot.slane %v6164_v9, 1 }
  0xa2   : > { %1286 = vmatmul.mubr.f32.gmra.mxu1 %v5878_v10  ;;  %880 = vmatprep.mubr.f32.mxu0 %v6525_v3  ;;  %v4542_v10 = vld [vmem:[%s9027_s1 + $0x318] sm:$0xff] }
  0xa3   : > { %1290 = vmatprep.mubr.f32.mxu1 %v6372_v52  ;;  %5085 = vmatpush3.msra.mxu0 %v641_v61  ;;  %v6590_v61 = vsel %vm381_vm1, %v443_v28, %v445_v14  ;;  %v6604_v38 = vsel %vm381_vm1, %v447_v63, %v448_v33  ;;  %v455_v28 = vrot.slane %v6220_v44, 1  ;;  %v9268_v14 = vld [vmem:[#allocation34_spill] sm:$0xff] }
  0xa4   : > { %1709 = vmatprep.subr.mxu1 %v6368_v16  ;;  %5086 = vmatprep.subr.mxu0 %v640_v62  ;;  %9262 = vst [vmem:[#allocation63_spill] sm:$0xff] %v6590_v61  ;;  %9263 = vst [vmem:[#allocation64_spill] sm:$0xff] %v6604_v38 }
  0xa5   : > { %881 = vmatmul.mubr.f32.gmra.mxu0 %v6064_v55  ;;  %1710 = vmatpush1.msra.mxu1 %v4543_v27  ;;  %v4569_v27 = vld [vmem:[%s9027_s1 + $0x3f0] sm:$0xff] }
  0xa6   : > { %1291 = vmatmul.mubr.f32.gmra.mxu1 %v5881_v11  ;;  %885 = vmatprep.mubr.f32.mxu0 %v6541_v0  ;;  %v639_v11 = vld [vmem:[%s9027_s1 + $0x100] sm:$0xff] }
  0xa7   : > { %1295 = vmatprep.mubr.f32.mxu1 %v6385_v13  ;;  %1711 = vmatprep.subr.mxu1 %v6368_v16 }
  0xa8   : > { %1712 = vmatpush1.msra.mxu1 %v4542_v10  ;;  %5087 = vmatpush3.msra.mxu0 %v640_v62  ;;  %v450_v62 = vrot.slane %v6187_v30, 1  ;;  %v453_v10 = vrot.slane %v6210_v18, 1 }
  0xa9   : > { %886 = vmatmul.mubr.f32.gmra.mxu0 %v6092_v20  ;;  %1713 = vmatprep.subr.mxu1 %v6368_v16 }
  0xaa   : > { %1296 = vmatmul.mubr.f32.gmra.mxu1 %v5914_v22  ;;  %890 = vmatprep.mubr.f32.mxu0 %v6553_v12  ;;  %v6581_v22 = vld [vmem:[%s9027_s1 + $0x478] sm:$0xff]  ;;  %v6620_v30 = vsel %vm381_vm1, %v448_v33, %v450_v62  ;;  %v6633_v7 = vsel %vm381_vm1, %v452_v49, %v453_v10  ;;  %v6649_v44 = vsel %vm381_vm1, %v453_v10, %v455_v28  ;;  %v9270_v33 = vld [vmem:[#allocation37_spill] sm:$0xff]  ;;  %v9273_v10 = vld [vmem:[#allocation42_spill] sm:$0xff] }
  0xab   : > { %1300 = vmatprep.mubr.f32.mxu1 %v6400_v26  ;;  %1714 = vmatpush1.msra.mxu1 %v4541_v36  ;;  %9264 = vst [vmem:[#allocation65_spill] sm:$0xff] %v6620_v30  ;;  %9265 = vst [vmem:[#allocation66_spill] sm:$0xff] %v6633_v7  ;;  %v4566_v36 = vld [vmem:[%s9027_s1 + $0x3d8] sm:$0xff]  ;;  %v4563_v62 = vld [vmem:[%s9027_s1 + $0x3c0] sm:$0xff] }
  0xac   : > { %1715 = vmatprep.subr.mxu1 %v6368_v16  ;;  %5088 = vmatprep.subr.mxu0 %v639_v11  ;;  %9266 = vst [vmem:[#allocation67_spill] sm:$0xff] %v6649_v44 }
  0xad   : > { %891 = vmatmul.mubr.f32.gmra.mxu0 %v6095_v29  ;;  %1716 = vmatpush1.msra.mxu1 %v4540_v50 }
  0xae   : > { %1301 = vmatmul.mubr.f32.gmra.mxu1 %v5917_v23  ;;  %895 = vmatprep.mubr.f32.mxu0 %v6573_v37  ;;  %v4570_v23 = vld [vmem:[%s9027_s1 + $0x3f8] sm:$0xff] }
  0xaf   : > { %1305 = vmatprep.mubr.f32.mxu1 %v6416_v2  ;;  %5089 = vmatpush3.msra.mxu0 %v639_v11  ;;  %v9267_v11 = vld [vmem:[#allocation33_spill] sm:$0xff] }
  0xb0   : > { %1717 = vmatprep.subr.mxu1 %v6368_v16  ;;  %5138 = vmatprep.subr.mxu0 %v6581_v22  ;;  %v457_v50 = vrot.slane %v9267_v11, 1 }
  0xb1   : > { %896 = vmatmul.mubr.f32.gmra.mxu0 %v6135_v15  ;;  %1718 = vmatpush1.msra.mxu1 %v4539_v31  ;;  %v458_v31 = vrot.slane %v9268_v14, 1 }
  0xb2   : > { %1306 = vmatmul.mubr.f32.gmra.mxu1 %v5950_v39  ;;  %900 = vmatprep.mubr.f32.mxu0 %v6590_v61  ;;  %v4568_v39 = vld [vmem:[%s9027_s1 + $0x3e8] sm:$0xff] }
  0xb3   : > { %1310 = vmatprep.mubr.f32.mxu1 %v6431_v46  ;;  %1719 = vmatprep.subr.mxu1 %v6368_v16  ;;  %v6662_v63 = vsel %vm381_vm1, %v457_v50, %v458_v31  ;;  %v4560_v50 = vld [vmem:[%s9027_s1 + $0x3a8] sm:$0xff] }
  0xb4   : > { %1720 = vmatpush2.msra.mxu1 %v4570_v23  ;;  %9269 = vst [vmem:[#allocation33_spill] sm:$0xff] %v6662_v63  ;;  %v460_v23 = vrot.slane %v9270_v33, 1  ;;  %v496_v33 = vrot.slane %v6311_v35, 2  ;;  %v4557_v35 = vld [vmem:[%s9027_s1 + $0x390] sm:$0xff] }
  0xb5   : > { %901 = vmatmul.mubr.f32.gmra.mxu0 %v6138_v21  ;;  %1721 = vmatprep.subr.mxu1 %v6368_v16 }
  0xb6   : > { %1311 = vmatmul.mubr.f32.gmra.mxu1 %v5953_v40  ;;  %905 = vmatprep.mubr.f32.mxu0 %v6604_v38  ;;  %v4567_v40 = vld [vmem:[%s9027_s1 + $0x3e0] sm:$0xff] }
  0xb7   : > { %1315 = vmatprep.mubr.f32.mxu1 %v6447_v56  ;;  %1722 = vmatpush2.msra.mxu1 %v4569_v27  ;;  %v6678_v27 = vsel %vm381_vm1, %v458_v31, %v460_v23  ;;  %v498_v23 = vrot.slane %v6339_v57, 2  ;;  %v4556_v57 = vld [vmem:[%s9027_s1 + $0x388] sm:$0xff] }
  0xb8   : > { %1723 = vmatprep.subr.mxu1 %v6368_v16  ;;  %9271 = vst [vmem:[#allocation34_spill] sm:$0xff] %v6678_v27 }
  0xb9   : > { %906 = vmatmul.mubr.f32.gmra.mxu0 %v6164_v9  ;;  %1724 = vmatpush2.msra.mxu1 %v4568_v39  ;;  %v9272_v39 = vld [vmem:[#allocation41_spill] sm:$0xff] }
  0xba   : > { %1316 = vmatmul.mubr.f32.gmra.mxu1 %v5986_v59  ;;  %910 = vmatprep.mubr.f32.mxu0 %v6620_v30  ;;  %v4565_v59 = vld [vmem:[%s9027_s1 + $0x3d0] sm:$0xff]  ;;  %v658_v49 = vrot.slane %v9272_v39, 1 }
  0xbb   : > { %1320 = vmatprep.mubr.f32.mxu1 %v6462_v4  ;;  %1725 = vmatprep.subr.mxu1 %v6368_v16 }
  0xbc   : > { %1726 = vmatpush2.msra.mxu1 %v4567_v40  ;;  %v659_v40 = vrot.slane %v9273_v10, 1 }
  0xbd   : > { %911 = vmatmul.mubr.f32.gmra.mxu0 %v6167_v32  ;;  %1727 = vmatprep.subr.mxu1 %v6368_v16 }
  0xbe   : > { %1321 = vmatmul.mubr.f32.gmra.mxu1 %v5989_v60  ;;  %915 = vmatprep.mubr.f32.mxu0 %v6633_v7  ;;  %v4564_v60 = vld [vmem:[%s9027_s1 + $0x3c8] sm:$0xff]  ;;  %v6691_v28 = vsel %vm381_vm1, %v658_v49, %v659_v40 }
  0xbf   : > { %1325 = vmatprep.mubr.f32.mxu1 %v6478_v42  ;;  %1728 = vmatpush2.msra.mxu1 %v4566_v36  ;;  %9274 = vst [vmem:[#allocation37_spill] sm:$0xff] %v6691_v28  ;;  %v9275_v36 = vld [vmem:[#allocation44_spill] sm:$0xff]  ;;  %v4584_v49 = vld [vmem:[%s9027_s1 + $0x468] sm:$0xff] }
  0xc0   : > { %1729 = vmatprep.subr.mxu1 %v6368_v16 }
  0xc1   : > { %916 = vmatmul.mubr.f32.gmra.mxu0 %v6207_v48  ;;  %1730 = vmatpush2.msra.mxu1 %v4565_v59  ;;  %v661_v59 = vrot.slane %v9275_v36, 1  ;;  %v9283_v36 = vld [vmem:[#allocation9_spill] sm:$0xff] }
  0xc2   : > { %1326 = vmatmul.mubr.f32.gmra.mxu1 %v6023_v17  ;;  %920 = vmatprep.mubr.f32.mxu0 %v6649_v44  ;;  %v4562_v17 = vld [vmem:[%s9027_s1 + $0x3b8] sm:$0xff] }
  0xc3   : > { %1330 = vmatprep.mubr.f32.mxu1 %v6493_v24  ;;  %1731 = vmatprep.subr.mxu1 %v6368_v16  ;;  %v6707_v31 = vsel %vm381_vm1, %v659_v40, %v661_v59  ;;  %v9281_v40 = vld [vmem:[#allocation7_spill] sm:$0xff] }
  0xc4   : > { %1732 = vmatpush2.msra.mxu1 %v4564_v60  ;;  %9276 = vst [vmem:[#allocation41_spill] sm:$0xff] %v6707_v31  ;;  %v495_v60 = vrot.slane %v6308_v54, 2  ;;  %v4581_v59 = vld [vmem:[%s9027_s1 + $0x450] sm:$0xff] }
  0xc5   : > { %921 = vmatmul.mubr.f32.gmra.mxu0 %v6210_v18  ;;  %1733 = vmatprep.subr.mxu1 %v6368_v16 }
  0xc6   : > { %1331 = vmatmul.mubr.f32.gmra.mxu1 %v6026_v19  ;;  %925 = vmatprep.mubr.f32.mxu0 %v6662_v63  ;;  %v4561_v19 = vld [vmem:[%s9027_s1 + $0x3b0] sm:$0xff]  ;;  %v497_v54 = vsel %vm494_vm0, %v495_v60, %v496_v33 }
  0xc7   : > { %1335 = vmatprep.mubr.f32.mxu1 %v6506_v43  ;;  %1734 = vmatpush2.msra.mxu1 %v4563_v62  ;;  %v4585_v62 = vld [vmem:[%s9027_s1 + $0x470] sm:$0xff] }
  0xc8   : > { %1735 = vmatprep.subr.mxu1 %v6368_v16 }
  0xc9   : > { %926 = vmatmul.mubr.f32.gmra.mxu0 %v9267_v11  ;;  %1736 = vmatpush2.msra.mxu1 %v4562_v17  ;;  %v9277_v17 = vld [vmem:[#allocation3_spill] sm:$0xff] }
  0xca   : > { %1336 = vmatmul.mubr.f32.gmra.mxu1 %v6061_v51  ;;  %930 = vmatprep.mubr.f32.mxu0 %v6678_v27  ;;  %v4559_v51 = vld [vmem:[%s9027_s1 + $0x3a0] sm:$0xff] }
  0xcb   : > { %1340 = vmatprep.mubr.f32.mxu1 %v6525_v3  ;;  %1737 = vmatprep.subr.mxu1 %v6368_v16 }
  0xcc   : > { %1738 = vmatpush2.msra.mxu1 %v4561_v19  ;;  %v4582_v19 = vld [vmem:[%s9027_s1 + $0x458] sm:$0xff] }
  0xcd   : > { %931 = vmatmul.mubr.f32.gmra.mxu0 %v9268_v14  ;;  %1739 = vmatprep.subr.mxu1 %v6368_v16 }
  0xce   : > { %1341 = vmatmul.mubr.f32.gmra.mxu1 %v6064_v55  ;;  %935 = vmatprep.mubr.f32.mxu0 %v6691_v28  ;;  %v4558_v55 = vld [vmem:[%s9027_s1 + $0x398] sm:$0xff] }
  0xcf   : > { %1345 = vmatprep.mubr.f32.mxu1 %v6541_v0  ;;  %1740 = vmatpush2.msra.mxu1 %v4560_v50  ;;  %v9285_v50 = vld [vmem:[#allocation11_spill] sm:$0xff] }
  0xd0   : > { %1741 = vmatprep.subr.mxu1 %v6368_v16 }
  0xd1   : > { %936 = vmatmul.mubr.f32.gmra.mxu0 %v9272_v39  ;;  %1742 = vmatpush2.msra.mxu1 %v4559_v51  ;;  %v9278_v39 = vld [vmem:[#allocation4_spill] sm:$0xff]  ;;  %v4580_v51 = vld [vmem:[%s9027_s1 + $0x448] sm:$0xff] }
  0xd2   : > { %1346 = vmatmul.mubr.f32.gmra.mxu1 %v6092_v20  ;;  %940 = vmatprep.mubr.f32.mxu0 %v6707_v31  ;;  %v499_v20 = vsel %vm494_vm0, %v496_v33, %v498_v23  ;;  %v4579_v23 = vld [vmem:[%s9027_s1 + $0x440] sm:$0xff]  ;;  %v5472_v31 = vld [vmem:[%s5733_s10 + $0x50] sm:$0xff] }
  0xd3   : > { %1350 = vmatprep.mubr.f32.mxu1 %v6553_v12  ;;  %1743 = vmatprep.subr.mxu1 %v6368_v16 }
  0xd4   : > { %1744 = vmatpush2.msra.mxu1 %v4558_v55  ;;  %v9288_v55 = vld [vmem:[#allocation14_spill] sm:$0xff] }
  0xd5   : > { %941 = vmatmul.mubr.f32.gmra.mxu0 %v9273_v10  ;;  %1745 = vmatprep.subr.mxu1 %v6368_v16  ;;  %v4583_v10 = vld [vmem:[%s9027_s1 + $0x460] sm:$0xff] }
  0xd6   : > { %1351 = vmatmul.mubr.f32.gmra.mxu1 %v6095_v29  ;;  %5090 = vmatprep.mubr.f32.mxu0 %v497_v54  ;;  %v4555_v29 = vld [vmem:[%s9027_s1 + $0x380] sm:$0xff] }
  0xd7   : > { %1355 = vmatprep.mubr.f32.mxu1 %v6573_v37  ;;  %1746 = vmatpush2.msra.mxu1 %v4557_v35 }
  0xd8   : > { %1747 = vmatprep.subr.mxu1 %v6368_v16 }
  0xd9   : > { %5091 = vmatmul.mubr.f32.vlgmr.msra.gmra.mxu0 %v499_v20  ;;  %1748 = vmatpush2.msra.mxu1 %v4556_v57  ;;  %v9290_v20 = vld [vmem:[#allocation16_spill] sm:$0xff] }
  0xda   : > { %1356 = vmatmul.mubr.f32.gmra.mxu1 %v6135_v15  ;;  %5139 = vmatpush3.msra.mxu0 %v6581_v22  ;;  %v9279_v15 = vld [vmem:[#allocation5_spill] sm:$0xff]  ;;  %v9280_v22 = vld [vmem:[#allocation6_spill] sm:$0xff]  ;;  %v4578_v57 = vld [vmem:[%s9027_s1 + $0x438] sm:$0xff] }
  0xdb   : > { %1360 = vmatprep.mubr.f32.mxu1 %v6590_v61  ;;  %5093 = vmatprep.mubr.f32.mxu0 %v9277_v17  ;;  %v4577_v17 = vld [vmem:[%s9027_s1 + $0x430] sm:$0xff] }
  0xdc   : > { %5140 = vmatprep.subr.mxu0 %v4585_v62  ;;  %1749 = vmatprep.subr.mxu1 %v6368_v16 }
  0xdd   : > { %5094 = vmatmul.mubr.f32.gmra.mxu0 %v9278_v39  ;;  %1750 = vmatpush2.msra.mxu1 %v4555_v29  ;;  %v9292_v29 = vld [vmem:[#allocation18_spill] sm:$0xff] }
  0xde   : > { %1361 = vmatmul.mubr.f32.gmra.mxu1 %v6138_v21  ;;  %5141 = vmatpush3.msra.mxu0 %v4585_v62  ;;  %v9282_v21 = vld [vmem:[#allocation8_spill] sm:$0xff] }
  0xdf   : > { %1365 = vmatprep.mubr.f32.mxu1 %v6604_v38  ;;  %5096 = vmatprep.mubr.f32.mxu0 %v9279_v15  ;;  %v5475_v38 = vld [vmem:[%s5733_s10 + $0x78] sm:$0xff] }
  0xe0   : > { %5142 = vmatprep.subr.mxu0 %v4584_v49 }
  0xe1   : > { %5097 = vmatmul.mubr.f32.gmra.mxu0 %v9280_v22 }
  0xe2   : > { %1366 = vmatmul.mubr.f32.gmra.mxu1 %v6164_v9  ;;  %5143 = vmatpush3.msra.mxu0 %v4584_v49  ;;  %v9284_v9 = vld [vmem:[#allocation10_spill] sm:$0xff]  ;;  %v5469_v49 = vld [vmem:[%s5733_s10 + $0x30] sm:$0xff] }
  0xe3   : > { %1370 = vmatprep.mubr.f32.mxu1 %v6620_v30  ;;  %5099 = vmatprep.mubr.f32.mxu0 %v9281_v40  ;;  %v5474_v30 = vld [vmem:[%s5733_s10 + $0x68] sm:$0xff] }
  0xe4   : > { %5144 = vmatprep.subr.mxu0 %v4583_v10 }
  0xe5   : > { %5100 = vmatmul.mubr.f32.gmra.mxu0 %v9282_v21 }
  0xe6   : > { %1371 = vmatmul.mubr.f32.gmra.mxu1 %v6167_v32  ;;  %5145 = vmatpush3.msra.mxu0 %v4583_v10  ;;  %v9286_v32 = vld [vmem:[#allocation12_spill] sm:$0xff] }
  0xe7   : > { %1375 = vmatprep.mubr.f32.mxu1 %v6633_v7  ;;  %5102 = vmatprep.mubr.f32.mxu0 %v9283_v36 }
  0xe8   : > { %5146 = vmatprep.subr.mxu0 %v4582_v19 }
  0xe9   : > { %5103 = vmatmul.mubr.f32.gmra.mxu0 %v9284_v9 }
  0xea   : > { %1376 = vmatmul.mubr.f32.gmra.mxu1 %v6207_v48  ;;  %5147 = vmatpush3.msra.mxu0 %v4582_v19  ;;  %v9287_v48 = vld [vmem:[#allocation13_spill] sm:$0xff] }
  0xeb   : > { %1380 = vmatprep.mubr.f32.mxu1 %v6649_v44  ;;  %5105 = vmatprep.mubr.f32.mxu0 %v9285_v50  ;;  %v9294_v19 = vld [vmem:[#allocation21_spill] sm:$0xff]  ;;  %v4572_v44 = vld [vmem:[%s9027_s1 + $0x408] sm:$0xff] }
  0xec   : > { %5148 = vmatprep.subr.mxu0 %v4581_v59 }
  0xed   : > { %5106 = vmatmul.mubr.f32.gmra.mxu0 %v9286_v32  ;;  %v6777_v60 = vpop.f32.mrf.mxu1 }
  0xee   : > { %1381 = vmatmul.mubr.f32.gmra.mxu1 %v6210_v18  ;;  %5149 = vmatpush3.msra.mxu0 %v4581_v59  ;;  %v9289_v18 = vld [vmem:[#allocation15_spill] sm:$0xff]  ;;  %v4576_v59 = vld [vmem:[%s9027_s1 + $0x428] sm:$0xff] }
  0xef   : > { %1385 = vmatprep.mubr.f32.mxu1 %v6662_v63  ;;  %5108 = vmatprep.mubr.f32.mxu0 %v9287_v48  ;;  %v6782_v33 = vpop.f32.mrf.mxu1  ;;  %v5473_v63 = vld [vmem:[%s5733_s10 + $0x60] sm:$0xff] }
  0xf0   : > { %5150 = vmatprep.subr.mxu0 %v4580_v51 }
  0xf1   : > { %5109 = vmatmul.mubr.f32.gmra.mxu0 %v9288_v55 }
  0xf2   : > { %1386 = vmatmul.mubr.f32.gmra.mxu1 %v9267_v11  ;;  %5151 = vmatpush3.msra.mxu0 %v4580_v51  ;;  %v6789_v54 = vpop.f32.mrf.mxu1  ;;  %v9291_v11 = vld [vmem:[#allocation17_spill] sm:$0xff]  ;;  %v5470_v51 = vld [vmem:[%s5733_s10 + $0x38] sm:$0xff] }
  0xf3   : > { %1390 = vmatprep.mubr.f32.mxu1 %v6678_v27  ;;  %5111 = vmatprep.mubr.f32.mxu0 %v9289_v18  ;;  %v4573_v27 = vld [vmem:[%s9027_s1 + $0x410] sm:$0xff] }
  0xf4   : > { %5152 = vmatprep.subr.mxu0 %v4579_v23  ;;  %v6793_v35 = vpop.f32.mrf.mxu1 }
  0xf5   : > { %5112 = vmatmul.mubr.f32.gmra.mxu0 %v9290_v20 }
  0xf6   : > { %1391 = vmatmul.mubr.f32.gmra.mxu1 %v9268_v14  ;;  %5153 = vmatpush3.msra.mxu0 %v4579_v23  ;;  %v9293_v14 = vld [vmem:[#allocation20_spill] sm:$0xff] }
  0xf7   : > { %5114 = vmatprep.mubr.f32.mxu0 %v9291_v11  ;;  %1751 = vmatprep.mubr.f32.mxu1 %v6131_v8  ;;  %v6802_v62 = vpop.f32.mrf.mxu1  ;;  %v4575_v8 = vld [vmem:[%s9027_s1 + $0x420] sm:$0xff] }
  0xf8   : > { %5154 = vmatprep.subr.mxu0 %v4578_v57 }
  0xf9   : > { %5115 = vmatmul.mubr.f32.gmra.mxu0 %v9292_v29  ;;  %v6808_v39 = vpop.f32.mrf.mxu1 }
  0xfa   : > { %1752 = vmatmul.mubr.f32.vlgmr.msra.gmra.mxu1 %v5469_v49  ;;  %5155 = vmatpush3.msra.mxu0 %v4578_v57  ;;  %v9295_v57 = vld [vmem:[#allocation23_spill] sm:$0xff]  ;;  %v9296_v49 = vld [vmem:[#allocation24_spill] sm:$0xff] }
  0xfb   : > { %5117 = vmatprep.mubr.f32.mxu0 %v9293_v14  ;;  %1756 = vmatprep.mubr.f32.mxu1 %v6182_v34 }
  0xfc   : > { %5156 = vmatprep.subr.mxu0 %v4577_v17  ;;  %v6813_v10 = vpop.f32.mrf.mxu1 }
  0xfd   : > { %5118 = vmatmul.mubr.f32.gmra.mxu0 %v9294_v19 }
  0xfe   : > { %1757 = vmatmul.mubr.f32.gmra.mxu1 %v5470_v51  ;;  %5157 = vmatpush3.msra.mxu0 %v4577_v17  ;;  %v6820_v23 = vpop.f32.mrf.mxu1  ;;  %v9297_v17 = vld [vmem:[#allocation26_spill] sm:$0xff] }
  0xff   : > { %5120 = vmatprep.mubr.f32.mxu0 %v9295_v57  ;;  %1761 = vmatprep.mubr.f32.mxu1 %v6203_v41  ;;  %v9298_v41 = vld [vmem:[#allocation27_spill] sm:$0xff] }
 0x100   : > { %5158 = vmatprep.subr.mxu0 %v4576_v59 }
 0x101   : > { %5121 = vmatmul.mubr.f32.gmra.mxu0 %v9296_v49  ;;  %v6828_v34 = vpop.f32.mrf.mxu1 }
 0x102   : > { %1762 = vmatmul.mubr.f32.gmra.mxu1 %v5471_v58  ;;  %5159 = vmatpush3.msra.mxu0 %v4576_v59  ;;  %v9299_v58 = vld [vmem:[#allocation29_spill] sm:$0xff] }
 0x103   : > { %5123 = vmatprep.mubr.f32.mxu0 %v9297_v17  ;;  %1766 = vmatprep.mubr.f32.mxu1 %v6254_v25  ;;  %v6833_v51 = vpop.f32.mrf.mxu1  ;;  %v9300_v25 = vld [vmem:[#allocation30_spill] sm:$0xff] }
 0x104   : > { %5160 = vmatprep.subr.mxu0 %v4575_v8 }
 0x105   : > { %5124 = vmatmul.mubr.f32.gmra.mxu0 %v9298_v41 }
 0x106   : > { %1767 = vmatmul.mubr.f32.gmra.mxu1 %v5472_v31  ;;  %5161 = vmatpush3.msra.mxu0 %v4575_v8  ;;  %v6840_v28 = vpop.f32.mrf.mxu1  ;;  %v9301_v8 = vld [vmem:[#allocation32_spill] sm:$0xff] }
 0x107   : > { %5126 = vmatprep.mubr.f32.mxu0 %v9299_v58  ;;  %1771 = vmatprep.mubr.f32.mxu1 %v6275_v53  ;;  %v9303_v53 = vld [vmem:[#allocation35_spill] sm:$0xff] }
 0x108   : > { %5162 = vmatprep.subr.mxu0 %v4574_v47  ;;  %v6844_v59 = vpop.f32.mrf.mxu1 }
 0x109   : > { %5127 = vmatmul.mubr.f32.gmra.mxu0 %v9300_v25 }
 0x10a   : > { %1772 = vmatmul.mubr.f32.gmra.mxu1 %v5473_v63  ;;  %5163 = vmatpush3.msra.mxu0 %v4574_v47  ;;  %v9304_v47 = vld [vmem:[#allocation38_spill] sm:$0xff] }
 0x10b   : > { %5129 = vmatprep.mubr.f32.mxu0 %v9301_v8  ;;  %1776 = vmatprep.mubr.f32.mxu1 %v6326_v45  ;;  %v6853_v31 = vpop.f32.mrf.mxu1  ;;  %v9306_v45 = vld [vmem:[#allocation39_spill] sm:$0xff] }
 0x10c   : > { %9302 = vst [vmem:[#allocation42_spill] sm:$0xff] %v6853_v31  ;;  %5164 = vmatprep.subr.mxu0 %v4573_v27  ;;  %v4571_v31 = vld [vmem:[%s9027_s1 + $0x400] sm:$0xff] }
 0x10d   : > { %5130 = vmatmul.mubr.f32.gmra.mxu0 %v9303_v53  ;;  %v6859_v7 = vpop.f32.mrf.mxu1 }
 0x10e   : > { %1777 = vmatmul.mubr.f32.gmra.mxu1 %v5474_v30  ;;  %5165 = vmatpush3.msra.mxu0 %v4573_v27  ;;  %v9307_v30 = vld [vmem:[#allocation43_spill] sm:$0xff] }
 0x10f   : > { %5132 = vmatprep.mubr.f32.mxu0 %v9304_v47  ;;  %1781 = vmatprep.mubr.f32.mxu1 %v6347_v5 }
 0x110   : > { %5166 = vmatprep.subr.mxu0 %v4572_v44  ;;  %v6864_v63 = vpop.f32.mrf.mxu1 }
 0x111   : > { %9305 = vst [vmem:[#allocation44_spill] sm:$0xff] %v6864_v63  ;;  %5133 = vmatmul.mubr.f32.gmra.mxu0 %v9306_v45  ;;  %v5476_v63 = vld [vmem:[%s5733_s10 + $0x80] sm:$0xff] }
 0x112   : > { %1782 = vmatmul.mubr.f32.gmra.mxu1 %v5475_v38  ;;  %5167 = vmatpush3.msra.mxu0 %v4572_v44  ;;  %v6871_v6 = vpop.f32.mrf.mxu1 }
 0x113   : > { %5135 = vmatprep.mubr.f32.mxu0 %v9307_v30  ;;  %1786 = vmatprep.mubr.f32.mxu1 %v6372_v52  ;;  %v5477_v52 = vld [vmem:[%s5733_s10 + $0x90] sm:$0xff] }
 0x114   : > { %5168 = vmatprep.subr.mxu0 %v4571_v31 }
 0x115   : > { %5136 = vmatmul.mubr.f32.gmra.mxu0 %v6315_v1  ;;  %v787_v27 = vpop.f32.mrf.mxu0  ;;  %v6876_v5 = vpop.f32.mrf.mxu1 }
 0x116   : > { %1787 = vmatmul.mubr.f32.gmra.mxu1 %v5476_v63  ;;  %5169 = vmatpush3.msra.mxu0 %v4571_v31  ;;  %v6880_v61 = vadd.f32 %v6782_v33, %v787_v27 }
 0x117   : > { %1791 = vmatprep.mubr.f32.mxu1 %v6385_v13  ;;  %5170 = vmatprep.mubr.f32.mxu0 %v9279_v15  ;;  %v789_v38 = vpop.f32.mrf.mxu0  ;;  %v6884_v44 = vpop.f32.mrf.mxu1 }
 0x118   : > { %2806 = vmatprep.subr.mxu0 %v6368_v16  ;;  %v5478_v38 = vld [vmem:[%s5733_s10 + $0x98] sm:$0xff] }
 0x119   : > { %5171 = vmatmul.mubr.f32.vlgmr.msra.gmra.mxu0 %v9280_v22 }
 0x11a   : > { %1792 = vmatmul.mubr.f32.gmra.mxu1 %v5477_v52  ;;  %5173 = vmatprep.mubr.f32.mxu0 %v9281_v40  ;;  %v792_v31 = vpop.f32.mrf.mxu0  ;;  %v6890_v63 = vpop.f32.mrf.mxu1 }
 0x11b   : > { %1796 = vmatprep.mubr.f32.mxu1 %v6400_v26  ;;  %v6894_v33 = vadd.f32 %v6777_v60, %v792_v31 }
 0x11c   : > { %v794_v15 = vpop.f32.mrf.mxu0  ;;  %v6896_v27 = vpop.f32.mrf.mxu1 }
 0x11d   : > { %5174 = vmatmul.mubr.f32.gmra.mxu0 %v9282_v21  ;;  %v5479_v15 = vld [vmem:[%s5733_s10 + $0xa8] sm:$0xff] }
 0x11e   : > { %1797 = vmatmul.mubr.f32.gmra.mxu1 %v5478_v38  ;;  %5176 = vmatprep.mubr.f32.mxu0 %v9283_v36  ;;  %v797_v52 = vpop.f32.mrf.mxu0 }
 0x11f   : > { %1801 = vmatprep.mubr.f32.mxu1 %v6416_v2  ;;  %v6903_v22 = vadd.f32 %v6793_v35, %v797_v52  ;;  %v6905_v40 = vpop.f32.mrf.mxu1 }
 0x120   : > { %v799_v60 = vpop.f32.mrf.mxu0 }
 0x121   : > { %5177 = vmatmul.mubr.f32.gmra.mxu0 %v9284_v9  ;;  %v6908_v31 = vpop.f32.mrf.mxu1  ;;  %v5480_v9 = vld [vmem:[%s5733_s10 + $0xb0] sm:$0xff] }
 0x122   : > { %1802 = vmatmul.mubr.f32.gmra.mxu1 %v5479_v15  ;;  %5179 = vmatprep.mubr.f32.mxu0 %v9285_v50 }
 0x123   : > { %1806 = vmatprep.mubr.f32.mxu1 %v6431_v46  ;;  %v802_v21 = vpop.f32.mrf.mxu0  ;;  %v6913_v36 = vpop.f32.mrf.mxu1 }
 0x124   : > { %v6916_v35 = vadd.f32 %v6789_v54, %v802_v21 }
 0x125   : > { %5180 = vmatmul.mubr.f32.gmra.mxu0 %v9286_v32  ;;  %v804_v38 = vpop.f32.mrf.mxu0  ;;  %v6919_v52 = vpop.f32.mrf.mxu1  ;;  %v5481_v32 = vld [vmem:[%s5733_s10 + $0xc0] sm:$0xff] }
 0x126   : > { %1807 = vmatmul.mubr.f32.gmra.mxu1 %v5480_v9  ;;  %5182 = vmatprep.mubr.f32.mxu0 %v9287_v48  ;;  %v5482_v9 = vld [vmem:[%s5733_s10 + $0xc8] sm:$0xff] }
 0x127   : > { %1811 = vmatprep.mubr.f32.mxu1 %v6447_v56  ;;  %v807_v50 = vpop.f32.mrf.mxu0 }
 0x128   : > { %v6925_v60 = vadd.f32 %v6808_v39, %v807_v50  ;;  %v6927_v15 = vpop.f32.mrf.mxu1 }
 0x129   : > { %5183 = vmatmul.mubr.f32.gmra.mxu0 %v9288_v55  ;;  %v809_v54 = vpop.f32.mrf.mxu0 }
 0x12a   : > { %1812 = vmatmul.mubr.f32.gmra.mxu1 %v5481_v32  ;;  %v6931_v21 = vpop.f32.mrf.mxu1  ;;  %5185 = vmatprep.mubr.f32.mxu0 %v9289_v18  ;;  %v4636_v54 = vld [vmem:[%s9028_s2 + $0x2f8] sm:$0xff] }
 0x12b   : > { %1816 = vmatprep.mubr.f32.mxu1 %v6462_v4  ;;  %5218 = vmatprep.subr.mxu1 %v4636_v54 }
 0x12c   : > { %v812_v48 = vpop.f32.mrf.mxu0  ;;  %v6935_v38 = vpop.f32.mrf.mxu1  ;;  %5219 = vmatpush3.msra.mxu1 %v4636_v54 }
 0x12d   : > { %v6938_v39 = vadd.f32 %v6802_v62, %v812_v48  ;;  %5186 = vmatmul.mubr.f32.gmra.mxu0 %v9290_v20  ;;  %v5483_v20 = vld [vmem:[%s5733_s10 + $0xd8] sm:$0xff] }
 0x12e   : > { %1817 = vmatmul.mubr.f32.gmra.mxu1 %v5482_v9  ;;  %v814_v55 = vpop.f32.mrf.mxu0  ;;  %v6942_v50 = vpop.f32.mrf.mxu1  ;;  %5188 = vmatprep.mubr.f32.mxu0 %v9291_v11 }
 0x12f   : > { %1821 = vmatprep.mubr.f32.mxu1 %v6478_v42 }
 0x130   : > { %v817_v18 = vpop.f32.mrf.mxu0 }
 0x131   : > { %v6950_v32 = vadd.f32 %v6820_v23, %v817_v18  ;;  %v6952_v62 = vpop.f32.mrf.mxu1  ;;  %5189 = vmatmul.mubr.f32.gmra.mxu0 %v9292_v29  ;;  %v4604_v23 = vld [vmem:[%s9028_s2 + $0x1f8] sm:$0xff]  ;;  %v4603_v29 = vld [vmem:[%s9028_s2 + $0x1f0] sm:$0xff]  ;;  %v5484_v18 = vld [vmem:[%s5733_s10 + $0xe0] sm:$0xff] }
 0x132   : > { %1822 = vmatmul.mubr.f32.gmra.mxu1 %v5483_v20  ;;  %v819_v48 = vpop.f32.mrf.mxu0  ;;  %5191 = vmatprep.mubr.f32.mxu0 %v9293_v14 }
 0x133   : > { %v6957_v11 = vpop.f32.mrf.mxu1  ;;  %1826 = vmatprep.mubr.f32.mxu1 %v6493_v24  ;;  %2807 = vmatpush1.msra.mxu0 %v4604_v23 }
 0x134   : > { %2808 = vmatprep.subr.mxu0 %v6368_v16 }
 0x135   : > { %v822_v9 = vpop.f32.mrf.mxu0  ;;  %v6963_v55 = vpop.f32.mrf.mxu1  ;;  %5192 = vmatmul.mubr.f32.gmra.mxu0 %v9294_v19  ;;  %v4602_v19 = vld [vmem:[%s9028_s2 + $0x1e8] sm:$0xff] }
 0x136   : > { %v6971_v14 = vadd.f32 %v6813_v10, %v822_v9  ;;  %1827 = vmatmul.mubr.f32.gmra.mxu1 %v5484_v18  ;;  %5194 = vmatprep.mubr.f32.mxu0 %v9295_v57  ;;  %v4635_v10 = vld [vmem:[%s9028_s2 + $0x2f0] sm:$0xff] }
 0x137   : > { %v824_v54 = vpop.f32.mrf.mxu0  ;;  %v6975_v20 = vpop.f32.mrf.mxu1  ;;  %1831 = vmatprep.mubr.f32.mxu1 %v6506_v43  ;;  %2809 = vmatpush1.msra.mxu0 %v4603_v29  ;;  %v5485_v9 = vld [vmem:[%s5733_s10 + $0xf0] sm:$0xff] }
 0x138   : > { %2810 = vmatprep.subr.mxu0 %v6368_v16  ;;  %5220 = vmatprep.subr.mxu1 %v4635_v10  ;;  %v6995_v54 = vld [vmem:[#allocation2] sm:$0xff] }
 0x139   : > { %v827_v48 = vpop.f32.mrf.mxu0  ;;  %5195 = vmatmul.mubr.f32.gmra.mxu0 %v9296_v49  ;;  %v4601_v49 = vld [vmem:[%s9028_s2 + $0x1e0] sm:$0xff]  ;;  %5221 = vmatpush3.msra.mxu1 %v4635_v10 }
 0x13a   : > { %v6987_v57 = vadd.f32 %v6833_v51, %v827_v48  ;;  %v1237_v23 = vpop.f32.mrf.mxu1  ;;  %1832 = vmatmul.mubr.f32.gmra.mxu1 %v5485_v9  ;;  %5197 = vmatprep.mubr.f32.mxu0 %v9297_v17  ;;  %v5487_v48 = vld [vmem:[%s5733_s10 + $0xf8] sm:$0xff] }
 0x13b   : > { %v6992_v16 = vadd.f32 %v1237_v23, %v6880_v61  ;;  %v829_v29 = vpop.f32.mrf.mxu0  ;;  %1836 = vmatprep.mubr.f32.mxu1 %v6525_v3  ;;  %2811 = vmatpush1.msra.mxu0 %v4602_v19 }
 0x13c   : > { %v1239_v18 = vpop.f32.mrf.mxu1  ;;  %2812 = vmatprep.subr.mxu0 %v6995_v54  ;;  %v5488_v29 = vld [vmem:[%s5733_s10 + $0x108] sm:$0xff] }
 0x13d   : > { %v832_v51 = vpop.f32.mrf.mxu0  ;;  %5198 = vmatmul.mubr.f32.gmra.mxu0 %v9298_v41  ;;  %v4600_v41 = vld [vmem:[%s9028_s2 + $0x1d8] sm:$0xff] }
 0x13e   : > { %v7003_v61 = vadd.f32 %v6828_v34, %v832_v51  ;;  %v1242_v17 = vpop.f32.mrf.mxu1  ;;  %1837 = vmatmul.mubr.f32.gmra.mxu1 %v5487_v48  ;;  %5200 = vmatprep.mubr.f32.mxu0 %v9299_v58  ;;  %v4634_v34 = vld [vmem:[%s9028_s2 + $0x2e8] sm:$0xff] }
 0x13f   : > { %v7008_v19 = vadd.f32 %v1242_v17, %v6894_v33  ;;  %v834_v23 = vpop.f32.mrf.mxu0  ;;  %1841 = vmatprep.mubr.f32.mxu1 %v6541_v0  ;;  %2813 = vmatpush1.msra.mxu0 %v4601_v49  ;;  %v5489_v17 = vld [vmem:[%s5733_s10 + $0x110] sm:$0xff] }
 0x140   : > { %v1244_v10 = vpop.f32.mrf.mxu1  ;;  %2814 = vmatprep.subr.mxu0 %v6995_v54  ;;  %5222 = vmatprep.subr.mxu1 %v4634_v34 }
 0x141   : > { %v837_v9 = vpop.f32.mrf.mxu0  ;;  %5201 = vmatmul.mubr.f32.gmra.mxu0 %v9300_v25  ;;  %v4599_v25 = vld [vmem:[%s9028_s2 + $0x1d0] sm:$0xff]  ;;  %5223 = vmatpush3.msra.mxu1 %v4634_v34  ;;  %v7043_v10 = vld [vmem:[%s5733_s10 + $0x198] sm:$0xff] }
 0x142   : > { %v7020_v58 = vadd.f32 %v6844_v59, %v837_v9  ;;  %v1247_v33 = vpop.f32.mrf.mxu1  ;;  %1842 = vmatmul.mubr.f32.gmra.mxu1 %v5488_v29  ;;  %5203 = vmatprep.mubr.f32.mxu0 %v9301_v8 }
 0x143   : > { %v7025_v18 = vadd.f32 %v1247_v33, %v6903_v22  ;;  %v839_v49 = vpop.f32.mrf.mxu0  ;;  %1846 = vmatprep.mubr.f32.mxu1 %v6553_v12  ;;  %2815 = vmatpush1.msra.mxu0 %v4600_v41  ;;  %v5490_v33 = vld [vmem:[%s5733_s10 + $0x120] sm:$0xff] }
 0x144   : > { %v1249_v51 = vpop.f32.mrf.mxu1  ;;  %2816 = vmatprep.subr.mxu0 %v6995_v54 }
 0x145   : > { %v842_v59 = vpop.f32.mrf.mxu0  ;;  %5204 = vmatmul.mubr.f32.gmra.mxu0 %v9303_v53  ;;  %v7046_v53 = vld [vmem:[%s5733_s10 + $0x1a0] sm:$0xff]  ;;  %v9308_v51 = vld [vmem:[#allocation63_spill] sm:$0xff] }
 0x146   : > { %v7034_v8 = vadd.f32 %v6840_v28, %v842_v59  ;;  %v1252_v22 = vpop.f32.mrf.mxu1  ;;  %1847 = vmatmul.mubr.f32.gmra.mxu1 %v5489_v17  ;;  %5206 = vmatprep.mubr.f32.mxu0 %v9304_v47  ;;  %v4598_v28 = vld [vmem:[%s9028_s2 + $0x1c8] sm:$0xff]  ;;  %v4633_v47 = vld [vmem:[%s9028_s2 + $0x2e0] sm:$0xff] }
 0x147   : > { %v7039_v48 = vadd.f32 %v1252_v22, %v6916_v35  ;;  %v844_v23 = vpop.f32.mrf.mxu0  ;;  %1851 = vmatprep.mubr.f32.mxu1 %v6573_v37  ;;  %2817 = vmatpush1.msra.mxu0 %v4599_v25  ;;  %v1631_v25 = vrot.slane %v7043_v10, 2  ;;  %v7068_v59 = vld [vmem:[%s5733_s10 + $0x1a8] sm:$0x3] }
 0x148   : > { %v1254_v41 = vpop.f32.mrf.mxu1  ;;  %2818 = vmatprep.subr.mxu0 %v6995_v54  ;;  %5224 = vmatprep.subr.mxu1 %v4633_v47  ;;  %v5491_v17 = vld [vmem:[%s5733_s10 + $0x128] sm:$0xff]  ;;  %v1627_v0 = vrot.slane %v7068_v59, 1 }
 0x149   : > { %v847_v35 = vpop.f32.mrf.mxu0  ;;  %5207 = vmatmul.mubr.f32.gmra.mxu0 %v9306_v45  ;;  %v1632_v45 = vrot.slane %v7046_v53, 2  ;;  %5225 = vmatpush3.msra.mxu1 %v4633_v47  ;;  %v9309_v23 = vld [vmem:[#allocation46_spill] sm:$0xff]  ;;  %v1634_v41 = vrot.slane %v7068_v59, 2 }
 0x14a   : > { %v7057_v34 = vadd.f32 %v6859_v7, %v847_v35  ;;  %v1257_v9 = vpop.f32.mrf.mxu1  ;;  %1852 = vmatmul.mubr.f32.gmra.mxu1 %v5490_v33  ;;  %5209 = vmatprep.mubr.f32.mxu0 %v9307_v30  ;;  %v4597_v30 = vld [vmem:[%s9028_s2 + $0x1c0] sm:$0xff]  ;;  %v5499_v59 = vld [vmem:[%s5733_s10 + $0x188] sm:$0xff] }
 0x14b   : > { %v7062_v29 = vadd.f32 %v1257_v9, %v6925_v60  ;;  %v849_v49 = vpop.f32.mrf.mxu0  ;;  %1856 = vmatprep.mubr.f32.mxu1 %v9308_v51  ;;  %2819 = vmatpush1.msra.mxu0 %v4598_v28  ;;  %v9310_v9 = vld [vmem:[#allocation64_spill] sm:$0xff]  ;;  %v1633_v47 = vsel %vm494_vm0, %v1631_v25, %v1632_v45  ;;  %v1625_v51 = vrot.slane %v7046_v53, 1 }
 0x14c   : > { %v1259_v7 = vpop.f32.mrf.mxu1  ;;  %2820 = vmatprep.subr.mxu0 %v6995_v54  ;;  %v4632_v49 = vld [vmem:[%s9028_s2 + $0x2d8] sm:$0xff] }
 0x14d   : > { %v7074_v60 = vpop.f32.mrf.mxu0  ;;  %5210 = vmatmul.mubr.f32.gmra.mxu0 %v6315_v1  ;;  %v4596_v1 = vld [vmem:[%s9028_s2 + $0x1b8] sm:$0xff]  ;;  %5226 = vmatprep.subr.mxu1 %v4632_v49 }
 0x14e   : > { %v1262_v22 = vpop.f32.mrf.mxu1  ;;  %1857 = vmatmul.mubr.f32.gmra.mxu1 %v5491_v17  ;;  %5212 = vmatprep.mubr.f32.mxu0 %v9309_v23  ;;  %v1635_v17 = vsel %vm494_vm0, %v1632_v45, %v1634_v41  ;;  %v5493_v41 = vld [vmem:[%s5733_s10 + $0x140] sm:$0xff] }
 0x14f   : > { %v7081_v28 = vadd.f32 %v1262_v22, %v6938_v39  ;;  %v854_v35 = vpop.f32.mrf.mxu0  ;;  %1861 = vmatprep.mubr.f32.mxu1 %v9310_v9  ;;  %2821 = vmatpush1.msra.mxu0 %v4597_v30  ;;  %v9311_v39 = vld [vmem:[#allocation47_spill] sm:$0xff]  ;;  %v5492_v30 = vld [vmem:[%s5733_s10 + $0x138] sm:$0xff]  ;;  %v1624_v9 = vrot.slane %v7043_v10, 1 }
 0x150   : > { %v1264_v33 = vpop.f32.mrf.mxu1  ;;  %2822 = vmatprep.subr.mxu0 %v6995_v54  ;;  %5227 = vmatpush3.msra.mxu1 %v4632_v49  ;;  %v4593_v49 = vld [vmem:[%s9028_s2 + $0x1a0] sm:$0xff] }
 0x151   : > { %v857_v7 = vpop.f32.mrf.mxu0  ;;  %5213 = vmatmul.mubr.f32.gmra.mxu0 %v9311_v39  ;;  %v9312_v33 = vld [vmem:[#allocation65_spill] sm:$0xff]  ;;  %v4595_v39 = vld [vmem:[%s9028_s2 + $0x1b0] sm:$0xff]  ;;  %v1626_v12 = vsel %vm381_vm1, %v1624_v9, %v1625_v51 }
 0x152   : > { %v7094_v22 = vadd.f32 %v6871_v6, %v857_v7  ;;  %v1267_v25 = vpop.f32.mrf.mxu1  ;;  %1862 = vmatmul.mubr.f32.gmra.mxu1 %v5492_v30  ;;  %5215 = vmatprep.mubr.f32.mxu0 %v1633_v47 }
 0x153   : > { %v7099_v23 = vadd.f32 %v1267_v25, %v6950_v32  ;;  %v859_v35 = vpop.f32.mrf.mxu0  ;;  %1866 = vmatprep.mubr.f32.mxu1 %v9312_v33  ;;  %2823 = vmatpush1.msra.mxu0 %v4596_v1  ;;  %v4594_v32 = vld [vmem:[%s9028_s2 + $0x1a8] sm:$0xff] }
 0x154   : > { %v1269_v6 = vpop.f32.mrf.mxu1  ;;  %2824 = vmatprep.subr.mxu0 %v6995_v54  ;;  %v9313_v25 = vld [vmem:[#allocation66_spill] sm:$0xff] }
 0x155   : > { %v7106_v7 = vpop.f32.mrf.mxu0  ;;  %5216 = vmatmul.mubr.f32.gmra.mxu0 %v1635_v17  ;;  %v4631_v17 = vld [vmem:[%s9028_s2 + $0x2d0] sm:$0xff] }
 0x156   : > { %v1272_v45 = vpop.f32.mrf.mxu1  ;;  %1867 = vmatmul.mubr.f32.gmra.mxu1 %v5493_v41  ;;  %2825 = vmatpush1.msra.mxu0 %v4595_v39 }
 0x157   : > { %v7113_v47 = vadd.f32 %v1272_v45, %v6971_v14  ;;  %v864_v1 = vpop.f32.mrf.mxu0  ;;  %1871 = vmatprep.mubr.f32.mxu1 %v9313_v25  ;;  %2826 = vmatprep.subr.mxu0 %v6995_v54  ;;  %v4592_v14 = vld [vmem:[%s9028_s2 + $0x198] sm:$0xff]  ;;  %v5494_v45 = vld [vmem:[%s5733_s10 + $0x150] sm:$0xff] }
 0x158   : > { %v1274_v30 = vpop.f32.mrf.mxu1  ;;  %2827 = vmatpush1.msra.mxu0 %v4594_v32  ;;  %5228 = vmatprep.subr.mxu1 %v4631_v17  ;;  %v9314_v1 = vld [vmem:[#allocation67_spill] sm:$0xff] }
 0x159   : > { %v867_v35 = vpop.f32.mrf.mxu0  ;;  %2828 = vmatprep.subr.mxu0 %v6995_v54  ;;  %v4591_v30 = vld [vmem:[%s9028_s2 + $0x190] sm:$0xff]  ;;  %5229 = vmatpush3.msra.mxu1 %v4631_v17 }
 0x15a   : > { %v7128_v39 = vadd.f32 %v6884_v44, %v867_v35  ;;  %v1277_v6 = vpop.f32.mrf.mxu1  ;;  %1872 = vmatmul.mubr.f32.gmra.mxu1 %v5494_v45  ;;  %2829 = vmatpush1.msra.mxu0 %v4593_v49  ;;  %v5495_v35 = vld [vmem:[%s5733_s10 + $0x158] sm:$0xff]  ;;  %v4589_v45 = vld [vmem:[%s9028_s2 + $0x180] sm:$0xff] }
 0x15b   : > { %v7132_v32 = vadd.f32 %v1277_v6, %v6987_v57  ;;  %v869_v41 = vpop.f32.mrf.mxu0  ;;  %1876 = vmatprep.mubr.f32.mxu1 %v9314_v1  ;;  %2830 = vmatprep.subr.mxu0 %v6995_v54  ;;  %v4590_v57 = vld [vmem:[%s9028_s2 + $0x188] sm:$0xff] }
 0x15c   : > { %v1279_v25 = vpop.f32.mrf.mxu1  ;;  %2831 = vmatpush1.msra.mxu0 %v4592_v14  ;;  %v4630_v6 = vld [vmem:[%s9028_s2 + $0x2c8] sm:$0xff]  ;;  %v9315_v14 = vld [vmem:[#allocation33_spill] sm:$0xff] }
 0x15d   : > { %v7139_v44 = vpop.f32.mrf.mxu0  ;;  %2832 = vmatprep.subr.mxu0 %v6995_v54  ;;  %5230 = vmatprep.subr.mxu1 %v4630_v6 }
 0x15e   : > { %v1282_v49 = vpop.f32.mrf.mxu1  ;;  %1877 = vmatmul.mubr.f32.gmra.mxu1 %v5495_v35  ;;  %2833 = vmatpush1.msra.mxu0 %v4591_v30 }
 0x15f   : > { %v7150_v25 = vadd.f32 %v1282_v49, %v7003_v61  ;;  %v874_v17 = vpop.f32.mrf.mxu0  ;;  %1881 = vmatprep.mubr.f32.mxu1 %v9315_v14  ;;  %2834 = vmatprep.subr.mxu0 %v6995_v54  ;;  %v4620_v61 = vld [vmem:[%s9028_s2 + $0x278] sm:$0xff]  ;;  %v4629_v49 = vld [vmem:[%s9028_s2 + $0x2c0] sm:$0xff]  ;;  %v9316_v14 = vld [vmem:[#allocation34_spill] sm:$0xff] }
 0x160   : > { %v1284_v41 = vpop.f32.mrf.mxu1  ;;  %2835 = vmatpush1.msra.mxu0 %v4590_v57  ;;  %5231 = vmatpush3.msra.mxu1 %v4630_v6  ;;  %v5496_v17 = vld [vmem:[%s5733_s10 + $0x168] sm:$0xff]  ;;  %v4619_v6 = vld [vmem:[%s9028_s2 + $0x270] sm:$0xff] }
 0x161   : > { %v7157_v30 = vpop.f32.mrf.mxu0  ;;  %2836 = vmatprep.subr.mxu0 %v6995_v54  ;;  %5232 = vmatprep.subr.mxu1 %v4629_v49 }
 0x162   : > { %v1287_v35 = vpop.f32.mrf.mxu1  ;;  %1882 = vmatmul.mubr.f32.gmra.mxu1 %v5496_v17  ;;  %2837 = vmatpush1.msra.mxu0 %v4589_v45  ;;  %v4628_v45 = vld [vmem:[%s9028_s2 + $0x2b8] sm:$0xff]  ;;  %v5497_v17 = vld [vmem:[%s5733_s10 + $0x170] sm:$0xff] }
 0x163   : > { %v7168_v57 = vadd.f32 %v1287_v35, %v7020_v58  ;;  %v879_v41 = vpop.f32.mrf.mxu0  ;;  %1886 = vmatprep.mubr.f32.mxu1 %v9316_v14  ;;  %2838 = vmatprep.subr.mxu0 %v6995_v54  ;;  %v4618_v58 = vld [vmem:[%s9028_s2 + $0x268] sm:$0xff] }
 0x164   : > { %v1289_v1 = vpop.f32.mrf.mxu1  ;;  %2839 = vmatpush2.msra.mxu0 %v4620_v61  ;;  %5233 = vmatpush3.msra.mxu1 %v4629_v49  ;;  %v9317_v41 = vld [vmem:[#allocation37_spill] sm:$0xff] }
 0x165   : > { %v7175_v33 = vpop.f32.mrf.mxu0  ;;  %2840 = vmatprep.subr.mxu0 %v6995_v54  ;;  %v4617_v49 = vld [vmem:[%s9028_s2 + $0x260] sm:$0xff]  ;;  %5234 = vmatprep.subr.mxu1 %v4628_v45 }
 0x166   : > { %v1292_v35 = vpop.f32.mrf.mxu1  ;;  %1887 = vmatmul.mubr.f32.gmra.mxu1 %v5497_v17  ;;  %2841 = vmatpush2.msra.mxu0 %v4619_v6  ;;  %v5498_v17 = vld [vmem:[%s5733_s10 + $0x180] sm:$0xff] }
 0x167   : > { %v7186_v1 = vadd.f32 %v1292_v35, %v7034_v8  ;;  %v884_v61 = vpop.f32.mrf.mxu0  ;;  %1891 = vmatprep.mubr.f32.mxu1 %v9317_v41  ;;  %2842 = vmatprep.subr.mxu0 %v6995_v54  ;;  %v4616_v8 = vld [vmem:[%s9028_s2 + $0x258] sm:$0xff]  ;;  %v4627_v35 = vld [vmem:[%s9028_s2 + $0x2b0] sm:$0xff]  ;;  %v9318_v41 = vld [vmem:[#allocation41_spill] sm:$0xff] }
 0x168   : > { %v1294_v14 = vpop.f32.mrf.mxu1  ;;  %2843 = vmatpush2.msra.mxu0 %v4618_v58  ;;  %5235 = vmatpush3.msra.mxu1 %v4628_v45  ;;  %v4615_v45 = vld [vmem:[%s9028_s2 + $0x250] sm:$0xff] }
 0x169   : > { %v7195_v6 = vpop.f32.mrf.mxu0  ;;  %2844 = vmatprep.subr.mxu0 %v6995_v54  ;;  %5236 = vmatprep.subr.mxu1 %v4627_v35 }
 0x16a   : > { %v1297_v14 = vpop.f32.mrf.mxu1  ;;  %1892 = vmatmul.mubr.f32.gmra.mxu1 %v5498_v17  ;;  %2845 = vmatpush2.msra.mxu0 %v4617_v49  ;;  %v4614_v17 = vld [vmem:[%s9028_s2 + $0x248] sm:$0xff] }
 0x16b   : > { %v7206_v58 = vadd.f32 %v1297_v14, %v7057_v34  ;;  %v889_v61 = vpop.f32.mrf.mxu0  ;;  %1896 = vmatprep.mubr.f32.mxu1 %v9318_v41  ;;  %2846 = vmatprep.subr.mxu0 %v6995_v54  ;;  %v9319_v34 = vld [vmem:[#allocation42_spill] sm:$0xff] }
 0x16c   : > { %v1299_v37 = vpop.f32.mrf.mxu1  ;;  %2847 = vmatpush2.msra.mxu0 %v4616_v8  ;;  %v1078_v49 = vadd.f32 %v9319_v34, %v7074_v60  ;;  %5237 = vmatpush3.msra.mxu1 %v4627_v35  ;;  %v4613_v61 = vld [vmem:[%s9028_s2 + $0x240] sm:$0xff]  ;;  %v1628_v35 = vsel %vm381_vm1, %v1625_v51, %v1627_v0 }
 0x16d   : > { %v7217_v14 = vpop.f32.mrf.mxu0  ;;  %2848 = vmatprep.subr.mxu0 %v6995_v54  ;;  %v4626_v37 = vld [vmem:[%s9028_s2 + $0x2a8] sm:$0xff] }
 0x16e   : > { %v1302_v9 = vpop.f32.mrf.mxu1  ;;  %1897 = vmatmul.mubr.f32.gmra.mxu1 %v5499_v59  ;;  %2849 = vmatpush2.msra.mxu0 %v4615_v45  ;;  %v4612_v45 = vld [vmem:[%s9028_s2 + $0x238] sm:$0xff] }
 0x16f   : > { %v7227_v8 = vadd.f32 %v1302_v9, %v1078_v49  ;;  %v894_v60 = vpop.f32.mrf.mxu0  ;;  %1901 = vmatprep.mubr.f32.mxu1 %v1626_v12  ;;  %2850 = vmatprep.subr.mxu0 %v6995_v54  ;;  %v4625_v12 = vld [vmem:[%s9028_s2 + $0x2a0] sm:$0xff]  ;;  %v4624_v9 = vld [vmem:[%s9028_s2 + $0x298] sm:$0xff] }
 0x170   : > { %v1304_v34 = vpop.f32.mrf.mxu1  ;;  %2851 = vmatpush2.msra.mxu0 %v4614_v17  ;;  %5238 = vmatprep.subr.mxu1 %v4626_v37  ;;  %v4611_v17 = vld [vmem:[%s9028_s2 + $0x230] sm:$0xff]  ;;  %v4610_v60 = vld [vmem:[%s9028_s2 + $0x228] sm:$0xff] }
 0x171   : > { %v7234_v41 = vpop.f32.mrf.mxu0  ;;  %2852 = vmatprep.subr.mxu0 %v6995_v54  ;;  %5239 = vmatpush3.msra.mxu1 %v4626_v37  ;;  %v4623_v34 = vld [vmem:[%s9028_s2 + $0x290] sm:$0xff] }
 0x172   : > { %v1307_v49 = vpop.f32.mrf.mxu1  ;;  %1902 = vmatmul.mubr.f32.gmra.mxu1 %v7043_v10  ;;  %2853 = vmatpush2.msra.mxu0 %v4613_v61  ;;  %v9320_v10 = vld [vmem:[#allocation44_spill] sm:$0xff] }
 0x173   : > { %v7245_v0 = vadd.f32 %v1307_v49, %v7094_v22  ;;  %v899_v51 = vpop.f32.mrf.mxu0  ;;  %1906 = vmatprep.mubr.f32.mxu1 %v1628_v35  ;;  %2854 = vmatprep.subr.mxu0 %v6995_v54  ;;  %v1088_v59 = vadd.f32 %v9320_v10, %v7106_v7 }
 0x174   : > { %v1309_v37 = vpop.f32.mrf.mxu1  ;;  %2855 = vmatpush2.msra.mxu0 %v4612_v45  ;;  %5240 = vmatprep.subr.mxu1 %v4625_v12  ;;  %v4609_v45 = vld [vmem:[%s9028_s2 + $0x220] sm:$0xff]  ;;  %v4608_v51 = vld [vmem:[%s9028_s2 + $0x218] sm:$0xff] }
 0x175   : > { %v7256_v22 = vpop.f32.mrf.mxu0  ;;  %2856 = vmatprep.subr.mxu0 %v6995_v54  ;;  %5241 = vmatpush3.msra.mxu1 %v4625_v12  ;;  %v4621_v37 = vld [vmem:[%s9028_s2 + $0x280] sm:$0xff] }
 0x176   : > { %v1312_v61 = vpop.f32.mrf.mxu1  ;;  %1907 = vmatmul.mubr.f32.gmra.mxu1 %v7046_v53  ;;  %2857 = vmatpush2.msra.mxu0 %v4611_v17  ;;  %v4622_v53 = vld [vmem:[%s9028_s2 + $0x288] sm:$0xff] }
 0x177   : > { %v7266_v35 = vadd.f32 %v1312_v61, %v1088_v59  ;;  %v904_v7 = vpop.f32.mrf.mxu0  ;;  %2858 = vmatprep.subr.mxu0 %v6995_v54  ;;  %5242 = vmatprep.subr.mxu1 %v4624_v9  ;;  %v4607_v59 = vld [vmem:[%s9028_s2 + $0x210] sm:$0xff]  ;;  %v1098_v61 = vadd.f32 %v6876_v5, %v7139_v44  ;;  %v4605_v5 = vld [vmem:[%s9028_s2 + $0x200] sm:$0xff] }
 0x178   : > { %v1314_v49 = vpop.f32.mrf.mxu1  ;;  %2859 = vmatpush2.msra.mxu0 %v4610_v60  ;;  %5243 = vmatpush3.msra.mxu1 %v4624_v9 }
 0x179   : > { %v7275_v12 = vpop.f32.mrf.mxu0  ;;  %2860 = vmatprep.subr.mxu0 %v6995_v54  ;;  %5244 = vmatprep.subr.mxu1 %v4623_v34 }
 0x17a   : > { %v1317_v17 = vpop.f32.mrf.mxu1  ;;  %2861 = vmatpush2.msra.mxu0 %v4609_v45  ;;  %5245 = vmatpush3.msra.mxu1 %v4623_v34 }
 0x17b   : > { %v7285_v9 = vadd.f32 %v1317_v17, %v7128_v39  ;;  %v909_v10 = vpop.f32.mrf.mxu0  ;;  %2862 = vmatprep.subr.mxu0 %v6995_v54  ;;  %5246 = vmatprep.subr.mxu1 %v4622_v53  ;;  %v4606_v39 = vld [vmem:[%s9028_s2 + $0x208] sm:$0xff] }
 0x17c   : > { %v1319_v60 = vpop.f32.mrf.mxu1  ;;  %2863 = vmatpush2.msra.mxu0 %v4608_v51  ;;  %5247 = vmatpush3.msra.mxu1 %v4622_v53  ;;  %v7307_v53 = vld [vmem:[%s9028_s2 + $0x178] sm:$0xff]  ;;  %v1103_v51 = vadd.f32 %v6896_v27, %v7157_v30 }
 0x17d   : > { %v912_v34 = vpop.f32.mrf.mxu0  ;;  %2864 = vmatprep.subr.mxu0 %v6995_v54  ;;  %5248 = vmatprep.subr.mxu1 %v4621_v37 }
 0x17e   : > { %v1322_v7 = vpop.f32.mrf.mxu1  ;;  %2865 = vmatpush2.msra.mxu0 %v4607_v59  ;;  %5249 = vmatpush3.msra.mxu1 %v4621_v37 }
 0x17f   : > { %v7297_v45 = vadd.f32 %v1322_v7, %v1098_v61  ;;  %v914_v49 = vpop.f32.mrf.mxu0  ;;  %2866 = vmatprep.subr.mxu0 %v6995_v54  ;;  %3256 = vmatprep.subr.mxu1 %v6995_v54  ;;  %v1108_v61 = vadd.f32 %v6890_v63, %v7175_v33 }
 0x180   : > { %v1324_v44 = vpop.f32.mrf.mxu1  ;;  %2867 = vmatpush2.msra.mxu0 %v4606_v39 }
 0x181   : > { %v917_v17 = vpop.f32.mrf.mxu0  ;;  %2868 = vmatprep.subr.mxu0 %v6995_v54  ;;  %v1113_v54 = vadd.f32 %v6908_v31, %v7195_v6 }
 0x182   : > { %v1327_v37 = vpop.f32.mrf.mxu1  ;;  %2869 = vmatpush2.msra.mxu0 %v4605_v5 }
 0x183   : > { %v7312_v10 = vadd.f32 %v1327_v37, %v1103_v51  ;;  %v919_v59 = vpop.f32.mrf.mxu0  ;;  %5298 = vmatprep.subr.mxu0 %v7307_v53 }
 0x184   : > { %v1329_v60 = vpop.f32.mrf.mxu1 }
 0x185   : > { %v922_v39 = vpop.f32.mrf.mxu0  ;;  %v1118_v60 = vadd.f32 %v6905_v40, %v7217_v14 }
 0x186   : > { %v1332_v7 = vpop.f32.mrf.mxu1 }
 0x187   : > { %v7317_v49 = vadd.f32 %v1332_v7, %v1108_v61  ;;  %v924_v44 = vpop.f32.mrf.mxu0 }
 0x188   : > { %v1334_v27 = vpop.f32.mrf.mxu1  ;;  %v1123_v44 = vadd.f32 %v6919_v52, %v7234_v41 }
 0x189   : > { %v927_v30 = vpop.f32.mrf.mxu0 }
 0x18a   : > { %v1337_v5 = vpop.f32.mrf.mxu1 }
 0x18b   : > { %v7321_v51 = vadd.f32 %v1337_v5, %v1113_v54  ;;  %v929_v37 = vpop.f32.mrf.mxu0 }
 0x18c   : > { %v1339_v59 = vpop.f32.mrf.mxu1  ;;  %v1128_v37 = vadd.f32 %v6913_v36, %v7256_v22  ;;  %v1138_v36 = vadd.f32 %v6927_v15, %v912_v34 }
 0x18d   : > { %v932_v3 = vpop.f32.mrf.mxu0 }
 0x18e   : > { %v1342_v63 = vpop.f32.mrf.mxu1 }
 0x18f   : > { %v7325_v33 = vadd.f32 %v1342_v63, %v1118_v60  ;;  %v934_v61 = vpop.f32.mrf.mxu0 }
 0x190   : > { %v1344_v7 = vpop.f32.mrf.mxu1  ;;  %v1133_v61 = vadd.f32 %v6931_v21, %v7275_v12 }
 0x191   : > { %v937_v27 = vpop.f32.mrf.mxu0 }
 0x192   : > { %v1347_v31 = vpop.f32.mrf.mxu1 }
 0x193   : > { %v7329_v6 = vadd.f32 %v1347_v31, %v1123_v44  ;;  %v939_v54 = vpop.f32.mrf.mxu0 }
 0x194   : > { %v1349_v5 = vpop.f32.mrf.mxu1 }
 0x195   : > { %v942_v59 = vpop.f32.mrf.mxu0 }
 0x196   : > { %v1352_v40 = vpop.f32.mrf.mxu1 }
 0x197   : > { %v7333_v14 = vadd.f32 %v1352_v40, %v1128_v37  ;;  %v944_v60 = vpop.f32.mrf.mxu0 }
 0x198   : > { %v1354_v63 = vpop.f32.mrf.mxu1 }
 0x199   : > { %v5092_v7 = vpop.f32.mrf.mxu0 }
 0x19a   : > { %v1357_v52 = vpop.f32.mrf.mxu1  ;;  %v7338_v41 = vadd.f32 %v5092_v7, %v7008_v19  ;;  %v1143_v19 = vadd.f32 %v6942_v50, %v917_v17  ;;  %v1153_v17 = vadd.f32 %v6957_v11, %v927_v30  ;;  %v1163_v30 = vadd.f32 %v6975_v20, %v937_v27 }
 0x19b   : > { %v7340_v44 = vadd.f32 %v1357_v52, %v1133_v61  ;;  %v7342_v31 = vpop.f32.mrf.mxu0 }
 0x19c   : > { %v1359_v54 = vpop.f32.mrf.mxu1 }
 0x19d   : > { %v5095_v22 = vpop.f32.mrf.mxu0 }
 0x19e   : > { %v1362_v5 = vpop.f32.mrf.mxu1  ;;  %v7346_v37 = vadd.f32 %v5095_v22, %v7039_v48  ;;  %v1148_v48 = vadd.f32 %v6935_v38, %v922_v39  ;;  %v1158_v39 = vadd.f32 %v6952_v62, %v932_v3  ;;  %v1168_v62 = vadd.f32 %v6963_v55, %v942_v59 }
 0x19f   : > { %v7348_v40 = vadd.f32 %v1362_v5, %v1138_v36  ;;  %v7350_v21 = vpop.f32.mrf.mxu0 }
 0x1a0   : > { %v1364_v12 = vpop.f32.mrf.mxu1 }
 0x1a1   : > { %v5098_v60 = vpop.f32.mrf.mxu0 }
 0x1a2   : > { %v1367_v63 = vpop.f32.mrf.mxu1  ;;  %v7354_v61 = vadd.f32 %v5098_v60, %v7081_v28 }
 0x1a3   : > { %v7356_v7 = vadd.f32 %v1367_v63, %v1143_v19  ;;  %v7358_v15 = vpop.f32.mrf.mxu0 }
 0x1a4   : > { %v1369_v34 = vpop.f32.mrf.mxu1 }
 0x1a5   : > { %9321 = vst [vmem:[#allocation3_spill] sm:$0xff] %v7356_v7  ;;  %v5101_v52 = vpop.f32.mrf.mxu0 }
 0x1a6   : > { %v1372_v54 = vpop.f32.mrf.mxu1  ;;  %v7362_v36 = vadd.f32 %v5101_v52, %v7113_v47 }
 0x1a7   : > { %v1373_v22 = vadd.f32 %v1372_v54, %v1148_v48  ;;  %v7364_v5 = vpop.f32.mrf.mxu0 }
 0x1a8   : > { %v1374_v50 = vpop.f32.mrf.mxu1 }
 0x1a9   : > { %v5104_v28 = vpop.f32.mrf.mxu0 }
 0x1aa   : > { %v1377_v12 = vpop.f32.mrf.mxu1  ;;  %v7368_v19 = vadd.f32 %v5104_v28, %v7150_v25 }
 0x1ab   : > { %v7370_v60 = vadd.f32 %v1377_v12, %v1153_v17  ;;  %v7372_v63 = vpop.f32.mrf.mxu0 }
 0x1ac   : > { %v1379_v38 = vpop.f32.mrf.mxu1 }
 0x1ad   : > { %9322 = vst [vmem:[#allocation4_spill] sm:$0xff] %v7370_v60  ;;  %v5107_v47 = vpop.f32.mrf.mxu0 }
 0x1ae   : > { %v1382_v34 = vpop.f32.mrf.mxu1  ;;  %v7376_v48 = vadd.f32 %v5107_v47, %v7186_v1 }
 0x1af   : > { %v1383_v52 = vadd.f32 %v1382_v34, %v1158_v39  ;;  %v7378_v54 = vpop.f32.mrf.mxu0 }
 0x1b0   : > { %v1384_v11 = vpop.f32.mrf.mxu1 }
 0x1b1   : > { %v5110_v25 = vpop.f32.mrf.mxu0 }
 0x1b2   : > { %v1387_v50 = vpop.f32.mrf.mxu1  ;;  %v7382_v17 = vadd.f32 %v5110_v25, %v7227_v8 }
 0x1b3   : > { %v7384_v28 = vadd.f32 %v1387_v50, %v1163_v30  ;;  %v7386_v12 = vpop.f32.mrf.mxu0 }
 0x1b4   : > { %v1389_v3 = vpop.f32.mrf.mxu1 }
 0x1b5   : > { %9323 = vst [vmem:[#allocation5_spill] sm:$0xff] %v7384_v28  ;;  %v5113_v1 = vpop.f32.mrf.mxu0 }
 0x1b6   : > { %v1392_v38 = vpop.f32.mrf.mxu1  ;;  %v7390_v39 = vadd.f32 %v5113_v1, %v7266_v35 }
 0x1b7   : > { %v1393_v47 = vadd.f32 %v1392_v38, %v1168_v62  ;;  %v7392_v34 = vpop.f32.mrf.mxu0 }
 0x1b8   : > { %v1394_v20 = vpop.f32.mrf.mxu1 }
 0x1b9   : > { %v5116_v27 = vpop.f32.mrf.mxu0 }
 0x1ba   : > { %v7395_v8 = vadd.f32 %v5116_v27, %v7297_v45  ;;  %v1753_v11 = vpop.f32.mrf.mxu1 }
 0x1bb   : > { %v7397_v30 = vpop.f32.mrf.mxu0 }
 0x1bc   : > { %v1755_v25 = vpop.f32.mrf.mxu1 }
 0x1bd   : > { %v5119_v50 = vpop.f32.mrf.mxu0 }
 0x1be   : > { %v7400_v55 = vadd.f32 %v5119_v50, %v7317_v49  ;;  %v1758_v59 = vpop.f32.mrf.mxu1 }
 0x1bf   : > { %v7402_v3 = vpop.f32.mrf.mxu0 }
 0x1c0   : > { %v1760_v35 = vpop.f32.mrf.mxu1 }
 0x1c1   : > { %v5122_v62 = vpop.f32.mrf.mxu0 }
 0x1c2   : > { %v7405_v1 = vadd.f32 %v5122_v62, %v7325_v33  ;;  %v1763_v38 = vpop.f32.mrf.mxu1 }
 0x1c3   : > { %v7407_v20 = vpop.f32.mrf.mxu0 }
 0x1c4   : > { %v1765_v45 = vpop.f32.mrf.mxu1 }
 0x1c5   : > { %v5125_v27 = vpop.f32.mrf.mxu0 }
 0x1c6   : > { %v7410_v43 = vadd.f32 %v5125_v27, %v7333_v14  ;;  %v1768_v25 = vpop.f32.mrf.mxu1 }
 0x1c7   : > { %v7412_v24 = vpop.f32.mrf.mxu0 }
 0x1c8   : > { %v1770_v49 = vpop.f32.mrf.mxu1 }
 0x1c9   : > { %v5128_v50 = vpop.f32.mrf.mxu0 }
 0x1ca   : > { %v7415_v42 = vadd.f32 %v5128_v50, %v7348_v40  ;;  %v1773_v35 = vpop.f32.mrf.mxu1 }
 0x1cb   : > { %v7417_v56 = vpop.f32.mrf.mxu0 }
 0x1cc   : > { %v1775_v33 = vpop.f32.mrf.mxu1 }
 0x1cd   : > { %v5131_v62 = vpop.f32.mrf.mxu0 }
 0x1ce   : > { %v7419_v4 = vadd.f32 %v5131_v62, %v1373_v22  ;;  %v1778_v45 = vpop.f32.mrf.mxu1 }
 0x1cf   : > { %v7421_v2 = vpop.f32.mrf.mxu0 }
 0x1d0   : > { %9324 = vst [vmem:[#allocation6_spill] sm:$0xff] %v7419_v4  ;;  %9325 = vst [vmem:[#allocation7_spill] sm:$0xff] %v7421_v2  ;;  %v1780_v14 = vpop.f32.mrf.mxu1 }
 0x1d1   : > { %v5134_v27 = vpop.f32.mrf.mxu0 }
 0x1d2   : > { %v7423_v46 = vadd.f32 %v5134_v27, %v1383_v52  ;;  %v1783_v13 = vpop.f32.mrf.mxu1  ;;  %v7436_v52 = vld [vmem:[%s9029_s3] ss:$0 sm:$0xff] }
 0x1d3   : > { %v7425_v49 = vpop.f32.mrf.mxu0 }
 0x1d4   : > { %9326 = vst [vmem:[#allocation8_spill] sm:$0xff] %v7423_v46  ;;  %9327 = vst [vmem:[#allocation9_spill] sm:$0xff] %v7425_v49  ;;  %v1785_v26 = vpop.f32.mrf.mxu1  ;;  %v1473_v49 = vadd.f32 %v7350_v21, %v7025_v18  ;;  %v1483_v18 = vadd.f32 %v7358_v15, %v7062_v29  ;;  %v1493_v15 = vadd.f32 %v7364_v5, %v7099_v23 }
 0x1d5   : > { %v5137_v40 = vpop.f32.mrf.mxu0  ;;  %v1463_v26 = vadd.f32 %v7342_v31, %v6992_v16 }
 0x1d6   : > { %v7427_v50 = vadd.f32 %v5137_v40, %v1393_v47  ;;  %v1788_v28 = vpop.f32.mrf.mxu1 }
 0x1d7   : > { %v7429_v60 = vpop.f32.mrf.mxu0 }
 0x1d8   : > { %9328 = vst [vmem:[#allocation10_spill] sm:$0xff] %v7427_v50  ;;  %9329 = vst [vmem:[#allocation11_spill] sm:$0xff] %v7429_v60  ;;  %v1790_v33 = vpop.f32.mrf.mxu1 }
 0x1d9   : > { %v5172_v22 = vpop.f32.mrf.mxu0  ;;  %v7444_v33 = vld [vmem:[%s9030_s4] ss:$0 sm:$0xff] }
 0x1da   : > { %v7431_v62 = vpop.f32.mrf.mxu1  ;;  %v1984_v4 = vadd.f32 %v5172_v22, %v1758_v59 }
 0x1db   : > { %v1978_v14 = vpop.f32.mrf.mxu0 }
 0x1dc   : > { %v2138_v47 = vadd.f32 %v1984_v4, %v7338_v41  ;;  %v1795_v27 = vpop.f32.mrf.mxu1  ;;  %v1979_v40 = vadd.f32 %v1978_v14, %v1753_v11 }
 0x1dd   : > { %v5175_v50 = vpop.f32.mrf.mxu0 }
 0x1de   : > { %v2177_v59 = vmul.f32 %v7436_v52, %v2138_v47  ;;  %v2137_v22 = vadd.f32 %v1979_v40, %v1463_v26  ;;  %v1798_v60 = vpop.f32.mrf.mxu1  ;;  %v1994_v46 = vadd.f32 %v5175_v50, %v1768_v25 }
 0x1df   : > { %v1988_v2 = vpop.f32.mrf.mxu0 }
 0x1e0   : > { %v2216_v16 = vadd.f32 %v7444_v33, %v2177_v59  ;;  %v2176_v4 = vmul.f32 %v7436_v52, %v2137_v22  ;;  %v2140_v41 = vadd.f32 %v1994_v46, %v7346_v37  ;;  %v1800_v31 = vpop.f32.mrf.mxu1  ;;  %v1989_v11 = vadd.f32 %v1988_v2, %v1763_v38 }
 0x1e1   : > { %v5178_v14 = vpop.f32.mrf.mxu0 }
 0x1e2   : > { %v2248_v27 = vmax.f32 %v2216_v16, 0.0  ;;  %v2215_v7 = vadd.f32 %v7444_v33, %v2176_v4  ;;  %v2179_v26 = vmul.f32 %v7436_v52, %v2140_v41  ;;  %v2139_v47 = vadd.f32 %v1989_v11, %v1473_v49  ;;  %v7454_v25 = vpop.f32.mrf.mxu1 }
 0x1e3   : > { %v2004_v21 = vadd.f32 %v5178_v14, %v1778_v45  ;;  %v1998_v50 = vpop.f32.mrf.mxu0 }
 0x1e4   : > { %2335 = vst [vmem:[#allocation2 + $0x21] sm:$0xff] %v2248_v27  ;;  %v2247_v40 = vmax.f32 %v2215_v7, 0.0  ;;  %v2218_v46 = vadd.f32 %v7444_v33, %v2179_v26  ;;  %v2178_v2 = vmul.f32 %v7436_v52, %v2139_v47  ;;  %v1805_v37 = vpop.f32.mrf.mxu1  ;;  %v1999_v38 = vadd.f32 %v1998_v50, %v1773_v35 }
 0x1e5   : > { %v2142_v59 = vadd.f32 %v2004_v21, %v7354_v61  ;;  %v5181_v22 = vpop.f32.mrf.mxu0  ;;  %v1503_v27 = vadd.f32 %v7372_v63, %v7132_v32  ;;  %v7482_v32 = vadd.f32 %v7392_v34, %v7245_v0 }
 0x1e6   : > { %2334 = vst [vmem:[#allocation2 + $0x19] sm:$0xff] %v2247_v40  ;;  %v2250_v49 = vmax.f32 %v2218_v46, 0.0  ;;  %v2217_v16 = vadd.f32 %v7444_v33, %v2178_v2  ;;  %v2141_v4 = vadd.f32 %v1999_v38, %v1483_v18  ;;  %v1808_v41 = vpop.f32.mrf.mxu1  ;;  %v2014_v29 = vadd.f32 %v5181_v22, %v1788_v28 }
 0x1e7   : > { %v2181_v7 = vmul.f32 %v7436_v52, %v2142_v59  ;;  %v2008_v45 = vpop.f32.mrf.mxu0 }
 0x1e8   : > { %2337 = vst [vmem:[#allocation2 + $0x39] sm:$0xff] %v2250_v49  ;;  %v2249_v31 = vmax.f32 %v2217_v16, 0.0  ;;  %v2180_v35 = vmul.f32 %v7436_v52, %v2141_v4  ;;  %v2144_v61 = vadd.f32 %v2014_v29, %v7362_v36  ;;  %v1810_v11 = vpop.f32.mrf.mxu1  ;;  %v2009_v14 = vadd.f32 %v2008_v45, %v1783_v13 }
 0x1e9   : > { %v2220_v26 = vadd.f32 %v7444_v33, %v2181_v7  ;;  %v5184_v28 = vpop.f32.mrf.mxu0  ;;  %v1513_v36 = vadd.f32 %v7378_v54, %v7168_v57  ;;  %v7478_v13 = vadd.f32 %v7386_v12, %v7206_v58  ;;  %v7489_v57 = vadd.f32 %v7397_v30, %v7285_v9 }
 0x1ea   : > { %2336 = vst [vmem:[#allocation2 + $0x31] sm:$0xff] %v2249_v31  ;;  %v2219_v23 = vadd.f32 %v7444_v33, %v2180_v35  ;;  %v2183_v5 = vmul.f32 %v7436_v52, %v2144_v61  ;;  %v2143_v47 = vadd.f32 %v2009_v14, %v1493_v15  ;;  %v7472_v18 = vpop.f32.mrf.mxu1  ;;  %v2024_v21 = vadd.f32 %v5184_v28, %v1798_v60 }
 0x1eb   : > { %v2252_v63 = vmax.f32 %v2220_v26, 0.0  ;;  %v2018_v50 = vpop.f32.mrf.mxu0  ;;  %v2371_v40 = vld [vmem:[#allocation2 + $0x28] sm:$0x3] }
 0x1ec   : > { %v2251_v46 = vmax.f32 %v2219_v23, 0.0  ;;  %v2222_v2 = vadd.f32 %v7444_v33, %v2183_v5  ;;  %v2182_v37 = vmul.f32 %v7436_v52, %v2143_v47  ;;  %v2146_v60 = vadd.f32 %v2024_v21, %v7368_v19  ;;  %v1815_v38 = vpop.f32.mrf.mxu1 }
 0x1ed   : > { %2339 = vst [vmem:[#allocation2 + $0x51] sm:$0xff] %v2252_v63  ;;  %v2019_v58 = vadd.f32 %v2018_v50, %v7431_v62  ;;  %v5187_v0 = vpop.f32.mrf.mxu0  ;;  %v2369_v54 = vld [vmem:[#allocation2 + $0x18] sm:$0xff]  ;;  %v7492_v12 = vld [vmem:[#allocation2 + $0x20] sm:$0xff]  ;;  %v2588_v34 = vrot.slane %v2371_v40, 2  ;;  %v2476_v59 = vrot.slane %v2371_v40, 1 }
 0x1ee   : > { %2338 = vst [vmem:[#allocation2 + $0x49] sm:$0xff] %v2251_v46  ;;  %v2254_v22 = vmax.f32 %v2222_v2, 0.0  ;;  %v2221_v49 = vadd.f32 %v7444_v33, %v2182_v37  ;;  %v2185_v19 = vmul.f32 %v7436_v52, %v2146_v60  ;;  %v1818_v16 = vpop.f32.mrf.mxu1  ;;  %v2034_v4 = vadd.f32 %v5187_v0, %v1808_v41  ;;  %v2707_v37 = vld [vmem:[%s9028_s2 + $0x78] sm:$0xff] }
 0x1ef   : > { %v2145_v29 = vadd.f32 %v2019_v58, %v1503_v27  ;;  %v2028_v9 = vpop.f32.mrf.mxu0  ;;  %v2473_v30 = vrot.slane %v2369_v54, 1  ;;  %v2474_v15 = vrot.slane %v7492_v12, 1  ;;  %v2585_v62 = vrot.slane %v2369_v54, 2  ;;  %v7514_v63 = vld [vmem:[#allocation2 + $0x40] sm:$0x3] }
 0x1f0   : > { %2341 = vst [vmem:[#allocation2 + $0x69] sm:$0xff] %v2254_v22  ;;  %v2253_v7 = vmax.f32 %v2221_v49, 0.0  ;;  %v2224_v45 = vadd.f32 %v7444_v33, %v2185_v19  ;;  %v2148_v31 = vadd.f32 %v2034_v4, %v7376_v48  ;;  %v1820_v35 = vpop.f32.mrf.mxu1  ;;  %v2029_v61 = vadd.f32 %v2028_v9, %v7454_v25 }
 0x1f1   : > { %v2184_v11 = vmul.f32 %v7436_v52, %v2145_v29  ;;  %v5190_v14 = vpop.f32.mrf.mxu0  ;;  %v7502_v41 = vsel %vm381_vm1, %v2473_v30, %v2474_v15  ;;  %v2586_v27 = vrot.slane %v7492_v12, 2  ;;  %v7506_v26 = vsel %vm381_vm1, %v2474_v15, %v2476_v59  ;;  %v7508_v28 = vld [vmem:[#allocation2 + $0x30] sm:$0xff]  ;;  %v7512_v21 = vld [vmem:[#allocation2 + $0x38] sm:$0xff] }
 0x1f2   : > { %2340 = vst [vmem:[#allocation2 + $0x61] sm:$0xff] %v2253_v7  ;;  %v2256_v23 = vmax.f32 %v2224_v45, 0.0  ;;  %v2187_v48 = vmul.f32 %v7436_v52, %v2148_v31  ;;  %v2147_v5 = vadd.f32 %v2029_v61, %v1513_v36  ;;  %v1823_v47 = vpop.f32.mrf.mxu1  ;;  %v2044_v25 = vadd.f32 %v5190_v14, %v1818_v16  ;;  %2870 = vmatprep.mubr.f32.mxu0 %v7502_v41 }
 0x1f3   : > { %v2223_v50 = vadd.f32 %v7444_v33, %v2184_v11  ;;  %v7518_v40 = vsel %vm494_vm0, %v2585_v62, %v2586_v27  ;;  %2871 = vmatmul.mubr.f32.vlgmr.msra.gmra.mxu0 %v2369_v54  ;;  %v7521_v46 = vsel %vm494_vm0, %v2586_v27, %v2588_v34  ;;  %v2038_v2 = vpop.f32.mrf.mxu0  ;;  %v2590_v36 = vrot.slane %v7508_v28, 2  ;;  %v2738_v34 = vld [vmem:[%s9028_s2 + $0x170] sm:$0xff]  ;;  %v2737_v62 = vld [vmem:[%s9028_s2 + $0x168] sm:$0xff] }
 0x1f4   : > { %2343 = vst [vmem:[#allocation2 + $0x81] sm:$0xff] %v2256_v23  ;;  %v2226_v60 = vadd.f32 %v7444_v33, %v2187_v48  ;;  %v2186_v38 = vmul.f32 %v7436_v52, %v2147_v5  ;;  %v2150_v58 = vadd.f32 %v2044_v25, %v7382_v17  ;;  %5250 = vmatprep.mubr.f32.mxu1 %v7518_v40  ;;  %v1825_v0 = vpop.f32.mrf.mxu1  ;;  %v2591_v49 = vrot.slane %v7512_v21, 2  ;;  %v7559_v35 = vld [vmem:[#allocation2 + $0x58] sm:$0x3] }
 0x1f5   : > { %v2039_v54 = vadd.f32 %v2038_v2, %v7472_v18  ;;  %v2255_v59 = vmax.f32 %v2223_v50, 0.0  ;;  %5251 = vmatmul.mubr.f32.vlgmr.msra.gmra.mxu1 %v7521_v46  ;;  %2875 = vmatprep.mubr.f32.mxu0 %v7506_v26  ;;  %v5193_v22 = vpop.f32.mrf.mxu0  ;;  %v2593_v19 = vrot.slane %v7514_v63, 2  ;;  %v2478_v17 = vrot.slane %v7508_v28, 1  ;;  %v7544_v30 = vld [vmem:[#allocation2 + $0x48] sm:$0xff]  ;;  %v7546_v15 = vld [vmem:[#allocation2 + $0x50] sm:$0xff] }
 0x1f6   : > { %v2258_v16 = vmax.f32 %v2226_v60, 0.0  ;;  %v2225_v4 = vadd.f32 %v7444_v33, %v2186_v38  ;;  %v2189_v18 = vmul.f32 %v7436_v52, %v2150_v58  ;;  %5299 = vmatpush3.msra.mxu0 %v7307_v53  ;;  %v1828_v9 = vpop.f32.mrf.mxu1  ;;  %3257 = vmatpush1.msra.mxu1 %v2707_v37  ;;  %v7552_v45 = vsel %vm494_vm0, %v2590_v36, %v2591_v49 }
 0x1f7   : > { %v2149_v29 = vadd.f32 %v2039_v54, %v7478_v13  ;;  %2342 = vst [vmem:[#allocation2 + $0x79] sm:$0xff] %v2255_v59  ;;  %v2054_v7 = vadd.f32 %v5193_v22, %v1828_v9  ;;  %2876 = vmatmul.mubr.f32.gmra.mxu0 %v7492_v12  ;;  %v7556_v13 = vsel %vm494_vm0, %v2591_v49, %v2593_v19  ;;  %v2048_v53 = vpop.f32.mrf.mxu0  ;;  %v2479_v31 = vrot.slane %v7512_v21, 1  ;;  %v2736_v12 = vld [vmem:[%s9028_s2 + $0x160] sm:$0xff]  ;;  %v7582_v0 = vld [vmem:[#allocation2 + $0x70] sm:$0x3]  ;;  %v2735_v49 = vld [vmem:[%s9028_s2 + $0x158] sm:$0xff] }
 0x1f8   : > { %5300 = vmatprep.subr.mxu0 %v2738_v34  ;;  %2345 = vst [vmem:[#allocation2 + $0x99] sm:$0xff] %v2258_v16  ;;  %v2257_v61 = vmax.f32 %v2225_v4, 0.0  ;;  %v2228_v11 = vadd.f32 %v7444_v33, %v2189_v18  ;;  %5253 = vmatprep.mubr.f32.mxu1 %v7552_v45  ;;  %v1830_v27 = vpop.f32.mrf.mxu1  ;;  %v2049_v23 = vadd.f32 %v2048_v53, %v1823_v47  ;;  %v2595_v50 = vrot.slane %v7544_v30, 2  ;;  %v7611_v53 = vld [vmem:[#allocation2] sm:$0xff] }
 0x1f9   : > { %v2188_v14 = vmul.f32 %v7436_v52, %v2149_v29  ;;  %5301 = vmatpush3.msra.mxu0 %v2738_v34  ;;  %v2152_v48 = vadd.f32 %v2054_v7, %v7390_v39  ;;  %5254 = vmatmul.mubr.f32.gmra.mxu1 %v7556_v13  ;;  %v7570_v5 = vsel %vm381_vm1, %v2478_v17, %v2479_v31  ;;  %v5196_v25 = vpop.f32.mrf.mxu0  ;;  %v2596_v2 = vrot.slane %v7546_v15, 2  ;;  %v7574_v36 = vld [vmem:[#allocation2 + $0x60] sm:$0xff]  ;;  %v7580_v58 = vld [vmem:[#allocation2 + $0x68] sm:$0xff] }
 0x1fa   : > { %5302 = vmatprep.subr.mxu0 %v2737_v62  ;;  %2344 = vst [vmem:[#allocation2 + $0x91] sm:$0xff] %v2257_v61  ;;  %v2260_v47 = vmax.f32 %v2228_v11, 0.0  ;;  %v2151_v60 = vadd.f32 %v2049_v23, %v7482_v32  ;;  %2880 = vmatprep.mubr.f32.mxu0 %v7570_v5  ;;  %v1833_v39 = vpop.f32.mrf.mxu1  ;;  %v2598_v38 = vrot.slane %v7559_v35, 2  ;;  %v2481_v32 = vrot.slane %v7514_v63, 1  ;;  %v2706_v63 = vld [vmem:[%s9028_s2 + $0x70] sm:$0xff] }
 0x1fb   : > { %v2227_v37 = vadd.f32 %v7444_v33, %v2188_v14  ;;  %5303 = vmatpush3.msra.mxu0 %v2737_v62  ;;  %v2191_v54 = vmul.f32 %v7436_v52, %v2152_v48  ;;  %v7586_v34 = vsel %vm494_vm0, %v2595_v50, %v2596_v2  ;;  %v2058_v59 = vpop.f32.mrf.mxu0  ;;  %v2600_v22 = vrot.slane %v7574_v36, 2  ;;  %3258 = vmatprep.subr.mxu1 %v7611_v53  ;;  %v7623_v48 = vld [vmem:[#allocation2 + $0x88] sm:$0x3] }
 0x1fc   : > { %2881 = vmatmul.mubr.f32.gmra.mxu0 %v7508_v28  ;;  %5304 = vmatprep.subr.mxu0 %v2736_v12  ;;  %2347 = vst [vmem:[#allocation2 + $0xb1] sm:$0xff] %v2260_v47  ;;  %v2190_v17 = vmul.f32 %v7436_v52, %v2151_v60  ;;  %v7597_v16 = vsel %vm494_vm0, %v2596_v2, %v2598_v38  ;;  %v1835_v28 = vpop.f32.mrf.mxu1  ;;  %v2601_v9 = vrot.slane %v7580_v58, 2  ;;  %v2603_v62 = vrot.slane %v7582_v0, 2 }
 0x1fd   : > { %v2259_v19 = vmax.f32 %v2227_v37, 0.0  ;;  %5256 = vmatprep.mubr.f32.mxu1 %v7586_v34  ;;  %v2059_v4 = vadd.f32 %v2058_v59, %v1833_v39  ;;  %5305 = vmatpush3.msra.mxu0 %v2736_v12  ;;  %v2230_v18 = vadd.f32 %v7444_v33, %v2191_v54  ;;  %v7605_v29 = vsel %vm381_vm1, %v2479_v31, %v2481_v32  ;;  %v7609_v7 = vpop.f32.mrf.mxu0  ;;  %v7635_v37 = vld [vmem:[%s9028_s2 + $0x150] sm:$0xff]  ;;  %v2705_v59 = vld [vmem:[%s9028_s2 + $0x68] sm:$0xff] }
 0x1fe   : > { %5257 = vmatmul.mubr.f32.gmra.mxu1 %v7597_v16  ;;  %v2229_v61 = vadd.f32 %v7444_v33, %v2190_v17  ;;  %2885 = vmatprep.mubr.f32.mxu0 %v7605_v29  ;;  %v1838_v14 = vpop.f32.mrf.mxu1  ;;  %v2483_v31 = vrot.slane %v7544_v30, 1  ;;  %v2484_v27 = vrot.slane %v7546_v15, 1  ;;  %v7619_v23 = vld [vmem:[#allocation2 + $0x78] sm:$0xff]  ;;  %v7621_v12 = vld [vmem:[#allocation2 + $0x80] sm:$0xff]  ;;  %v7626_v47 = vsel %vm494_vm0, %v2600_v22, %v2601_v9 }
 0x1ff   : > { %2346 = vst [vmem:[#allocation2 + $0xa9] sm:$0xff] %v2259_v19  ;;  %v2153_v11 = vadd.f32 %v2059_v4, %v7489_v57  ;;  %5306 = vmatprep.subr.mxu0 %v2735_v49  ;;  %v2262_v50 = vmax.f32 %v2230_v18, 0.0  ;;  %v2064_v2 = vadd.f32 %v5196_v25, %v1838_v14  ;;  %v7630_v57 = vsel %vm494_vm0, %v2601_v9, %v2603_v62  ;;  %v2068_v54 = vpop.f32.mrf.mxu0  ;;  %v7657_v4 = vld [vmem:[#allocation2 + $0xa0] sm:$0x3] }
 0x200   : > { %2886 = vmatmul.mubr.f32.gmra.mxu0 %v7512_v21  ;;  %3259 = vmatpush1.msra.mxu1 %v2706_v63  ;;  %v2261_v60 = vmax.f32 %v2229_v61, 0.0  ;;  %v1840_v25 = vpop.f32.mrf.mxu1  ;;  %v7640_v38 = vsel %vm381_vm1, %v2483_v31, %v2484_v27  ;;  %v2605_v21 = vrot.slane %v7619_v23, 2  ;;  %v1553_v32 = vadd.f32 %v7402_v3, %v7312_v10 }
 0x201   : > { %v2192_v39 = vmul.f32 %v7436_v52, %v2153_v11  ;;  %5259 = vmatprep.mubr.f32.mxu1 %v7626_v47  ;;  %5307 = vmatpush3.msra.mxu0 %v2735_v49  ;;  %2349 = vst [vmem:[#allocation2 + $0xc9] sm:$0xff] %v2262_v50  ;;  %v2154_v22 = vadd.f32 %v2064_v2, %v7395_v8  ;;  %v2606_v19 = vrot.slane %v7621_v12, 2  ;;  %v2608_v17 = vrot.slane %v7623_v48, 2  ;;  %v7653_v28 = vld [vmem:[#allocation2 + $0x90] sm:$0xff]  ;;  %v7655_v49 = vld [vmem:[#allocation2 + $0x98] sm:$0xff] }
 0x202   : > { %5260 = vmatmul.mubr.f32.gmra.mxu1 %v7630_v57  ;;  %2890 = vmatprep.mubr.f32.mxu0 %v7640_v38  ;;  %2348 = vst [vmem:[#allocation2 + $0xc1] sm:$0xff] %v2261_v60  ;;  %v1843_v3 = vpop.f32.mrf.mxu1  ;;  %v2486_v8 = vrot.slane %v7559_v35, 1  ;;  %v2610_v63 = vrot.slane %v7653_v28, 2  ;;  %v2611_v18 = vrot.slane %v7655_v49, 2  ;;  %v2613_v60 = vrot.slane %v7657_v4, 2 }
 0x203   : > { %v2231_v10 = vadd.f32 %v7444_v33, %v2192_v39  ;;  %3260 = vmatprep.subr.mxu1 %v7611_v53  ;;  %5308 = vmatprep.subr.mxu0 %v7635_v37  ;;  %v2193_v9 = vmul.f32 %v7436_v52, %v2154_v22  ;;  %v2069_v62 = vadd.f32 %v2068_v54, %v1843_v3  ;;  %v7673_v35 = vld [vmem:[#allocation2 + $0xb8] sm:$0x3]  ;;  %v7683_v39 = vpop.f32.mrf.mxu0 }
 0x204   : > { %v7667_v61 = vsel %vm494_vm0, %v2605_v21, %v2606_v19  ;;  %2891 = vmatmul.mubr.f32.gmra.mxu0 %v7544_v30  ;;  %v7671_v11 = vsel %vm494_vm0, %v2606_v19, %v2608_v17  ;;  %v1845_v31 = vpop.f32.mrf.mxu1  ;;  %v7677_v50 = vsel %vm381_vm1, %v2484_v27, %v2486_v8  ;;  %v7680_v2 = vsel %vm494_vm0, %v2610_v63, %v2611_v18  ;;  %v2704_v30 = vld [vmem:[%s9028_s2 + $0x60] sm:$0xff] }
 0x205   : > { %v2263_v14 = vmax.f32 %v2231_v10, 0.0  ;;  %5262 = vmatprep.mubr.f32.mxu1 %v7667_v61  ;;  %9330 = vst [vmem:[#allocation12_spill] sm:$0xff] %v7680_v2  ;;  %3261 = vmatpush1.msra.mxu1 %v2705_v59  ;;  %v2232_v25 = vadd.f32 %v7444_v33, %v2193_v9  ;;  %v2155_v54 = vadd.f32 %v2069_v62, %v1553_v32  ;;  %v2488_v27 = vrot.slane %v7574_v36, 1 }
 0x206   : > { %5263 = vmatmul.mubr.f32.gmra.mxu1 %v7671_v11  ;;  %2895 = vmatprep.mubr.f32.mxu0 %v7677_v50  ;;  %v2489_v21 = vrot.slane %v7580_v58, 1  ;;  %v7693_v22 = vld [vmem:[#allocation2 + $0xa8] sm:$0xff]  ;;  %v7695_v19 = vld [vmem:[#allocation2 + $0xb0] sm:$0xff]  ;;  %v1848_v59 = vpop.f32.mrf.mxu1  ;;  %v7699_v17 = vsel %vm494_vm0, %v2611_v18, %v2613_v60  ;;  %v2618_v3 = vrot.slane %v7673_v35, 2  ;;  %v2703_v18 = vld [vmem:[%s9028_s2 + $0x58] sm:$0xff]  ;;  %v2078_v60 = vpop.f32.mrf.mxu0 }
 0x207   : > { %2350 = vst [vmem:[#allocation2 + $0xd9] sm:$0xff] %v2263_v14  ;;  %5265 = vmatprep.mubr.f32.mxu1 %v7680_v2  ;;  %9331 = vst [vmem:[#allocation13_spill] sm:$0xff] %v7699_v17  ;;  %v2615_v32 = vrot.slane %v7693_v22, 2  ;;  %v2616_v10 = vrot.slane %v7695_v19, 2  ;;  %3262 = vmatprep.subr.mxu1 %v7611_v53  ;;  %v2264_v8 = vmax.f32 %v2232_v25, 0.0  ;;  %v2194_v63 = vmul.f32 %v7436_v52, %v2155_v54 }
 0x208   : > { %v2074_v9 = vadd.f32 %v7609_v7, %v1848_v59  ;;  %2896 = vmatmul.mubr.f32.gmra.mxu0 %v7546_v15  ;;  %v7709_v62 = vsel %vm381_vm1, %v2488_v27, %v2489_v21  ;;  %3263 = vmatpush1.msra.mxu1 %v2704_v30  ;;  %v1563_v14 = vadd.f32 %v7407_v20, %v7321_v51  ;;  %v1850_v31 = vpop.f32.mrf.mxu1  ;;  %v2491_v15 = vrot.slane %v7582_v0, 1  ;;  %v2702_v7 = vld [vmem:[%s9028_s2 + $0x50] sm:$0xff] }
 0x209   : > { %2900 = vmatprep.mubr.f32.mxu0 %v7709_v62  ;;  %v7718_v25 = vsel %vm494_vm0, %v2615_v32, %v2616_v10  ;;  %3264 = vmatprep.subr.mxu1 %v7611_v53  ;;  %2351 = vst [vmem:[#allocation2 + $0xe1] sm:$0xff] %v2264_v8  ;;  %v2233_v30 = vadd.f32 %v7444_v33, %v2194_v63  ;;  %v7731_v54 = vld [vmem:[#allocation2 + $0xc0] sm:$0xff]  ;;  %v7733_v27 = vld [vmem:[#allocation2 + $0xc8] sm:$0xff]  ;;  %v7735_v0 = vld [vmem:[#allocation2 + $0xd0] sm:$0x3] }
 0x20a   : > { %9332 = vst [vmem:[#allocation14_spill] sm:$0xff] %v7718_v25  ;;  %v2156_v51 = vadd.f32 %v2074_v9, %v7400_v55  ;;  %5266 = vmatmul.mubr.f32.gmra.mxu1 %v7699_v17  ;;  %v7729_v20 = vsel %vm494_vm0, %v2616_v10, %v2618_v3  ;;  %5309 = vmatpush3.msra.mxu0 %v7635_v37  ;;  %v1853_v59 = vpop.f32.mrf.mxu1  ;;  %v2620_v55 = vrot.slane %v7731_v54, 2  ;;  %v2621_v8 = vrot.slane %v7733_v27, 2 }
 0x20b   : > { %9333 = vst [vmem:[#allocation15_spill] sm:$0xff] %v7729_v20  ;;  %5268 = vmatprep.mubr.f32.mxu1 %v7718_v25  ;;  %v7740_v32 = vsel %vm381_vm1, %v2489_v21, %v2491_v15  ;;  %v2493_v10 = vrot.slane %v7619_v23, 1  ;;  %3265 = vmatpush1.msra.mxu1 %v2703_v18  ;;  %v2265_v3 = vmax.f32 %v2233_v30, 0.0  ;;  %v2079_v9 = vadd.f32 %v2078_v60, %v1853_v59  ;;  %v2701_v21 = vld [vmem:[%s9028_s2 + $0x48] sm:$0xff]  ;;  %v7757_v30 = vpop.f32.mrf.mxu0  ;;  %v2700_v59 = vld [vmem:[%s9028_s2 + $0x40] sm:$0xff] }
 0x20c   : > { %v2195_v63 = vmul.f32 %v7436_v52, %v2156_v51  ;;  %2901 = vmatmul.mubr.f32.gmra.mxu0 %v7574_v36  ;;  %v2494_v37 = vrot.slane %v7621_v12, 1  ;;  %3266 = vmatprep.subr.mxu1 %v7611_v53  ;;  %v1855_v31 = vpop.f32.mrf.mxu1  ;;  %v7754_v15 = vsel %vm494_vm0, %v2620_v55, %v2621_v8  ;;  %v2623_v18 = vrot.slane %v7735_v0, 2 }
 0x20d   : > { %2905 = vmatprep.mubr.f32.mxu0 %v7740_v32  ;;  %9334 = vst [vmem:[#allocation16_spill] sm:$0xff] %v7754_v15  ;;  %3267 = vmatpush1.msra.mxu1 %v2702_v7  ;;  %2352 = vst [vmem:[#allocation2 + $0xf1] sm:$0xff] %v2265_v3  ;;  %v2157_v60 = vadd.f32 %v2079_v9, %v1563_v14  ;;  %v2699_v9 = vld [vmem:[%s9028_s2 + $0x38] sm:$0xff] }
 0x20e   : > { %v2234_v36 = vadd.f32 %v7444_v33, %v2195_v63  ;;  %5269 = vmatmul.mubr.f32.gmra.mxu1 %v7729_v20  ;;  %v7761_v51 = vld [vmem:[#allocation2 + $0xd8] sm:$0xff]  ;;  %3268 = vmatprep.subr.mxu1 %v7611_v53  ;;  %v1858_v55 = vpop.f32.mrf.mxu1  ;;  %v7769_v31 = vsel %vm494_vm0, %v2621_v8, %v2623_v18  ;;  %v7775_v63 = vsel %vm381_vm1, %v2493_v10, %v2494_v37  ;;  %v2733_v8 = vld [vmem:[%s9028_s2 + $0x148] sm:$0xff]  ;;  %v2088_v18 = vpop.f32.mrf.mxu0 }
 0x20f   : > { %5271 = vmatprep.mubr.f32.mxu1 %v7754_v15  ;;  %9335 = vst [vmem:[#allocation17_spill] sm:$0xff] %v7769_v31  ;;  %3269 = vmatpush1.msra.mxu1 %v2701_v21  ;;  %v2196_v14 = vmul.f32 %v7436_v52, %v2157_v60  ;;  %v2084_v3 = vadd.f32 %v7683_v39, %v1858_v55  ;;  %v2496_v39 = vrot.slane %v7623_v48, 1  ;;  %v2625_v10 = vrot.slane %v7761_v51, 2 }
 0x210   : > { %v2266_v7 = vmax.f32 %v2234_v36, 0.0  ;;  %2906 = vmatmul.mubr.f32.gmra.mxu0 %v7580_v58  ;;  %3270 = vmatprep.subr.mxu1 %v7611_v53  ;;  %v1860_v21 = vpop.f32.mrf.mxu1  ;;  %v7786_v58 = vld [vmem:[#allocation2 + $0xe0] sm:$0xff]  ;;  %v7789_v36 = vld [vmem:[#allocation2 + $0xe8] sm:$0x3]  ;;  %v1573_v48 = vadd.f32 %v7412_v24, %v7329_v6  ;;  %v2698_v24 = vld [vmem:[%s9028_s2 + $0x30] sm:$0xff] }
 0x211   : > { %2910 = vmatprep.mubr.f32.mxu0 %v7775_v63  ;;  %3271 = vmatpush1.msra.mxu1 %v2700_v59  ;;  %v2235_v60 = vadd.f32 %v7444_v33, %v2196_v14  ;;  %v2158_v55 = vadd.f32 %v2084_v3, %v7405_v1  ;;  %v2626_v21 = vrot.slane %v7786_v58, 2  ;;  %v2628_v15 = vrot.slane %v7789_v36, 2  ;;  %v2732_v6 = vld [vmem:[%s9028_s2 + $0x140] sm:$0xff] }
 0x212   : > { %2353 = vst [vmem:[#allocation2 + $0xf9] sm:$0xff] %v2266_v7  ;;  %5272 = vmatmul.mubr.f32.gmra.mxu1 %v7769_v31  ;;  %3272 = vmatprep.subr.mxu1 %v7611_v53  ;;  %v1863_v20 = vpop.f32.mrf.mxu1  ;;  %v7800_v25 = vsel %vm381_vm1, %v2494_v37, %v2496_v39  ;;  %v2498_v59 = vrot.slane %v7653_v28, 1  ;;  %v2499_v7 = vrot.slane %v7655_v49, 1 }
 0x213   : > { %3273 = vmatpush1.msra.mxu1 %v2699_v9  ;;  %5310 = vmatprep.subr.mxu0 %v2733_v8  ;;  %v2267_v1 = vmax.f32 %v2235_v60, 0.0  ;;  %v2197_v14 = vmul.f32 %v7436_v52, %v2158_v55  ;;  %v2089_v3 = vadd.f32 %v2088_v18, %v1863_v20  ;;  %v7807_v31 = vsel %vm494_vm0, %v2625_v10, %v2626_v21  ;;  %v7821_v20 = vpop.f32.mrf.mxu0  ;;  %v2697_v10 = vld [vmem:[%s9028_s2 + $0x28] sm:$0xff] }
 0x214   : > { %2911 = vmatmul.mubr.f32.gmra.mxu0 %v7619_v23  ;;  %9336 = vst [vmem:[#allocation18_spill] sm:$0xff] %v7807_v31  ;;  %3274 = vmatprep.subr.mxu1 %v7611_v53  ;;  %v1865_v37 = vpop.f32.mrf.mxu1  ;;  %v7819_v23 = vsel %vm494_vm0, %v2626_v21, %v2628_v15  ;;  %v7825_v39 = vld [vmem:[#allocation2 + $0xf0] sm:$0xff] }
 0x215   : > { %2915 = vmatprep.mubr.f32.mxu0 %v7800_v25  ;;  %5274 = vmatprep.mubr.f32.mxu1 %v7807_v31  ;;  %9337 = vst [vmem:[#allocation20_spill] sm:$0xff] %v7819_v23  ;;  %2354 = vst [vmem:[#allocation2 + $0x109] sm:$0xff] %v2267_v1  ;;  %v2236_v9 = vadd.f32 %v7444_v33, %v2197_v14  ;;  %v2159_v18 = vadd.f32 %v2089_v3, %v1573_v48  ;;  %v2731_v1 = vld [vmem:[%s9028_s2 + $0x138] sm:$0xff]  ;;  %v2098_v3 = vpop.f32.mrf.mxu0 }
 0x216   : > { %5275 = vmatmul.mubr.f32.gmra.mxu1 %v7819_v23  ;;  %5311 = vmatpush3.msra.mxu0 %v2733_v8  ;;  %v1868_v60 = vpop.f32.mrf.mxu1  ;;  %v7834_v48 = vsel %vm381_vm1, %v2498_v59, %v2499_v7  ;;  %v2696_v8 = vld [vmem:[%s9028_s2 + $0x20] sm:$0xff]  ;;  %v2630_v59 = vrot.slane %v7825_v39, 2 }
 0x217   : > { %3275 = vmatpush1.msra.mxu1 %v2698_v24  ;;  %5312 = vmatprep.subr.mxu0 %v2732_v6  ;;  %v2268_v15 = vmax.f32 %v2236_v9, 0.0  ;;  %v2198_v55 = vmul.f32 %v7436_v52, %v2159_v18  ;;  %v2094_v21 = vadd.f32 %v7757_v30, %v1868_v60  ;;  %v2501_v30 = vrot.slane %v7657_v4, 1 }
 0x218   : > { %2916 = vmatmul.mubr.f32.gmra.mxu0 %v7621_v12  ;;  %3276 = vmatprep.subr.mxu1 %v7611_v53  ;;  %v1870_v14 = vpop.f32.mrf.mxu1  ;;  %v1583_v4 = vadd.f32 %v7417_v56, %v7340_v44  ;;  %v2695_v56 = vld [vmem:[%s9028_s2 + $0x18] sm:$0xff]  ;;  %v2730_v44 = vld [vmem:[%s9028_s2 + $0x130] sm:$0xff] }
 0x219   : > { %2920 = vmatprep.mubr.f32.mxu0 %v7834_v48  ;;  %v7845_v12 = vld [vmem:[#allocation2 + $0xf8] sm:$0xff]  ;;  %v7848_v24 = vld [vmem:[#allocation2 + $0x100] sm:$0x3]  ;;  %3277 = vmatpush1.msra.mxu1 %v2697_v10  ;;  %2355 = vst [vmem:[#allocation2 + $0x111] sm:$0xff] %v2268_v15  ;;  %v2237_v37 = vadd.f32 %v7444_v33, %v2198_v55  ;;  %v2160_v9 = vadd.f32 %v2094_v21, %v7410_v43  ;;  %v2503_v10 = vrot.slane %v7693_v22, 1  ;;  %v2504_v15 = vrot.slane %v7695_v19, 1 }
 0x21a   : > { %v2631_v18 = vrot.slane %v7845_v12, 2  ;;  %v2633_v60 = vrot.slane %v7848_v24, 2  ;;  %3278 = vmatprep.subr.mxu1 %v7611_v53  ;;  %5313 = vmatpush3.msra.mxu0 %v2732_v6  ;;  %v1873_v14 = vpop.f32.mrf.mxu1  ;;  %v7858_v23 = vsel %vm381_vm1, %v2499_v7, %v2501_v30 }
 0x21b   : > { %3279 = vmatpush1.msra.mxu1 %v2696_v8  ;;  %5314 = vmatprep.subr.mxu0 %v2731_v1  ;;  %v2269_v43 = vmax.f32 %v2237_v37, 0.0  ;;  %v2199_v55 = vmul.f32 %v7436_v52, %v2160_v9  ;;  %v2099_v21 = vadd.f32 %v2098_v3, %v1873_v14  ;;  %v7879_v8 = vpop.f32.mrf.mxu0  ;;  %v2694_v37 = vld [vmem:[%s9028_s2 + $0x10] sm:$0xff] }
 0x21c   : > { %2921 = vmatmul.mubr.f32.gmra.mxu0 %v7653_v28  ;;  %v7865_v6 = vsel %vm494_vm0, %v2630_v59, %v2631_v18  ;;  %3280 = vmatprep.subr.mxu1 %v7611_v53  ;;  %v1875_v7 = vpop.f32.mrf.mxu1  ;;  %v7877_v28 = vsel %vm494_vm0, %v2631_v18, %v2633_v60  ;;  %v7883_v59 = vld [vmem:[#allocation2 + $0x108] sm:$0xff] }
 0x21d   : > { %9338 = vst [vmem:[#allocation21_spill] sm:$0xff] %v7865_v6  ;;  %2925 = vmatprep.mubr.f32.mxu0 %v7858_v23  ;;  %5277 = vmatprep.mubr.f32.mxu1 %v7865_v6  ;;  %9339 = vst [vmem:[#allocation23_spill] sm:$0xff] %v7877_v28  ;;  %v2238_v3 = vadd.f32 %v7444_v33, %v2199_v55  ;;  %v2161_v30 = vadd.f32 %v2099_v21, %v1583_v4  ;;  %v2108_v21 = vpop.f32.mrf.mxu0 }
 0x21e   : > { %2356 = vst [vmem:[#allocation2 + $0x121] sm:$0xff] %v2269_v43  ;;  %5278 = vmatmul.mubr.f32.gmra.mxu1 %v7877_v28  ;;  %5315 = vmatpush3.msra.mxu0 %v2731_v1  ;;  %v1878_v9 = vpop.f32.mrf.mxu1  ;;  %v7892_v4 = vsel %vm381_vm1, %v2503_v10, %v2504_v15  ;;  %v2693_v43 = vld [vmem:[%s9028_s2 + $0x8] sm:$0xff]  ;;  %v2635_v10 = vrot.slane %v7883_v59, 2 }
 0x21f   : > { %3281 = vmatpush1.msra.mxu1 %v2695_v56  ;;  %5316 = vmatprep.subr.mxu0 %v2730_v44  ;;  %v2270_v18 = vmax.f32 %v2238_v3, 0.0  ;;  %v2200_v60 = vmul.f32 %v7436_v52, %v2161_v30  ;;  %v2104_v14 = vadd.f32 %v7821_v20, %v1878_v9  ;;  %v2729_v1 = vld [vmem:[%s9028_s2 + $0x128] sm:$0xff]  ;;  %v2506_v20 = vrot.slane %v7673_v35, 1  ;;  %v9341_v35 = vld [vmem:[#allocation3_spill] sm:$0xff] }
 0x220   : > { %2926 = vmatmul.mubr.f32.gmra.mxu0 %v7655_v49  ;;  %3282 = vmatprep.subr.mxu1 %v7611_v53  ;;  %v1880_v55 = vpop.f32.mrf.mxu1  ;;  %v7903_v49 = vld [vmem:[#allocation2 + $0x110] sm:$0xff]  ;;  %v7906_v56 = vld [vmem:[#allocation2 + $0x118] sm:$0x3] }
 0x221   : > { %2930 = vmatprep.mubr.f32.mxu0 %v7892_v4  ;;  %9340 = vst [vmem:[#allocation24_spill] sm:$0xff] %v7903_v49  ;;  %3283 = vmatpush1.msra.mxu1 %v2694_v37  ;;  %2357 = vst [vmem:[#allocation2 + $0x129] sm:$0xff] %v2270_v18  ;;  %v2239_v7 = vadd.f32 %v7444_v33, %v2200_v60  ;;  %v2162_v3 = vadd.f32 %v2104_v14, %v7415_v42  ;;  %v2636_v30 = vrot.slane %v7903_v49, 2  ;;  %v9342_v55 = vld [vmem:[#allocation7_spill] sm:$0xff] }
 0x222   : > { %v2638_v9 = vrot.slane %v7906_v56, 2  ;;  %3284 = vmatprep.subr.mxu1 %v7611_v53  ;;  %5317 = vmatpush3.msra.mxu0 %v2730_v44  ;;  %v1593_v28 = vadd.f32 %v9342_v55, %v9341_v35  ;;  %v1883_v6 = vpop.f32.mrf.mxu1  ;;  %v7916_v31 = vsel %vm381_vm1, %v2504_v15, %v2506_v20  ;;  %v2508_v37 = vrot.slane %v7731_v54, 1  ;;  %v2692_v15 = vld [vmem:[%s9028_s2] sm:$0xff] }
 0x223   : > { %v2509_v18 = vrot.slane %v7733_v27, 1  ;;  %3285 = vmatpush1.msra.mxu1 %v2693_v43  ;;  %5318 = vmatprep.subr.mxu0 %v2729_v1  ;;  %v2271_v42 = vmax.f32 %v2239_v7, 0.0  ;;  %v2201_v60 = vmul.f32 %v7436_v52, %v2162_v3  ;;  %v2109_v14 = vadd.f32 %v2108_v21, %v1883_v6  ;;  %v2728_v43 = vld [vmem:[%s9028_s2 + $0x120] sm:$0xff]  ;;  %v7937_v6 = vpop.f32.mrf.mxu0  ;;  %v2723_v3 = vld [vmem:[%s9028_s2 + $0xf8] sm:$0xff] }
 0x224   : > { %2931 = vmatmul.mubr.f32.gmra.mxu0 %v7693_v22  ;;  %v7923_v44 = vsel %vm494_vm0, %v2635_v10, %v2636_v30  ;;  %3286 = vmatprep.subr.mxu1 %v7611_v53  ;;  %v1885_v20 = vpop.f32.mrf.mxu1  ;;  %v7935_v22 = vsel %vm494_vm0, %v2636_v30, %v2638_v9 }
 0x225   : > { %9343 = vst [vmem:[#allocation26_spill] sm:$0xff] %v7923_v44  ;;  %2935 = vmatprep.mubr.f32.mxu0 %v7916_v31  ;;  %5280 = vmatprep.mubr.f32.mxu1 %v7923_v44  ;;  %9344 = vst [vmem:[#allocation27_spill] sm:$0xff] %v7935_v22  ;;  %v2240_v21 = vadd.f32 %v7444_v33, %v2201_v60  ;;  %v2163_v10 = vadd.f32 %v2109_v14, %v1593_v28  ;;  %v7941_v7 = vld [vmem:[#allocation2 + $0x120] sm:$0xff]  ;;  %v9346_v20 = vld [vmem:[#allocation6_spill] sm:$0xff] }
 0x226   : > { %2358 = vst [vmem:[#allocation2 + $0x139] sm:$0xff] %v2271_v42  ;;  %5281 = vmatmul.mubr.f32.gmra.mxu1 %v7935_v22  ;;  %5319 = vmatpush3.msra.mxu0 %v2729_v1  ;;  %v1888_v35 = vpop.f32.mrf.mxu1  ;;  %v7950_v28 = vsel %vm381_vm1, %v2508_v37, %v2509_v18  ;;  %v2722_v42 = vld [vmem:[%s9028_s2 + $0xf0] sm:$0xff]  ;;  %v2727_v1 = vld [vmem:[%s9028_s2 + $0x118] sm:$0xff]  ;;  %v2640_v37 = vrot.slane %v7941_v7, 2 }
 0x227   : > { %3287 = vmatpush1.msra.mxu1 %v2692_v15  ;;  %5320 = vmatprep.subr.mxu0 %v2728_v43  ;;  %v2272_v30 = vmax.f32 %v2240_v21, 0.0  ;;  %v2202_v9 = vmul.f32 %v7436_v52, %v2163_v10  ;;  %v2114_v55 = vadd.f32 %v7879_v8, %v1888_v35  ;;  %9345 = vst [vmem:[#allocation29_spill] sm:$0xff] %v7950_v28  ;;  %v2118_v52 = vpop.f32.mrf.mxu0  ;;  %v2511_v8 = vrot.slane %v7735_v0, 1  ;;  %v9347_v0 = vld [vmem:[#allocation4_spill] sm:$0xff] }
 0x228   : > { %2936 = vmatmul.mubr.f32.gmra.mxu0 %v7695_v19  ;;  %3288 = vmatprep.subr.mxu1 %v7611_v53  ;;  %v1890_v60 = vpop.f32.mrf.mxu1  ;;  %v7961_v19 = vld [vmem:[#allocation2 + $0x128] sm:$0xff]  ;;  %v7964_v14 = vld [vmem:[#allocation2 + $0x130] sm:$0x3] }
 0x229   : > { %2940 = vmatprep.mubr.f32.mxu0 %v7950_v28  ;;  %3289 = vmatpush2.msra.mxu1 %v2723_v3  ;;  %2359 = vst [vmem:[#allocation2 + $0x141] sm:$0xff] %v2272_v30  ;;  %v2241_v15 = vadd.f32 %v7444_v33, %v2202_v9  ;;  %v2164_v21 = vadd.f32 %v2114_v55, %v9346_v20  ;;  %v2641_v10 = vrot.slane %v7961_v19, 2  ;;  %v2643_v35 = vrot.slane %v7964_v14, 2  ;;  %v9348_v60 = vld [vmem:[#allocation9_spill] sm:$0xff] }
 0x22a   : > { %3290 = vmatprep.subr.mxu1 %v7611_v53  ;;  %5321 = vmatpush3.msra.mxu0 %v2728_v43  ;;  %v1603_v22 = vadd.f32 %v9348_v60, %v9347_v0  ;;  %v1893_v44 = vpop.f32.mrf.mxu1  ;;  %v7974_v28 = vsel %vm381_vm1, %v2509_v18, %v2511_v8  ;;  %v2514_v3 = vrot.slane %v7786_v58, 1  ;;  %v7980_v30 = vld [vmem:[%s9029_s3] ss:$0 sm:$0xff]  ;;  %v2721_v18 = vld [vmem:[%s9028_s2 + $0xe8] sm:$0xff]  ;;  %v2513_v20 = vrot.slane %v7761_v51, 1 }
 0x22b   : > { %9349 = vst [vmem:[#allocation30_spill] sm:$0xff] %v7974_v28  ;;  %3291 = vmatpush2.msra.mxu1 %v2722_v42  ;;  %5322 = vmatprep.subr.mxu0 %v2727_v1  ;;  %v2273_v33 = vmax.f32 %v2241_v15, 0.0  ;;  %v2203_v9 = vmul.f32 %v7980_v30, %v2164_v21  ;;  %v2119_v43 = vadd.f32 %v2118_v52, %v1893_v44  ;;  %v2726_v42 = vld [vmem:[%s9028_s2 + $0x110] sm:$0xff]  ;;  %v7999_v44 = vpop.f32.mrf.mxu0  ;;  %v8004_v52 = vld [vmem:[%s9030_s4] ss:$0 sm:$0xff]  ;;  %v2516_v0 = vrot.slane %v7789_v36, 1 }
 0x22c   : > { %2941 = vmatmul.mubr.f32.gmra.mxu0 %v7731_v54  ;;  %v7985_v55 = vsel %vm494_vm0, %v2640_v37, %v2641_v10  ;;  %3292 = vmatprep.subr.mxu1 %v7611_v53  ;;  %v1895_v8 = vpop.f32.mrf.mxu1  ;;  %v7997_v54 = vsel %vm494_vm0, %v2641_v10, %v2643_v35  ;;  %v2720_v10 = vld [vmem:[%s9028_s2 + $0xe0] sm:$0xff]  ;;  %v2725_v36 = vld [vmem:[%s9028_s2 + $0x108] sm:$0xff] }
 0x22d   : > { %9350 = vst [vmem:[#allocation32_spill] sm:$0xff] %v7985_v55  ;;  %2945 = vmatprep.mubr.f32.mxu0 %v7974_v28  ;;  %5283 = vmatprep.mubr.f32.mxu1 %v7985_v55  ;;  %9351 = vst [vmem:[#allocation35_spill] sm:$0xff] %v7997_v54  ;;  %v2242_v37 = vadd.f32 %v8004_v52, %v2203_v9  ;;  %v2165_v15 = vadd.f32 %v2119_v43, %v1603_v22  ;;  %v8009_v21 = vld [vmem:[#allocation2 + $0x138] sm:$0xff]  ;;  %v9355_v55 = vld [vmem:[#allocation11_spill] sm:$0xff] }
 0x22e   : > { %2360 = vst [vmem:[#allocation2 + $0x151] sm:$0xff] %v2273_v33  ;;  %5284 = vmatmul.mubr.f32.gmra.mxu1 %v7997_v54  ;;  %5323 = vmatpush3.msra.mxu0 %v2727_v1  ;;  %v1898_v35 = vpop.f32.mrf.mxu1  ;;  %v8019_v9 = vsel %vm381_vm1, %v2513_v20, %v2514_v3  ;;  %v2719_v1 = vld [vmem:[%s9028_s2 + $0xd8] sm:$0xff]  ;;  %v8042_v17 = vsel %vm381_vm1, %v2514_v3, %v2516_v0  ;;  %v2718_v3 = vld [vmem:[%s9028_s2 + $0xd0] sm:$0xff] }
 0x22f   : > { %3293 = vmatpush2.msra.mxu1 %v2721_v18  ;;  %5324 = vmatprep.subr.mxu0 %v2726_v42  ;;  %v2274_v60 = vmax.f32 %v2242_v37, 0.0  ;;  %v2204_v33 = vmul.f32 %v7980_v30, %v2165_v15  ;;  %v2124_v22 = vadd.f32 %v7937_v6, %v1898_v35  ;;  %9352 = vst [vmem:[#allocation38_spill] sm:$0xff] %v8019_v9  ;;  %v2128_v18 = vpop.f32.mrf.mxu0  ;;  %v9353_v15 = vld [vmem:[#allocation8_spill] sm:$0xff] }
 0x230   : > { %2946 = vmatmul.mubr.f32.gmra.mxu0 %v7733_v27  ;;  %3294 = vmatprep.subr.mxu1 %v7611_v53  ;;  %v1900_v43 = vpop.f32.mrf.mxu1  ;;  %v8029_v6 = vld [vmem:[#allocation2 + $0x140] sm:$0xff]  ;;  %v2645_v27 = vrot.slane %v8009_v21, 2  ;;  %v8032_v8 = vld [vmem:[#allocation2 + $0x148] sm:$0x3] }
 0x231   : > { %2950 = vmatprep.mubr.f32.mxu0 %v8019_v9  ;;  %3295 = vmatpush2.msra.mxu1 %v2720_v10  ;;  %2361 = vst [vmem:[#allocation2 + $0x159] sm:$0xff] %v2274_v60  ;;  %v2243_v37 = vadd.f32 %v8004_v52, %v2204_v33  ;;  %v2166_v20 = vadd.f32 %v2124_v22, %v9353_v15  ;;  %v2646_v35 = vrot.slane %v8029_v6, 2  ;;  %v2648_v54 = vrot.slane %v8032_v8, 2  ;;  %v9354_v43 = vld [vmem:[#allocation5_spill] sm:$0xff] }
 0x232   : > { %3296 = vmatprep.subr.mxu1 %v7611_v53  ;;  %5325 = vmatpush3.msra.mxu0 %v2726_v42  ;;  %v1613_v9 = vadd.f32 %v9355_v55, %v9354_v43  ;;  %v1903_v28 = vpop.f32.mrf.mxu1  ;;  %v2519_v10 = vrot.slane %v7845_v12, 1  ;;  %v2724_v55 = vld [vmem:[%s9028_s2 + $0x100] sm:$0xff] }
 0x233   : > { %3297 = vmatpush2.msra.mxu1 %v2719_v1  ;;  %5326 = vmatprep.subr.mxu0 %v2725_v36  ;;  %v2275_v60 = vmax.f32 %v2243_v37, 0.0  ;;  %v2205_v33 = vmul.f32 %v7980_v30, %v2166_v20  ;;  %v2129_v22 = vadd.f32 %v2128_v18, %v1903_v28  ;;  %v8048_v15 = vsel %vm494_vm0, %v2645_v27, %v2646_v35  ;;  %v2717_v27 = vld [vmem:[%s9028_s2 + $0xc8] sm:$0xff] }
 0x234   : > { %2951 = vmatmul.mubr.f32.gmra.mxu0 %v7761_v51  ;;  %9356 = vst [vmem:[#allocation39_spill] sm:$0xff] %v8048_v15  ;;  %3298 = vmatprep.subr.mxu1 %v7611_v53  ;;  %v1905_v42 = vpop.f32.mrf.mxu1  ;;  %v8060_v51 = vsel %vm494_vm0, %v2646_v35, %v2648_v54  ;;  %v2518_v1 = vrot.slane %v7825_v39, 1  ;;  %v2521_v20 = vrot.slane %v7848_v24, 1 }
 0x235   : > { %2955 = vmatprep.mubr.f32.mxu0 %v8042_v17  ;;  %5286 = vmatprep.mubr.f32.mxu1 %v8048_v15  ;;  %2362 = vst [vmem:[#allocation2 + $0x169] sm:$0xff] %v2275_v60  ;;  %v2244_v28 = vadd.f32 %v8004_v52, %v2205_v33  ;;  %v2167_v0 = vadd.f32 %v2129_v22, %v1613_v9  ;;  %v8065_v18 = vld [vmem:[#allocation2 + $0x150] sm:$0xff]  ;;  %v9357_v22 = vld [vmem:[#allocation10_spill] sm:$0xff] }
 0x236   : > { %5287 = vmatmul.mubr.f32.gmra.mxu1 %v8060_v51  ;;  %5327 = vmatpush3.msra.mxu0 %v2725_v36  ;;  %v1908_v37 = vpop.f32.mrf.mxu1  ;;  %v8075_v43 = vsel %vm381_vm1, %v2518_v1, %v2519_v10  ;;  %v2716_v36 = vld [vmem:[%s9028_s2 + $0xc0] sm:$0xff]  ;;  %v2650_v60 = vrot.slane %v8065_v18, 2  ;;  %v2524_v1 = vrot.slane %v7903_v49, 1 }
 0x237   : > { %3299 = vmatpush2.msra.mxu1 %v2718_v3  ;;  %5328 = vmatprep.subr.mxu0 %v2724_v55  ;;  %v2276_v54 = vmax.f32 %v2244_v28, 0.0  ;;  %v2206_v35 = vmul.f32 %v7980_v30, %v2167_v0  ;;  %v2134_v9 = vadd.f32 %v7999_v44, %v1908_v37  ;;  %v8093_v0 = vsel %vm381_vm1, %v2519_v10, %v2521_v20  ;;  %v2715_v10 = vld [vmem:[%s9028_s2 + $0xb8] sm:$0xff] }
 0x238   : > { %2956 = vmatmul.mubr.f32.gmra.mxu0 %v7786_v58  ;;  %3300 = vmatprep.subr.mxu1 %v7611_v53  ;;  %v8082_v24 = vld [vmem:[#allocation2 + $0x158] sm:$0xff]  ;;  %v8085_v33 = vld [vmem:[#allocation2 + $0x160] sm:$0x3]  ;;  %v1910_v44 = vpop.f32.mrf.mxu1 }
 0x239   : > { %2960 = vmatprep.mubr.f32.mxu0 %v8075_v43  ;;  %3301 = vmatpush2.msra.mxu1 %v2717_v27  ;;  %2363 = vst [vmem:[#allocation2 + $0x171] sm:$0xff] %v2276_v54  ;;  %v2245_v58 = vadd.f32 %v8004_v52, %v2206_v35  ;;  %v2168_v3 = vadd.f32 %v2134_v9, %v9357_v22  ;;  %v2651_v42 = vrot.slane %v8082_v24, 2  ;;  %v2653_v28 = vrot.slane %v8085_v33, 2 }
 0x23a   : > { %3302 = vmatprep.subr.mxu1 %v7611_v53  ;;  %5329 = vmatpush3.msra.mxu0 %v2724_v55  ;;  %v2714_v55 = vld [vmem:[%s9028_s2 + $0xb0] sm:$0xff] }
 0x23b   : > { %3303 = vmatpush2.msra.mxu1 %v2716_v36  ;;  %3772 = vmatprep.subr.mxu0 %v7611_v53  ;;  %v2277_v27 = vmax.f32 %v2245_v58, 0.0  ;;  %v2207_v37 = vmul.f32 %v7980_v30, %v2168_v3  ;;  %v8100_v54 = vsel %vm494_vm0, %v2650_v60, %v2651_v42  ;;  %v8103_v35 = vsel %vm494_vm0, %v2651_v42, %v2653_v28  ;;  %v2713_v60 = vld [vmem:[%s9028_s2 + $0xa8] sm:$0xff] }
 0x23c   : > { %2961 = vmatmul.mubr.f32.gmra.mxu0 %v7825_v39  ;;  %9358 = vst [vmem:[#allocation43_spill] sm:$0xff] %v8103_v35  ;;  %3304 = vmatprep.subr.mxu1 %v7611_v53  ;;  %v2523_v39 = vrot.slane %v7883_v59, 1  ;;  %v8117_v20 = vld [vmem:[#allocation2 + $0x168] sm:$0xff] }
 0x23d   : > { %2965 = vmatprep.mubr.f32.mxu0 %v8093_v0  ;;  %5289 = vmatprep.mubr.f32.mxu1 %v8100_v54  ;;  %2364 = vst [vmem:[#allocation2 + $0x181] sm:$0xff] %v2277_v27  ;;  %v2246_v30 = vadd.f32 %v8004_v52, %v2207_v37  ;;  %v2526_v52 = vrot.slane %v7906_v56, 1  ;;  %v2529_v27 = vrot.slane %v7961_v19, 1  ;;  %v2712_v37 = vld [vmem:[%s9028_s2 + $0xa0] sm:$0xff] }
 0x23e   : > { %5290 = vmatmul.mubr.f32.gmra.mxu1 %v8103_v35  ;;  %v8121_v36 = vsel %vm381_vm1, %v2523_v39, %v2524_v1  ;;  %v2468_v39 = vrot.slane %v7611_v53, 1 }
 0x23f   : > { %3305 = vmatpush2.msra.mxu1 %v2715_v10  ;;  %v2278_v9 = vmax.f32 %v2246_v30, 0.0  ;;  %v8139_v56 = vsel %vm381_vm1, %v2524_v1, %v2526_v52  ;;  %v2528_v1 = vrot.slane %v7941_v7, 1  ;;  %v2711_v10 = vld [vmem:[%s9028_s2 + $0x98] sm:$0xff]  ;;  %v2710_v52 = vld [vmem:[%s9028_s2 + $0x90] sm:$0xff] }
 0x240   : > { %2966 = vmatmul.mubr.f32.gmra.mxu0 %v7845_v12  ;;  %3306 = vmatprep.subr.mxu1 %v7611_v53  ;;  %v8129_v44 = vld [vmem:[#allocation2 + $0x170] sm:$0xff]  ;;  %v8131_v58 = vld [vmem:[#allocation2 + $0x178] sm:$0x3]  ;;  %v2655_v12 = vrot.slane %v8117_v20, 2 }
 0x241   : > { %2970 = vmatprep.mubr.f32.mxu0 %v8121_v36  ;;  %3307 = vmatpush2.msra.mxu1 %v2714_v55  ;;  %2365 = vst [vmem:[#allocation2 + $0x189] sm:$0xff] %v2278_v9  ;;  %v2656_v22 = vrot.slane %v8129_v44, 2  ;;  %v2658_v3 = vrot.slane %v8131_v58, 2  ;;  %v8164_v55 = vsel %vm381_vm1, %v2528_v1, %v2529_v27  ;;  %v2531_v9 = vrot.slane %v7964_v14, 1 }
 0x242   : > { %3308 = vmatprep.subr.mxu1 %v7611_v53  ;;  %9361 = vst [vmem:[#allocation42_spill] sm:$0xff] %v8164_v55 }
 0x243   : > { %3309 = vmatpush2.msra.mxu1 %v2713_v60  ;;  %v8142_v42 = vsel %vm494_vm0, %v2655_v12, %v2656_v22  ;;  %v8145_v28 = vsel %vm494_vm0, %v2656_v22, %v2658_v3  ;;  %v8171_v60 = vld [vmem:[#allocation2 + $0x10] sm:$0x3] }
 0x244   : > { %2971 = vmatmul.mubr.f32.gmra.mxu0 %v7883_v59  ;;  %9359 = vst [vmem:[#allocation46_spill] sm:$0xff] %v8142_v42  ;;  %9360 = vst [vmem:[#allocation47_spill] sm:$0xff] %v8145_v28  ;;  %3310 = vmatprep.subr.mxu1 %v7611_v53  ;;  %v8159_v30 = vld [vmem:[#allocation2 + $0x180] sm:$0xff]  ;;  %v2471_v1 = vrot.slane %v8171_v60, 1 }
 0x245   : > { %2975 = vmatprep.mubr.f32.mxu0 %v8139_v56  ;;  %5292 = vmatprep.mubr.f32.mxu1 %v8142_v42  ;;  %v2750_v3 = vrot.slane %v8159_v30, 2 }
 0x246   : > { %5293 = vmatmul.mubr.f32.gmra.mxu1 %v8145_v28  ;;  %v8185_v28 = vsel %vm381_vm1, %v2529_v27, %v2531_v9  ;;  %v2533_v27 = vrot.slane %v8009_v21, 1  ;;  %v2708_v9 = vld [vmem:[%s9028_s2 + $0x80] sm:$0xff] }
 0x247   : > { %3311 = vmatpush2.msra.mxu1 %v2712_v37 }
 0x248   : > { %2976 = vmatmul.mubr.f32.gmra.mxu0 %v7903_v49  ;;  %3312 = vmatprep.subr.mxu1 %v7611_v53  ;;  %v8174_v12 = vld [vmem:[#allocation2 + $0x188] sm:$0xff]  ;;  %v8176_v22 = vld [vmem:[#allocation2 + $0x190] sm:$0x3] }
 0x249   : > { %2980 = vmatprep.mubr.f32.mxu0 %v8164_v55  ;;  %3313 = vmatpush2.msra.mxu1 %v2711_v10  ;;  %v2751_v37 = vrot.slane %v8174_v12, 2  ;;  %v2753_v14 = vrot.slane %v8176_v22, 2  ;;  %v2709_v49 = vld [vmem:[%s9028_s2 + $0x88] sm:$0xff] }
 0x24a   : > { %3314 = vmatprep.subr.mxu1 %v7611_v53 }
 0x24b   : > { %3315 = vmatpush2.msra.mxu1 %v2710_v52  ;;  %v8188_v10 = vsel %vm494_vm0, %v2750_v3, %v2751_v37  ;;  %v8191_v55 = vsel %vm494_vm0, %v2751_v37, %v2753_v14  ;;  %v2534_v52 = vrot.slane %v8029_v6, 1  ;;  %v4684_v3 = vld [vmem:[%s9028_s2 + $0x478] sm:$0xff]  ;;  %v2536_v14 = vrot.slane %v8032_v8, 1 }
 0x24c   : > { %2981 = vmatmul.mubr.f32.gmra.mxu0 %v7941_v7  ;;  %9362 = vst [vmem:[#allocation44_spill] sm:$0xff] %v8188_v10  ;;  %9363 = vst [vmem:[#allocation3_spill] sm:$0xff] %v8191_v55  ;;  %3316 = vmatprep.subr.mxu1 %v7611_v53 }
 0x24d   : > { %2985 = vmatprep.mubr.f32.mxu0 %v8185_v28  ;;  %5295 = vmatprep.mubr.f32.mxu1 %v8188_v10  ;;  %v8211_v37 = vsel %vm381_vm1, %v2533_v27, %v2534_v52  ;;  %v4682_v27 = vld [vmem:[%s9028_s2 + $0x468] sm:$0xff]  ;;  %v8225_v8 = vsel %vm381_vm1, %v2534_v52, %v2536_v14  ;;  %v4680_v52 = vld [vmem:[%s9028_s2 + $0x458] sm:$0xff]  ;;  %v4671_v10 = vld [vmem:[%s9028_s2 + $0x410] sm:$0xff] }
 0x24e   : > { %5296 = vmatmul.mubr.f32.gmra.mxu1 %v8191_v55  ;;  %v2472_v55 = vsel %vm381_vm1, %v2468_v39, %v2471_v1  ;;  %v2538_v1 = vrot.slane %v8065_v18, 1  ;;  %v5504_v14 = vld [vmem:[#allocation2 + $0x18] sm:$0xff] }
 0x24f   : > { %3317 = vmatpush2.msra.mxu1 %v2709_v49  ;;  %3320 = vmatprep.mubr.f32.mxu1 %v2468_v39  ;;  %v4683_v49 = vld [vmem:[%s9028_s2 + $0x470] sm:$0xff]  ;;  %v2539_v39 = vrot.slane %v8082_v24, 1 }
 0x250   : > { %2986 = vmatmul.mubr.f32.gmra.mxu0 %v7961_v19  ;;  %3318 = vmatprep.subr.mxu1 %v7611_v53 }
 0x251   : > { %2990 = vmatprep.mubr.f32.mxu0 %v8211_v37  ;;  %3319 = vmatpush2.msra.mxu1 %v2708_v9  ;;  %v8242_v9 = vsel %vm381_vm1, %v2538_v1, %v2539_v39  ;;  %v2543_v1 = vrot.slane %v8117_v20, 1 }
 0x252   : > { %3321 = vmatmul.mubr.f32.vlgmr.msra.gmra.mxu1 %v7611_v53  ;;  %5378 = vmatprep.subr.mxu1 %v4684_v3  ;;  %v4681_v53 = vld [vmem:[%s9028_s2 + $0x460] sm:$0xff] }
 0x253   : > { %3325 = vmatprep.mubr.f32.mxu1 %v2472_v55  ;;  %5379 = vmatpush3.msra.mxu1 %v4684_v3  ;;  %v8232_v55 = vld [vmem:[#allocation2] sm:$0xff]  ;;  %v2541_v3 = vrot.slane %v8085_v33, 1 }
 0x254   : > { %2991 = vmatmul.mubr.f32.gmra.mxu0 %v8009_v21  ;;  %5380 = vmatprep.subr.mxu1 %v4683_v49  ;;  %9364 = vst [vmem:[#allocation7_spill] sm:$0xff] %v8232_v55 }
 0x255   : > { %2995 = vmatprep.mubr.f32.mxu0 %v8225_v8  ;;  %5381 = vmatpush3.msra.mxu1 %v4683_v49  ;;  %v4678_v49 = vld [vmem:[%s9028_s2 + $0x448] sm:$0xff]  ;;  %v8255_v33 = vsel %vm381_vm1, %v2539_v39, %v2541_v3  ;;  %v4676_v39 = vld [vmem:[%s9028_s2 + $0x438] sm:$0xff]  ;;  %v2546_v3 = vrot.slane %v8131_v58, 1 }
 0x256   : > { %3326 = vmatmul.mubr.f32.gmra.mxu1 %v8232_v55  ;;  %5382 = vmatprep.subr.mxu1 %v4682_v27  ;;  %v4674_v58 = vld [vmem:[%s9028_s2 + $0x428] sm:$0xff] }
 0x257   : > { %3330 = vmatprep.mubr.f32.mxu1 %v7502_v41  ;;  %5383 = vmatpush3.msra.mxu1 %v4682_v27  ;;  %v4679_v41 = vld [vmem:[%s9028_s2 + $0x450] sm:$0xff]  ;;  %v2544_v27 = vrot.slane %v8129_v44, 1 }
 0x258   : > { %2996 = vmatmul.mubr.f32.gmra.mxu0 %v8029_v6  ;;  %5384 = vmatprep.subr.mxu1 %v4681_v53 }
 0x259   : > { %3000 = vmatprep.mubr.f32.mxu0 %v8242_v9  ;;  %5385 = vmatpush3.msra.mxu1 %v4681_v53  ;;  %v5505_v53 = vld [vmem:[#allocation2 + $0x20] sm:$0xff] }
 0x25a   : > { %3331 = vmatmul.mubr.f32.gmra.mxu1 %v5504_v14  ;;  %5386 = vmatprep.subr.mxu1 %v4680_v52  ;;  %v8276_v14 = vld [vmem:[#allocation2 + $0x30] sm:$0xff] }
 0x25b   : > { %3335 = vmatprep.mubr.f32.mxu1 %v7506_v26  ;;  %5387 = vmatpush3.msra.mxu1 %v4680_v52  ;;  %v4677_v26 = vld [vmem:[%s9028_s2 + $0x440] sm:$0xff]  ;;  %v8269_v52 = vsel %vm381_vm1, %v2543_v1, %v2544_v27  ;;  %v8292_v1 = vld [vmem:[#allocation2 + $0x38] sm:$0xff] }
 0x25c   : > { %3001 = vmatmul.mubr.f32.gmra.mxu0 %v8065_v18  ;;  %5388 = vmatprep.subr.mxu1 %v4679_v41 }
 0x25d   : > { %3005 = vmatprep.mubr.f32.mxu0 %v8255_v33  ;;  %5389 = vmatpush3.msra.mxu1 %v4679_v41  ;;  %v4675_v41 = vld [vmem:[%s9028_s2 + $0x430] sm:$0xff] }
 0x25e   : > { %3336 = vmatmul.mubr.f32.gmra.mxu1 %v5505_v53  ;;  %5390 = vmatprep.subr.mxu1 %v4678_v49  ;;  %v4673_v53 = vld [vmem:[%s9028_s2 + $0x420] sm:$0xff] }
 0x25f   : > { %3340 = vmatprep.mubr.f32.mxu1 %v7570_v5  ;;  %5391 = vmatpush3.msra.mxu1 %v4678_v49  ;;  %v8285_v49 = vsel %vm381_vm1, %v2544_v27, %v2546_v3  ;;  %v4672_v27 = vld [vmem:[%s9028_s2 + $0x418] sm:$0xff] }
 0x260   : > { %3006 = vmatmul.mubr.f32.gmra.mxu0 %v8082_v24  ;;  %5392 = vmatprep.subr.mxu1 %v4677_v26  ;;  %9365 = vst [vmem:[#allocation6_spill] sm:$0xff] %v8285_v49 }
 0x261   : > { %3010 = vmatprep.mubr.f32.mxu0 %v8269_v52  ;;  %5393 = vmatpush3.msra.mxu1 %v4677_v26  ;;  %v2744_v26 = vrot.slane %v8174_v12, 1 }
 0x262   : > { %3341 = vmatmul.mubr.f32.gmra.mxu1 %v8276_v14  ;;  %5394 = vmatprep.subr.mxu1 %v4676_v39 }
 0x263   : > { %3345 = vmatprep.mubr.f32.mxu1 %v7605_v29  ;;  %5395 = vmatpush3.msra.mxu1 %v4676_v39  ;;  %v2743_v39 = vrot.slane %v8159_v30, 1 }
 0x264   : > { %3011 = vmatmul.mubr.f32.gmra.mxu0 %v8117_v20  ;;  %5396 = vmatprep.subr.mxu1 %v4675_v41 }
 0x265   : > { %3015 = vmatprep.mubr.f32.mxu0 %v8285_v49  ;;  %5397 = vmatpush3.msra.mxu1 %v4675_v41  ;;  %v8302_v3 = vsel %vm381_vm1, %v2743_v39, %v2744_v26  ;;  %v2746_v41 = vrot.slane %v8176_v22, 1  ;;  %v8313_v49 = vrot.slane %v8232_v55, 2  ;;  %v4670_v22 = vld [vmem:[%s9028_s2 + $0x408] sm:$0xff]  ;;  %v2583_v39 = vrot.slane %v8171_v60, 2  ;;  %v8336_v60 = vld [vmem:[#allocation2 + $0x60] sm:$0xff] }
 0x266   : > { %3346 = vmatmul.mubr.f32.gmra.mxu1 %v8292_v1  ;;  %5398 = vmatprep.subr.mxu1 %v4674_v58  ;;  %9366 = vst [vmem:[#allocation4_spill] sm:$0xff] %v8302_v3 }
 0x267   : > { %3350 = vmatprep.mubr.f32.mxu1 %v7640_v38  ;;  %5399 = vmatpush3.msra.mxu1 %v4674_v58  ;;  %v8309_v58 = vld [vmem:[#allocation2 + $0x48] sm:$0xff]  ;;  %9367 = vst [vmem:[#allocation9_spill] sm:$0xff] %v8313_v49 }
 0x268   : > { %3016 = vmatmul.mubr.f32.gmra.mxu0 %v8129_v44  ;;  %5400 = vmatprep.subr.mxu1 %v4673_v53 }
 0x269   : > { %3020 = vmatprep.mubr.f32.mxu0 %v8302_v3  ;;  %5401 = vmatpush3.msra.mxu1 %v4673_v53  ;;  %v8321_v53 = vsel %vm381_vm1, %v2744_v26, %v2746_v41  ;;  %v4669_v3 = vld [vmem:[%s9028_s2 + $0x400] sm:$0xff]  ;;  %v8347_v26 = vld [vmem:[#allocation2 + $0x68] sm:$0xff]  ;;  %v8361_v41 = vld [vmem:[#allocation2 + $0x78] sm:$0xff] }
 0x26a   : > { %3351 = vmatmul.mubr.f32.gmra.mxu1 %v8309_v58  ;;  %5402 = vmatprep.subr.mxu1 %v4672_v27  ;;  %9368 = vst [vmem:[#allocation8_spill] sm:$0xff] %v8321_v53 }
 0x26b   : > { %3355 = vmatprep.mubr.f32.mxu1 %v7677_v50  ;;  %5403 = vmatpush3.msra.mxu1 %v4672_v27  ;;  %v8328_v27 = vld [vmem:[#allocation2 + $0x50] sm:$0xff] }
 0x26c   : > { %3021 = vmatmul.mubr.f32.gmra.mxu0 %v8159_v30  ;;  %5404 = vmatprep.subr.mxu1 %v4671_v10  ;;  %v2584_v30 = vsel %vm494_vm0, %v8313_v49, %v2583_v39  ;;  %v8375_v39 = vld [vmem:[#allocation2 + $0x80] sm:$0xff] }
 0x26d   : > { %3025 = vmatprep.mubr.f32.mxu0 %v8321_v53  ;;  %5405 = vmatpush3.msra.mxu1 %v4671_v10  ;;  %v4652_v10 = vld [vmem:[%s9028_s2 + $0x378] sm:$0xff]  ;;  %v9370_v53 = vld [vmem:[#allocation14_spill] sm:$0xff] }
 0x26e   : > { %3356 = vmatmul.mubr.f32.gmra.mxu1 %v8328_v27  ;;  %5406 = vmatprep.subr.mxu1 %v4670_v22 }
 0x26f   : > { %3360 = vmatprep.mubr.f32.mxu1 %v7709_v62  ;;  %5407 = vmatpush3.msra.mxu1 %v4670_v22  ;;  %v4648_v22 = vld [vmem:[%s9028_s2 + $0x358] sm:$0xff] }
 0x270   : > { %3026 = vmatmul.mubr.f32.gmra.mxu0 %v8174_v12  ;;  %5408 = vmatprep.subr.mxu1 %v4669_v3  ;;  %v4651_v12 = vld [vmem:[%s9028_s2 + $0x370] sm:$0xff] }
 0x271   : > { %5330 = vmatprep.mubr.f32.mxu0 %v8313_v49  ;;  %5409 = vmatpush3.msra.mxu1 %v4669_v3  ;;  %v4650_v3 = vld [vmem:[%s9028_s2 + $0x368] sm:$0xff]  ;;  %v8431_v49 = vld [vmem:[#allocation2 + $0xb0] sm:$0xff] }
 0x272   : > { %3361 = vmatmul.mubr.f32.gmra.mxu1 %v8336_v60  ;;  %9371 = vst [vmem:[#allocation5_spill] sm:$0xff] %v8431_v49 }
 0x273   : > { %3365 = vmatprep.mubr.f32.mxu1 %v7740_v32 }
 0x274   : > { %5331 = vmatmul.mubr.f32.vlgmr.msra.gmra.mxu0 %v2584_v30  ;;  %v4646_v30 = vld [vmem:[%s9028_s2 + $0x348] sm:$0xff] }
 0x275   : > { %5333 = vmatprep.mubr.f32.mxu0 %v7518_v40  ;;  %3773 = vmatpush1.msra.mxu0 %v4652_v10  ;;  %v4649_v40 = vld [vmem:[%s9028_s2 + $0x360] sm:$0xff] }
 0x276   : > { %3366 = vmatmul.mubr.f32.gmra.mxu1 %v8347_v26  ;;  %3774 = vmatprep.subr.mxu0 %v8232_v55  ;;  %v4645_v10 = vld [vmem:[%s9028_s2 + $0x340] sm:$0xff] }
 0x277   : > { %3370 = vmatprep.mubr.f32.mxu1 %v7775_v63  ;;  %3775 = vmatpush1.msra.mxu0 %v4651_v12  ;;  %v8389_v12 = vld [vmem:[#allocation2 + $0x90] sm:$0xff] }
 0x278   : > { %5334 = vmatmul.mubr.f32.gmra.mxu0 %v7521_v46  ;;  %3776 = vmatprep.subr.mxu0 %v8232_v55  ;;  %v4647_v46 = vld [vmem:[%s9028_s2 + $0x350] sm:$0xff] }
 0x279   : > { %5336 = vmatprep.mubr.f32.mxu0 %v7552_v45  ;;  %3777 = vmatpush1.msra.mxu0 %v4650_v3  ;;  %v4644_v3 = vld [vmem:[%s9028_s2 + $0x338] sm:$0xff] }
 0x27a   : > { %3371 = vmatmul.mubr.f32.gmra.mxu1 %v8361_v41  ;;  %3778 = vmatprep.subr.mxu0 %v8232_v55 }
 0x27b   : > { %3375 = vmatprep.mubr.f32.mxu1 %v7800_v25  ;;  %3779 = vmatpush1.msra.mxu0 %v4649_v40  ;;  %v4643_v40 = vld [vmem:[%s9028_s2 + $0x330] sm:$0xff] }
 0x27c   : > { %5337 = vmatmul.mubr.f32.gmra.mxu0 %v7556_v13  ;;  %3780 = vmatprep.subr.mxu0 %v8232_v55 }
 0x27d   : > { %5339 = vmatprep.mubr.f32.mxu0 %v7586_v34  ;;  %3781 = vmatpush1.msra.mxu0 %v4648_v22  ;;  %v8403_v22 = vld [vmem:[#allocation2 + $0x98] sm:$0xff] }
 0x27e   : > { %3376 = vmatmul.mubr.f32.gmra.mxu1 %v8375_v39  ;;  %3782 = vmatprep.subr.mxu0 %v8232_v55 }
 0x27f   : > { %3380 = vmatprep.mubr.f32.mxu1 %v7834_v48  ;;  %3783 = vmatpush1.msra.mxu0 %v4647_v46  ;;  %v4642_v46 = vld [vmem:[%s9028_s2 + $0x328] sm:$0xff] }
 0x280   : > { %5340 = vmatmul.mubr.f32.gmra.mxu0 %v7597_v16  ;;  %3784 = vmatprep.subr.mxu0 %v8232_v55 }
 0x281   : > { %5342 = vmatprep.mubr.f32.mxu0 %v7626_v47  ;;  %3785 = vmatpush1.msra.mxu0 %v4646_v30  ;;  %v4641_v30 = vld [vmem:[%s9028_s2 + $0x320] sm:$0xff] }
 0x282   : > { %3381 = vmatmul.mubr.f32.gmra.mxu1 %v8389_v12  ;;  %3786 = vmatprep.subr.mxu0 %v8232_v55 }
 0x283   : > { %3385 = vmatprep.mubr.f32.mxu1 %v7858_v23  ;;  %3787 = vmatpush1.msra.mxu0 %v4645_v10  ;;  %v8417_v10 = vld [vmem:[#allocation2 + $0xa8] sm:$0xff] }
 0x284   : > { %5343 = vmatmul.mubr.f32.gmra.mxu0 %v7630_v57  ;;  %3788 = vmatprep.subr.mxu0 %v8232_v55 }
 0x285   : > { %5345 = vmatprep.mubr.f32.mxu0 %v7667_v61  ;;  %3789 = vmatpush1.msra.mxu0 %v4644_v3  ;;  %v4640_v3 = vld [vmem:[%s9028_s2 + $0x318] sm:$0xff] }
 0x286   : > { %3386 = vmatmul.mubr.f32.gmra.mxu1 %v8403_v22  ;;  %3790 = vmatprep.subr.mxu0 %v8232_v55 }
 0x287   : > { %3390 = vmatprep.mubr.f32.mxu1 %v7892_v4  ;;  %3791 = vmatpush1.msra.mxu0 %v4643_v40  ;;  %v9369_v40 = vld [vmem:[#allocation13_spill] sm:$0xff] }
 0x288   : > { %5346 = vmatmul.mubr.f32.gmra.mxu0 %v7671_v11  ;;  %3792 = vmatprep.subr.mxu0 %v8232_v55 }
 0x289   : > { %5348 = vmatprep.mubr.f32.mxu0 %v7680_v2  ;;  %3793 = vmatpush1.msra.mxu0 %v4642_v46  ;;  %v4639_v46 = vld [vmem:[%s9028_s2 + $0x310] sm:$0xff] }
 0x28a   : > { %3391 = vmatmul.mubr.f32.gmra.mxu1 %v8417_v10  ;;  %3794 = vmatprep.subr.mxu0 %v8232_v55  ;;  %v9373_v2 = vld [vmem:[#allocation15_spill] sm:$0xff] }
 0x28b   : > { %3395 = vmatprep.mubr.f32.mxu1 %v7916_v31  ;;  %3795 = vmatpush1.msra.mxu0 %v4641_v30  ;;  %v4638_v30 = vld [vmem:[%s9028_s2 + $0x308] sm:$0xff] }
 0x28c   : > { %5349 = vmatmul.mubr.f32.gmra.mxu0 %v9369_v40  ;;  %3796 = vmatprep.subr.mxu0 %v8232_v55  ;;  %v9372_v40 = vld [vmem:[#allocation29_spill] sm:$0xff] }
 0x28d   : > { %5351 = vmatprep.mubr.f32.mxu0 %v9370_v53  ;;  %3797 = vmatpush1.msra.mxu0 %v4640_v3  ;;  %v4637_v3 = vld [vmem:[%s9028_s2 + $0x300] sm:$0xff]  ;;  %v9374_v53 = vld [vmem:[#allocation16_spill] sm:$0xff] }
 0x28e   : > { %3396 = vmatmul.mubr.f32.gmra.mxu1 %v8431_v49  ;;  %3798 = vmatprep.subr.mxu0 %v8232_v55  ;;  %v8445_v49 = vld [vmem:[#allocation2 + $0xc0] sm:$0xff] }
 0x28f   : > { %3400 = vmatprep.mubr.f32.mxu1 %v9372_v40  ;;  %3799 = vmatpush1.msra.mxu0 %v4639_v46  ;;  %9375 = vst [vmem:[#allocation11_spill] sm:$0xff] %v8445_v49  ;;  %v4668_v46 = vld [vmem:[%s9028_s2 + $0x3f8] sm:$0xff]  ;;  %v9377_v40 = vld [vmem:[#allocation17_spill] sm:$0xff] }
 0x290   : > { %5352 = vmatmul.mubr.f32.gmra.mxu0 %v9373_v2  ;;  %3800 = vmatprep.subr.mxu0 %v8232_v55  ;;  %v9376_v2 = vld [vmem:[#allocation30_spill] sm:$0xff] }
 0x291   : > { %5354 = vmatprep.mubr.f32.mxu0 %v9374_v53  ;;  %3801 = vmatpush1.msra.mxu0 %v4638_v30  ;;  %v4667_v30 = vld [vmem:[%s9028_s2 + $0x3f0] sm:$0xff]  ;;  %v9378_v53 = vld [vmem:[#allocation18_spill] sm:$0xff] }
 0x292   : > { %3401 = vmatmul.mubr.f32.gmra.mxu1 %v8445_v49  ;;  %3802 = vmatprep.subr.mxu0 %v8232_v55  ;;  %v8459_v49 = vld [vmem:[#allocation2 + $0xc8] sm:$0xff] }
 0x293   : > { %3405 = vmatprep.mubr.f32.mxu1 %v9376_v2  ;;  %3803 = vmatpush1.msra.mxu0 %v4637_v3  ;;  %9379 = vst [vmem:[#allocation10_spill] sm:$0xff] %v8459_v49  ;;  %v4666_v3 = vld [vmem:[%s9028_s2 + $0x3e8] sm:$0xff]  ;;  %v9381_v2 = vld [vmem:[#allocation20_spill] sm:$0xff] }
 0x294   : > { %5355 = vmatmul.mubr.f32.gmra.mxu0 %v9377_v40  ;;  %3804 = vmatprep.subr.mxu0 %v8232_v55  ;;  %v9380_v40 = vld [vmem:[#allocation38_spill] sm:$0xff] }
 0x295   : > { %5357 = vmatprep.mubr.f32.mxu0 %v9378_v53  ;;  %3805 = vmatpush2.msra.mxu0 %v4668_v46  ;;  %v4665_v46 = vld [vmem:[%s9028_s2 + $0x3e0] sm:$0xff] }
 0x296   : > { %3406 = vmatmul.mubr.f32.gmra.mxu1 %v8459_v49  ;;  %3806 = vmatprep.subr.mxu0 %v8232_v55  ;;  %v9382_v53 = vld [vmem:[#allocation21_spill] sm:$0xff]  ;;  %v8473_v49 = vld [vmem:[#allocation2 + $0xd8] sm:$0xff] }
 0x297   : > { %3410 = vmatprep.mubr.f32.mxu1 %v9380_v40  ;;  %3807 = vmatpush2.msra.mxu0 %v4667_v30  ;;  %9383 = vst [vmem:[#allocation38_spill] sm:$0xff] %v8473_v49  ;;  %v4664_v30 = vld [vmem:[%s9028_s2 + $0x3d8] sm:$0xff] }
 0x298   : > { %5358 = vmatmul.mubr.f32.gmra.mxu0 %v9381_v2  ;;  %3808 = vmatprep.subr.mxu0 %v8232_v55  ;;  %v9384_v2 = vld [vmem:[#allocation23_spill] sm:$0xff] }
 0x299   : > { %5360 = vmatprep.mubr.f32.mxu0 %v9382_v53  ;;  %3809 = vmatpush2.msra.mxu0 %v4666_v3  ;;  %v4663_v3 = vld [vmem:[%s9028_s2 + $0x3d0] sm:$0xff]  ;;  %v9385_v53 = vld [vmem:[#allocation26_spill] sm:$0xff] }
 0x29a   : > { %3411 = vmatmul.mubr.f32.gmra.mxu1 %v8473_v49  ;;  %3810 = vmatprep.subr.mxu0 %v8232_v55  ;;  %v8487_v49 = vld [vmem:[#allocation2 + $0xe0] sm:$0xff] }
 0x29b   : > { %3415 = vmatprep.mubr.f32.mxu1 %v8042_v17  ;;  %3811 = vmatpush2.msra.mxu0 %v4665_v46  ;;  %9386 = vst [vmem:[#allocation68_spill] sm:$0xff] %v8487_v49  ;;  %v4662_v46 = vld [vmem:[%s9028_s2 + $0x3c8] sm:$0xff] }
 0x29c   : > { %5361 = vmatmul.mubr.f32.gmra.mxu0 %v9384_v2  ;;  %3812 = vmatprep.subr.mxu0 %v8232_v55  ;;  %v9387_v2 = vld [vmem:[#allocation27_spill] sm:$0xff] }
 0x29d   : > { %5363 = vmatprep.mubr.f32.mxu0 %v9385_v53  ;;  %3813 = vmatpush2.msra.mxu0 %v4664_v30  ;;  %v4661_v30 = vld [vmem:[%s9028_s2 + $0x3c0] sm:$0xff]  ;;  %v9388_v53 = vld [vmem:[#allocation32_spill] sm:$0xff] }
 0x29e   : > { %3416 = vmatmul.mubr.f32.gmra.mxu1 %v8487_v49  ;;  %3814 = vmatprep.subr.mxu0 %v8232_v55  ;;  %v8501_v49 = vld [vmem:[#allocation2 + $0xf0] sm:$0xff] }
 0x29f   : > { %3420 = vmatprep.mubr.f32.mxu1 %v8075_v43  ;;  %3815 = vmatpush2.msra.mxu0 %v4663_v3  ;;  %v4660_v3 = vld [vmem:[%s9028_s2 + $0x3b8] sm:$0xff] }
 0x2a0   : > { %5364 = vmatmul.mubr.f32.gmra.mxu0 %v9387_v2  ;;  %3816 = vmatprep.subr.mxu0 %v8232_v55  ;;  %v9389_v2 = vld [vmem:[#allocation35_spill] sm:$0xff] }
 0x2a1   : > { %5366 = vmatprep.mubr.f32.mxu0 %v9388_v53  ;;  %3817 = vmatpush2.msra.mxu0 %v4662_v46  ;;  %v4659_v46 = vld [vmem:[%s9028_s2 + $0x3b0] sm:$0xff]  ;;  %v8515_v53 = vld [vmem:[#allocation2 + $0xf8] sm:$0xff] }
 0x2a2   : > { %3421 = vmatmul.mubr.f32.gmra.mxu1 %v8501_v49  ;;  %3818 = vmatprep.subr.mxu0 %v8232_v55 }
 0x2a3   : > { %3425 = vmatprep.mubr.f32.mxu1 %v8093_v0  ;;  %3819 = vmatpush2.msra.mxu0 %v4661_v30  ;;  %v4658_v30 = vld [vmem:[%s9028_s2 + $0x3a8] sm:$0xff] }
 0x2a4   : > { %5367 = vmatmul.mubr.f32.gmra.mxu0 %v9389_v2  ;;  %3820 = vmatprep.subr.mxu0 %v8232_v55 }
 0x2a5   : > { %5369 = vmatprep.mubr.f32.mxu0 %v8048_v15  ;;  %3821 = vmatpush2.msra.mxu0 %v4660_v3  ;;  %v4657_v3 = vld [vmem:[%s9028_s2 + $0x3a0] sm:$0xff]  ;;  %v4656_v15 = vld [vmem:[%s9028_s2 + $0x398] sm:$0xff] }
 0x2a6   : > { %3426 = vmatmul.mubr.f32.gmra.mxu1 %v8515_v53  ;;  %3822 = vmatprep.subr.mxu0 %v8232_v55 }
 0x2a7   : > { %3430 = vmatprep.mubr.f32.mxu1 %v8121_v36  ;;  %3823 = vmatpush2.msra.mxu0 %v4659_v46  ;;  %v4655_v46 = vld [vmem:[%s9028_s2 + $0x390] sm:$0xff] }
 0x2a8   : > { %5370 = vmatmul.mubr.f32.gmra.mxu0 %v8060_v51  ;;  %3824 = vmatprep.subr.mxu0 %v8232_v55 }
 0x2a9   : > { %5372 = vmatprep.mubr.f32.mxu0 %v8100_v54  ;;  %3825 = vmatpush2.msra.mxu0 %v4658_v30  ;;  %v4654_v30 = vld [vmem:[%s9028_s2 + $0x388] sm:$0xff] }
 0x2aa   : > { %3431 = vmatmul.mubr.f32.gmra.mxu1 %v7883_v59  ;;  %3826 = vmatprep.subr.mxu0 %v8232_v55  ;;  %v9390_v59 = vld [vmem:[#allocation24_spill] sm:$0xff] }
 0x2ab   : > { %3435 = vmatprep.mubr.f32.mxu1 %v8139_v56  ;;  %3827 = vmatpush2.msra.mxu0 %v4657_v3  ;;  %v9391_v3 = vld [vmem:[#allocation42_spill] sm:$0xff] }
 0x2ac   : > { %5373 = vmatmul.mubr.f32.gmra.mxu0 %v8103_v35  ;;  %3828 = vmatprep.subr.mxu0 %v8232_v55  ;;  %v9392_v35 = vld [vmem:[#allocation47_spill] sm:$0xff] }
 0x2ad   : > { %5375 = vmatprep.mubr.f32.mxu0 %v8142_v42  ;;  %3829 = vmatpush2.msra.mxu0 %v4656_v15  ;;  %v4653_v42 = vld [vmem:[%s9028_s2 + $0x380] sm:$0xff] }
 0x2ae   : > { %3436 = vmatmul.mubr.f32.gmra.mxu1 %v9390_v59  ;;  %3830 = vmatprep.subr.mxu0 %v8232_v55 }
 0x2af   : > { %3440 = vmatprep.mubr.f32.mxu1 %v9391_v3  ;;  %3831 = vmatpush2.msra.mxu0 %v4655_v46 }
 0x2b0   : > { %5376 = vmatmul.mubr.f32.gmra.mxu0 %v9392_v35  ;;  %3832 = vmatprep.subr.mxu0 %v8232_v55 }
 0x2b1   : > { %3833 = vmatpush2.msra.mxu0 %v4654_v30  ;;  %3836 = vmatprep.mubr.f32.mxu0 %v7570_v5 }
 0x2b2   : > { %3441 = vmatmul.mubr.f32.gmra.mxu1 %v7941_v7  ;;  %3834 = vmatprep.subr.mxu0 %v8232_v55 }
 0x2b3   : > { %3445 = vmatprep.mubr.f32.mxu1 %v8185_v28  ;;  %3835 = vmatpush2.msra.mxu0 %v4653_v42  ;;  %v2872_v15 = vpop.f32.mrf.mxu0 }
 0x2b4   : > { %3837 = vmatmul.mubr.f32.vlgmr.msra.gmra.mxu0 %v8276_v14 }
 0x2b5   : > { %3841 = vmatprep.mubr.f32.mxu0 %v7605_v29  ;;  %v5252_v46 = vpop.f32.mrf.mxu1  ;;  %v2874_v59 = vpop.f32.mrf.mxu0 }
 0x2b6   : > { %3446 = vmatmul.mubr.f32.gmra.mxu1 %v7961_v19 }
 0x2b7   : > { %3450 = vmatprep.mubr.f32.mxu1 %v8211_v37  ;;  %v3097_v30 = vpop.f32.mrf.mxu1  ;;  %v2877_v5 = vpop.f32.mrf.mxu0 }
 0x2b8   : > { %3842 = vmatmul.mubr.f32.gmra.mxu0 %v8292_v1  ;;  %v8561_v7 = vadd.f32 %v3097_v30, %v2872_v15  ;;  %v8563_v55 = vadd.f32 %v5252_v46, %v2877_v5 }
 0x2b9   : > { %3846 = vmatprep.mubr.f32.mxu0 %v7640_v38  ;;  %v5255_v42 = vpop.f32.mrf.mxu1  ;;  %v2879_v14 = vpop.f32.mrf.mxu0 }
 0x2ba   : > { %3451 = vmatmul.mubr.f32.gmra.mxu1 %v8009_v21 }
 0x2bb   : > { %3455 = vmatprep.mubr.f32.mxu1 %v8225_v8  ;;  %v3107_v29 = vpop.f32.mrf.mxu1 }
 0x2bc   : > { %v2882_v19 = vpop.f32.mrf.mxu0  ;;  %3847 = vmatmul.mubr.f32.gmra.mxu0 %v8309_v58 }
 0x2bd   : > { %v8569_v59 = vadd.f32 %v3107_v29, %v2882_v19  ;;  %3851 = vmatprep.mubr.f32.mxu0 %v7677_v50 }
 0x2be   : > { %v5258_v1 = vpop.f32.mrf.mxu1  ;;  %v2884_v15 = vpop.f32.mrf.mxu0  ;;  %3456 = vmatmul.mubr.f32.gmra.mxu1 %v8029_v6 }
 0x2bf   : > { %3460 = vmatprep.mubr.f32.mxu1 %v8242_v9 }
 0x2c0   : > { %v3117_v38 = vpop.f32.mrf.mxu1  ;;  %v2887_v46 = vpop.f32.mrf.mxu0  ;;  %3852 = vmatmul.mubr.f32.gmra.mxu0 %v8328_v27 }
 0x2c1   : > { %v8575_v21 = vadd.f32 %v5255_v42, %v2887_v46  ;;  %3856 = vmatprep.mubr.f32.mxu0 %v7709_v62 }
 0x2c2   : > { %v5261_v30 = vpop.f32.mrf.mxu1  ;;  %v2889_v58 = vpop.f32.mrf.mxu0  ;;  %3461 = vmatmul.mubr.f32.gmra.mxu1 %v8065_v18 }
 0x2c3   : > { %3465 = vmatprep.mubr.f32.mxu1 %v8255_v33  ;;  %v9398_v58 = vld [vmem:[#allocation14_spill] sm:$0xff] }
 0x2c4   : > { %v3127_v50 = vpop.f32.mrf.mxu1  ;;  %v2892_v5 = vpop.f32.mrf.mxu0  ;;  %3857 = vmatmul.mubr.f32.gmra.mxu0 %v8336_v60  ;;  %v9393_v60 = vld [vmem:[#allocation6_spill] sm:$0xff] }
 0x2c5   : > { %v8581_v6 = vadd.f32 %v3117_v38, %v2892_v5  ;;  %3861 = vmatprep.mubr.f32.mxu0 %v7740_v32  ;;  %v9395_v38 = vld [vmem:[#allocation5_spill] sm:$0xff]  ;;  %v9399_v5 = vld [vmem:[#allocation11_spill] sm:$0xff] }
 0x2c6   : > { %v5264_v14 = vpop.f32.mrf.mxu1  ;;  %v2894_v27 = vpop.f32.mrf.mxu0  ;;  %3466 = vmatmul.mubr.f32.gmra.mxu1 %v8082_v24 }
 0x2c7   : > { %3470 = vmatprep.mubr.f32.mxu1 %v8269_v52 }
 0x2c8   : > { %v2897_v62 = vpop.f32.mrf.mxu0  ;;  %3862 = vmatmul.mubr.f32.gmra.mxu0 %v8347_v26  ;;  %v3137_v42 = vpop.f32.mrf.mxu1 }
 0x2c9   : > { %v8587_v18 = vadd.f32 %v5258_v1, %v2897_v62  ;;  %3866 = vmatprep.mubr.f32.mxu0 %v7775_v63  ;;  %v9401_v62 = vld [vmem:[#allocation15_spill] sm:$0xff] }
 0x2ca   : > { %v2899_v29 = vpop.f32.mrf.mxu0  ;;  %3471 = vmatmul.mubr.f32.gmra.mxu1 %v8117_v20  ;;  %v5267_v24 = vpop.f32.mrf.mxu1 }
 0x2cb   : > { %3475 = vmatprep.mubr.f32.mxu1 %v9393_v60 }
 0x2cc   : > { %v2902_v32 = vpop.f32.mrf.mxu0  ;;  %3867 = vmatmul.mubr.f32.gmra.mxu0 %v8361_v41  ;;  %v3147_v20 = vpop.f32.mrf.mxu1 }
 0x2cd   : > { %v8593_v19 = vadd.f32 %v3127_v50, %v2902_v32  ;;  %3871 = vmatprep.mubr.f32.mxu0 %v7800_v25 }
 0x2ce   : > { %v2904_v15 = vpop.f32.mrf.mxu0  ;;  %3476 = vmatmul.mubr.f32.gmra.mxu1 %v8129_v44 }
 0x2cf   : > { %5410 = vmatprep.mubr.f32.mxu1 %v7552_v45  ;;  %v5270_v45 = vpop.f32.mrf.mxu1 }
 0x2d0   : > { %v2907_v63 = vpop.f32.mrf.mxu0  ;;  %3872 = vmatmul.mubr.f32.gmra.mxu0 %v8375_v39 }
 0x2d1   : > { %v8599_v26 = vadd.f32 %v5261_v30, %v2907_v63  ;;  %3876 = vmatprep.mubr.f32.mxu0 %v7834_v48 }
 0x2d2   : > { %v2909_v1 = vpop.f32.mrf.mxu0  ;;  %5411 = vmatmul.mubr.f32.vlgmr.msra.gmra.mxu1 %v7556_v13  ;;  %v3157_v13 = vpop.f32.mrf.mxu1 }
 0x2d3   : > { %5413 = vmatprep.mubr.f32.mxu1 %v7586_v34  ;;  %v9404_v1 = vld [vmem:[#allocation17_spill] sm:$0xff] }
 0x2d4   : > { %v2912_v25 = vpop.f32.mrf.mxu0  ;;  %3877 = vmatmul.mubr.f32.gmra.mxu0 %v8389_v12 }
 0x2d5   : > { %v8605_v41 = vadd.f32 %v3137_v42, %v2912_v25  ;;  %3881 = vmatprep.mubr.f32.mxu0 %v7858_v23  ;;  %v9402_v42 = vld [vmem:[#allocation16_spill] sm:$0xff]  ;;  %v9405_v25 = vld [vmem:[#allocation18_spill] sm:$0xff] }
 0x2d6   : > { %v2914_v44 = vpop.f32.mrf.mxu0  ;;  %5414 = vmatmul.mubr.f32.gmra.mxu1 %v7597_v16  ;;  %v5273_v16 = vpop.f32.mrf.mxu1 }
 0x2d7   : > { %5416 = vmatprep.mubr.f32.mxu1 %v7626_v47 }
 0x2d8   : > { %v2917_v48 = vpop.f32.mrf.mxu0  ;;  %3882 = vmatmul.mubr.f32.gmra.mxu0 %v8403_v22  ;;  %v9394_v22 = vld [vmem:[#allocation12_spill] sm:$0xff] }
 0x2d9   : > { %v8611_v39 = vadd.f32 %v5264_v14, %v2917_v48  ;;  %3886 = vmatprep.mubr.f32.mxu0 %v7892_v4  ;;  %v9400_v14 = vld [vmem:[#allocation30_spill] sm:$0xff] }
 0x2da   : > { %v2919_v34 = vpop.f32.mrf.mxu0  ;;  %5417 = vmatmul.mubr.f32.gmra.mxu1 %v7630_v57  ;;  %v9396_v57 = vld [vmem:[#allocation29_spill] sm:$0xff]  ;;  %v9406_v48 = vld [vmem:[#allocation38_spill] sm:$0xff] }
 0x2db   : > { %5419 = vmatprep.mubr.f32.mxu1 %v7667_v61  ;;  %v3167_v61 = vpop.f32.mrf.mxu1 }
 0x2dc   : > { %v2922_v23 = vpop.f32.mrf.mxu0  ;;  %3887 = vmatmul.mubr.f32.gmra.mxu0 %v8417_v10  ;;  %v9397_v10 = vld [vmem:[#allocation13_spill] sm:$0xff] }
 0x2dd   : > { %v8617_v12 = vadd.f32 %v3147_v20, %v2922_v23  ;;  %3891 = vmatprep.mubr.f32.mxu0 %v7916_v31  ;;  %v5276_v31 = vpop.f32.mrf.mxu1 }
 0x2de   : > { %v2924_v47 = vpop.f32.mrf.mxu0  ;;  %5420 = vmatmul.mubr.f32.gmra.mxu1 %v7671_v11 }
 0x2df   : > { %5422 = vmatprep.mubr.f32.mxu1 %v9394_v22  ;;  %v3177_v29 = vpop.f32.mrf.mxu1  ;;  %v9407_v47 = vld [vmem:[#allocation20_spill] sm:$0xff] }
 0x2e0   : > { %v2927_v4 = vpop.f32.mrf.mxu0  ;;  %3892 = vmatmul.mubr.f32.gmra.mxu0 %v9395_v38 }
 0x2e1   : > { %v8623_v46 = vadd.f32 %v5267_v24, %v2927_v4  ;;  %3896 = vmatprep.mubr.f32.mxu0 %v9396_v57  ;;  %v9403_v24 = vld [vmem:[#allocation10_spill] sm:$0xff]  ;;  %v5279_v63 = vpop.f32.mrf.mxu1  ;;  %v9409_v4 = vld [vmem:[#allocation68_spill] sm:$0xff] }
 0x2e2   : > { %v2929_v30 = vpop.f32.mrf.mxu0  ;;  %5423 = vmatmul.mubr.f32.gmra.mxu1 %v9397_v10 }
 0x2e3   : > { %5425 = vmatprep.mubr.f32.mxu1 %v9398_v58  ;;  %v3187_v34 = vpop.f32.mrf.mxu1  ;;  %v9410_v30 = vld [vmem:[#allocation23_spill] sm:$0xff] }
 0x2e4   : > { %v2932_v50 = vpop.f32.mrf.mxu0  ;;  %3897 = vmatmul.mubr.f32.gmra.mxu0 %v9399_v5 }
 0x2e5   : > { %v8629_v11 = vadd.f32 %v3157_v13, %v2932_v50  ;;  %3901 = vmatprep.mubr.f32.mxu0 %v9400_v14  ;;  %v9413_v14 = vld [vmem:[#allocation32_spill] sm:$0xff] }
 0x2e6   : > { %v2934_v27 = vpop.f32.mrf.mxu0  ;;  %5426 = vmatmul.mubr.f32.gmra.mxu1 %v9401_v62 }
 0x2e7   : > { %5428 = vmatprep.mubr.f32.mxu1 %v9402_v42  ;;  %v9414_v42 = vld [vmem:[#allocation39_spill] sm:$0xff] }
 0x2e8   : > { %v2937_v32 = vpop.f32.mrf.mxu0  ;;  %3902 = vmatmul.mubr.f32.gmra.mxu0 %v9403_v24 }
 0x2e9   : > { %v8635_v15 = vadd.f32 %v5270_v45, %v2937_v32  ;;  %3906 = vmatprep.mubr.f32.mxu0 %v9380_v40  ;;  %v9408_v45 = vld [vmem:[#allocation21_spill] sm:$0xff]  ;;  %v5282_v40 = vpop.f32.mrf.mxu1  ;;  %v5524_v32 = vld [vmem:[#allocation2 + $0x108] sm:$0xff] }
 0x2ea   : > { %v2939_v20 = vpop.f32.mrf.mxu0  ;;  %5429 = vmatmul.mubr.f32.gmra.mxu1 %v9404_v1 }
 0x2eb   : > { %5431 = vmatprep.mubr.f32.mxu1 %v9405_v25  ;;  %v5525_v20 = vld [vmem:[#allocation2 + $0x110] sm:$0xff] }
 0x2ec   : > { %v2942_v44 = vpop.f32.mrf.mxu0  ;;  %3907 = vmatmul.mubr.f32.gmra.mxu0 %v9406_v48  ;;  %v9416_v48 = vld [vmem:[#allocation46_spill] sm:$0xff] }
 0x2ed   : > { %v8641_v13 = vadd.f32 %v3167_v61, %v2942_v44  ;;  %3911 = vmatprep.mubr.f32.mxu0 %v8042_v17  ;;  %v9411_v61 = vld [vmem:[#allocation26_spill] sm:$0xff]  ;;  %v3197_v17 = vpop.f32.mrf.mxu1  ;;  %v9415_v44 = vld [vmem:[#allocation43_spill] sm:$0xff] }
 0x2ee   : > { %v2944_v23 = vpop.f32.mrf.mxu0  ;;  %5432 = vmatmul.mubr.f32.gmra.mxu1 %v9407_v47 }
 0x2ef   : > { %5434 = vmatprep.mubr.f32.mxu1 %v9408_v45  ;;  %v8656_v50 = vpop.f32.mrf.mxu1 }
 0x2f0   : > { %v2947_v22 = vpop.f32.mrf.mxu0  ;;  %3912 = vmatmul.mubr.f32.gmra.mxu0 %v9409_v4  ;;  %v5527_v4 = vld [vmem:[#allocation2 + $0x128] sm:$0xff] }
 0x2f1   : > { %v8647_v38 = vadd.f32 %v5273_v16, %v2947_v22  ;;  %3916 = vmatprep.mubr.f32.mxu0 %v8075_v43  ;;  %v9412_v16 = vld [vmem:[#allocation27_spill] sm:$0xff]  ;;  %v3207_v62 = vpop.f32.mrf.mxu1 }
 0x2f2   : > { %v2949_v57 = vpop.f32.mrf.mxu0  ;;  %5435 = vmatmul.mubr.f32.gmra.mxu1 %v9410_v30 }
 0x2f3   : > { %5437 = vmatprep.mubr.f32.mxu1 %v9411_v61  ;;  %v9418_v61 = vld [vmem:[#allocation3_spill] sm:$0xff] }
 0x2f4   : > { %v2952_v10 = vpop.f32.mrf.mxu0  ;;  %3917 = vmatmul.mubr.f32.gmra.mxu0 %v8501_v49 }
 0x2f5   : > { %v8653_v58 = vadd.f32 %v3177_v29, %v2952_v10  ;;  %3921 = vmatprep.mubr.f32.mxu0 %v8093_v0 }
 0x2f6   : > { %v2954_v5 = vpop.f32.mrf.mxu0  ;;  %5438 = vmatmul.mubr.f32.gmra.mxu1 %v9412_v16  ;;  %v8666_v0 = vpop.f32.mrf.mxu1 }
 0x2f7   : > { %5440 = vmatprep.mubr.f32.mxu1 %v9413_v14  ;;  %v5528_v5 = vld [vmem:[#allocation2 + $0x138] sm:$0xff] }
 0x2f8   : > { %v2957_v43 = vpop.f32.mrf.mxu0  ;;  %3922 = vmatmul.mubr.f32.gmra.mxu0 %v8515_v53 }
 0x2f9   : > { %v8661_v27 = vadd.f32 %v5276_v31, %v2957_v43  ;;  %3926 = vmatprep.mubr.f32.mxu0 %v8121_v36  ;;  %v3217_v36 = vpop.f32.mrf.mxu1 }
 0x2fa   : > { %v2959_v49 = vpop.f32.mrf.mxu0  ;;  %5441 = vmatmul.mubr.f32.gmra.mxu1 %v9389_v2 }
 0x2fb   : > { %5443 = vmatprep.mubr.f32.mxu1 %v9414_v42  ;;  %v5529_v49 = vld [vmem:[#allocation2 + $0x140] sm:$0xff] }
 0x2fc   : > { %v2962_v29 = vpop.f32.mrf.mxu0  ;;  %3927 = vmatmul.mubr.f32.gmra.mxu0 %v5524_v32 }
 0x2fd   : > { %v8668_v24 = vadd.f32 %v3187_v34, %v2962_v29  ;;  %3931 = vmatprep.mubr.f32.mxu0 %v8139_v56  ;;  %v5526_v34 = vld [vmem:[#allocation2 + $0x120] sm:$0xff] }
 0x2fe   : > { %v2964_v53 = vpop.f32.mrf.mxu0  ;;  %5444 = vmatmul.mubr.f32.gmra.mxu1 %v8060_v51  ;;  %v8676_v1 = vpop.f32.mrf.mxu1  ;;  %v8680_v51 = vld [vmem:[#allocation2 + $0x1a8] sm:$0x3] }
 0x2ff   : > { %5446 = vmatprep.mubr.f32.mxu1 %v8100_v54  ;;  %v3719_v47 = vrot.slane %v8680_v51, 2 }
 0x300   : > { %v2967_v31 = vpop.f32.mrf.mxu0  ;;  %3932 = vmatmul.mubr.f32.gmra.mxu0 %v5525_v20 }
 0x301   : > { %v8673_v2 = vadd.f32 %v5279_v63, %v2967_v31  ;;  %3936 = vmatprep.mubr.f32.mxu0 %v9391_v3  ;;  %v3227_v63 = vpop.f32.mrf.mxu1  ;;  %v9417_v3 = vld [vmem:[#allocation44_spill] sm:$0xff]  ;;  %v5530_v31 = vld [vmem:[#allocation2 + $0x150] sm:$0xff] }
 0x302   : > { %v2969_v25 = vpop.f32.mrf.mxu0  ;;  %5447 = vmatmul.mubr.f32.gmra.mxu1 %v9415_v44 }
 0x303   : > { %5449 = vmatprep.mubr.f32.mxu1 %v9416_v48 }
 0x304   : > { %v2972_v56 = vpop.f32.mrf.mxu0  ;;  %3937 = vmatmul.mubr.f32.gmra.mxu0 %v5526_v34 }
 0x305   : > { %v8682_v54 = vadd.f32 %v3197_v17, %v2972_v56  ;;  %3941 = vmatprep.mubr.f32.mxu0 %v8185_v28  ;;  %v9419_v28 = vld [vmem:[#allocation9_spill] sm:$0xff]  ;;  %v5531_v56 = vld [vmem:[#allocation2 + $0x158] sm:$0xff] }
 0x306   : > { %v2974_v23 = vpop.f32.mrf.mxu0  ;;  %5450 = vmatmul.mubr.f32.gmra.mxu1 %v9392_v35  ;;  %v8688_v45 = vpop.f32.mrf.mxu1  ;;  %v3720_v35 = vsel %vm494_vm0, %v9419_v28, %v3719_v47  ;;  %v5532_v47 = vld [vmem:[#allocation2 + $0x168] sm:$0xff] }
 0x307   : > { %5452 = vmatprep.mubr.f32.mxu1 %v9417_v3 }
 0x308   : > { %v2977_v22 = vpop.f32.mrf.mxu0  ;;  %3942 = vmatmul.mubr.f32.gmra.mxu0 %v5527_v4  ;;  %v3237_v17 = vpop.f32.mrf.mxu1 }
 0x309   : > { %v8690_v57 = vadd.f32 %v5282_v40, %v2977_v22  ;;  %3946 = vmatprep.mubr.f32.mxu0 %v8211_v37 }
 0x30a   : > { %v2979_v30 = vpop.f32.mrf.mxu0  ;;  %5453 = vmatmul.mubr.f32.gmra.mxu1 %v9418_v61 }
 0x30b   : > { %5455 = vmatprep.mubr.f32.mxu1 %v9419_v28 }
 0x30c   : > { %v2982_v10 = vpop.f32.mrf.mxu0  ;;  %3947 = vmatmul.mubr.f32.gmra.mxu0 %v5528_v5  ;;  %v9421_v5 = vld [vmem:[#allocation7_spill] sm:$0xff] }
 0x30d   : > { %v8697_v16 = vadd.f32 %v3207_v62, %v2982_v10  ;;  %3951 = vmatprep.mubr.f32.mxu0 %v8225_v8 }
 0x30e   : > { %v2984_v40 = vpop.f32.mrf.mxu0  ;;  %v8700_v14 = vpop.f32.mrf.mxu1  ;;  %5456 = vmatmul.mubr.f32.gmra.mxu1 %v3720_v35 }
 0x310   : > { %v2987_v37 = vpop.f32.mrf.mxu0  ;;  %v8702_v43 = vpop.f32.mrf.mxu1  ;;  %3952 = vmatmul.mubr.f32.gmra.mxu0 %v5529_v49  ;;  %v5534_v49 = vld [vmem:[#allocation2 + $0x180] sm:$0xff] }
 0x311   : > { %v8705_v42 = vadd.f32 %v8656_v50, %v2987_v37  ;;  %3956 = vmatprep.mubr.f32.mxu0 %v8242_v9 }
 0x312   : > { %v2989_v29 = vpop.f32.mrf.mxu0  ;;  %v3322_v32 = vpop.f32.mrf.mxu1 }
 0x313   : > { %v8709_v62 = vadd.f32 %v3322_v32, %v8561_v7  ;;  %v9422_v29 = vld [vmem:[#allocation8_spill] sm:$0xff] }
 0x314   : > { %v2992_v8 = vpop.f32.mrf.mxu0  ;;  %v3324_v53 = vpop.f32.mrf.mxu1  ;;  %3957 = vmatmul.mubr.f32.gmra.mxu0 %v5530_v31 }
 0x315   : > { %v8711_v20 = vadd.f32 %v3217_v36, %v2992_v8  ;;  %3961 = vmatprep.mubr.f32.mxu0 %v8255_v33 }
 0x316   : > { %v2994_v25 = vpop.f32.mrf.mxu0  ;;  %v3327_v44 = vpop.f32.mrf.mxu1 }
 0x317   : > { %v8715_v50 = vadd.f32 %v3327_v44, %v8563_v55  ;;  %v5535_v44 = vld [vmem:[#allocation2 + $0x188] sm:$0xff] }
 0x318   : > { %v2997_v48 = vpop.f32.mrf.mxu0  ;;  %v3329_v9 = vpop.f32.mrf.mxu1  ;;  %3962 = vmatmul.mubr.f32.gmra.mxu0 %v5531_v56 }
 0x319   : > { %v8718_v7 = vadd.f32 %v8666_v0, %v2997_v48  ;;  %3966 = vmatprep.mubr.f32.mxu0 %v8269_v52  ;;  %v5533_v52 = vld [vmem:[#allocation2 + $0x170] sm:$0xff] }
 0x31a   : > { %v2999_v34 = vpop.f32.mrf.mxu0  ;;  %v3332_v23 = vpop.f32.mrf.mxu1 }
 0x31b   : > { %v8722_v36 = vadd.f32 %v3332_v23, %v8569_v59  ;;  %v9420_v59 = vld [vmem:[#allocation4_spill] sm:$0xff] }
 0x31c   : > { %v3002_v33 = vpop.f32.mrf.mxu0  ;;  %v3334_v3 = vpop.f32.mrf.mxu1  ;;  %3967 = vmatmul.mubr.f32.gmra.mxu0 %v5532_v47 }
 0x31d   : > { %v8724_v55 = vadd.f32 %v3227_v63, %v3002_v33  ;;  %3971 = vmatprep.mubr.f32.mxu0 %v9393_v60  ;;  %v3709_v63 = vrot.slane %v9421_v5, 1 }
 0x31e   : > { %v3004_v22 = vpop.f32.mrf.mxu0  ;;  %v3337_v4 = vpop.f32.mrf.mxu1 }
 0x31f   : > { %v3338_v0 = vadd.f32 %v3337_v4, %v8575_v21 }
 0x320   : > { %v3007_v30 = vpop.f32.mrf.mxu0  ;;  %v3339_v61 = vpop.f32.mrf.mxu1  ;;  %3972 = vmatmul.mubr.f32.gmra.mxu0 %v5533_v52 }
 0x321   : > { %v8729_v28 = vadd.f32 %v8676_v1, %v3007_v30  ;;  %3976 = vmatprep.mubr.f32.mxu0 %v9420_v59  ;;  %v3712_v1 = vrot.slane %v8680_v51, 1 }
 0x322   : > { %v3009_v35 = vpop.f32.mrf.mxu0  ;;  %v3342_v10 = vpop.f32.mrf.mxu1 }
 0x323   : > { %v3343_v40 = vadd.f32 %v3342_v10, %v8581_v6 }
 0x324   : > { %v3012_v60 = vpop.f32.mrf.mxu0  ;;  %v3344_v37 = vpop.f32.mrf.mxu1  ;;  %3977 = vmatmul.mubr.f32.gmra.mxu0 %v5534_v49 }
 0x325   : > { %v8734_v21 = vadd.f32 %v3237_v17, %v3012_v60  ;;  %3981 = vmatprep.mubr.f32.mxu0 %v9422_v29  ;;  %v3713_v17 = vsel %vm381_vm1, %v3709_v63, %v3712_v1 }
 0x326   : > { %v3014_v32 = vpop.f32.mrf.mxu0  ;;  %v3347_v8 = vpop.f32.mrf.mxu1 }
 0x327   : > { %v3348_v53 = vadd.f32 %v3347_v8, %v8587_v18 }
 0x328   : > { %v3017_v31 = vpop.f32.mrf.mxu0  ;;  %v3349_v25 = vpop.f32.mrf.mxu1  ;;  %3982 = vmatmul.mubr.f32.gmra.mxu0 %v5535_v44 }
 0x329   : > { %v8740_v6 = vadd.f32 %v8688_v45, %v3017_v31  ;;  %3986 = vmatprep.mubr.f32.mxu0 %v3709_v63 }
 0x32a   : > { %v3019_v48 = vpop.f32.mrf.mxu0  ;;  %v3352_v9 = vpop.f32.mrf.mxu1 }
 0x32b   : > { %v3353_v56 = vadd.f32 %v3352_v9, %v8593_v19 }
 0x32c   : > { %v3022_v34 = vpop.f32.mrf.mxu0  ;;  %v3354_v23 = vpop.f32.mrf.mxu1  ;;  %3987 = vmatmul.mubr.f32.gmra.mxu0 %v9421_v5 }
 0x32d   : > { %v8746_v18 = vadd.f32 %v8702_v43, %v3022_v34  ;;  %3991 = vmatprep.mubr.f32.mxu0 %v3713_v17 }
 0x32e   : > { %v3024_v51 = vpop.f32.mrf.mxu0  ;;  %v3357_v33 = vpop.f32.mrf.mxu1 }
 0x32f   : > { %v3358_v45 = vadd.f32 %v3357_v33, %v8599_v26 }
 0x330   : > { %v3027_v3 = vpop.f32.mrf.mxu0  ;;  %v3359_v47 = vpop.f32.mrf.mxu1  ;;  %3992 = vmatmul.mubr.f32.gmra.mxu0 %v9421_v5 }
 0x331   : > { %v8751_v22 = vadd.f32 %v8700_v14, %v3027_v3 }
 0x332   : > { %v3029_v19 = vpop.f32.mrf.mxu0  ;;  %v3362_v4 = vpop.f32.mrf.mxu1 }
 0x333   : > { %v3363_v30 = vadd.f32 %v3362_v4, %v8605_v41 }
 0x334   : > { %v3364_v61 = vpop.f32.mrf.mxu1  ;;  %v5332_v52 = vpop.f32.mrf.mxu0 }
 0x335   : > { %v8755_v43 = vadd.f32 %v5332_v52, %v8715_v50 }
 0x336   : > { %v3367_v59 = vpop.f32.mrf.mxu1  ;;  %v3547_v35 = vpop.f32.mrf.mxu0 }
 0x337   : > { %v3368_v26 = vadd.f32 %v3367_v59, %v8611_v39  ;;  %v8759_v10 = vadd.f32 %v3547_v35, %v8709_v62 }
 0x338   : > { %v3369_v5 = vpop.f32.mrf.mxu1  ;;  %v5335_v63 = vpop.f32.mrf.mxu0 }
 0x339   : > { %v8761_v14 = vadd.f32 %v5335_v63, %v3338_v0 }
 0x33a   : > { %v3372_v60 = vpop.f32.mrf.mxu1  ;;  %v3557_v37 = vpop.f32.mrf.mxu0 }
 0x33b   : > { %v3373_v41 = vadd.f32 %v3372_v60, %v8617_v12  ;;  %v8765_v49 = vadd.f32 %v3557_v37, %v8722_v36 }
 0x33c   : > { %v3374_v50 = vpop.f32.mrf.mxu1  ;;  %v5338_v29 = vpop.f32.mrf.mxu0 }
 0x33d   : > { %v8767_v32 = vadd.f32 %v5338_v29, %v3348_v53 }
 0x33e   : > { %v3377_v8 = vpop.f32.mrf.mxu1  ;;  %v3567_v39 = vpop.f32.mrf.mxu0 }
 0x33f   : > { %v3378_v62 = vadd.f32 %v3377_v8, %v8623_v46  ;;  %v8770_v1 = vadd.f32 %v3567_v39, %v3343_v40 }
 0x340   : > { %v3379_v31 = vpop.f32.mrf.mxu1  ;;  %v5341_v0 = vpop.f32.mrf.mxu0 }
 0x341   : > { %v8772_v25 = vadd.f32 %v5341_v0, %v3358_v45 }
 0x342   : > { %v3382_v44 = vpop.f32.mrf.mxu1  ;;  %v3577_v48 = vpop.f32.mrf.mxu0 }
 0x343   : > { %v3383_v12 = vadd.f32 %v3382_v44, %v8629_v11  ;;  %v8775_v36 = vadd.f32 %v3577_v48, %v3353_v56 }
 0x344   : > { %v3384_v9 = vpop.f32.mrf.mxu1  ;;  %v5344_v17 = vpop.f32.mrf.mxu0 }
 0x345   : > { %v8777_v53 = vadd.f32 %v5344_v17, %v3368_v26 }
 0x346   : > { %v3387_v34 = vpop.f32.mrf.mxu1  ;;  %v3587_v23 = vpop.f32.mrf.mxu0 }
 0x347   : > { %v3388_v46 = vadd.f32 %v3387_v34, %v8635_v15  ;;  %v8780_v40 = vadd.f32 %v3587_v23, %v3363_v30 }
 0x348   : > { %v3389_v51 = vpop.f32.mrf.mxu1  ;;  %v5347_v33 = vpop.f32.mrf.mxu0 }
 0x349   : > { %v8782_v45 = vadd.f32 %v5347_v33, %v3378_v62 }
 0x34a   : > { %v3392_v3 = vpop.f32.mrf.mxu1  ;;  %v3597_v47 = vpop.f32.mrf.mxu0 }
 0x34b   : > { %v3393_v11 = vadd.f32 %v3392_v3, %v8641_v13  ;;  %v8785_v56 = vadd.f32 %v3597_v47, %v3373_v41 }
 0x34c   : > { %v3394_v19 = vpop.f32.mrf.mxu1  ;;  %v5350_v4 = vpop.f32.mrf.mxu0 }
 0x34d   : > { %v8787_v61 = vadd.f32 %v5350_v4, %v3388_v46 }
 0x34e   : > { %v3397_v52 = vpop.f32.mrf.mxu1  ;;  %v3607_v59 = vpop.f32.mrf.mxu0 }
 0x34f   : > { %v3398_v15 = vadd.f32 %v3397_v52, %v8647_v38  ;;  %v8790_v30 = vadd.f32 %v3607_v59, %v3383_v12 }
 0x350   : > { %v3399_v35 = vpop.f32.mrf.mxu1  ;;  %v5353_v26 = vpop.f32.mrf.mxu0 }
 0x351   : > { %v8792_v5 = vadd.f32 %v5353_v26, %v3398_v15 }
 0x352   : > { %v3402_v63 = vpop.f32.mrf.mxu1  ;;  %v3617_v60 = vpop.f32.mrf.mxu0 }
 0x353   : > { %v3403_v13 = vadd.f32 %v3402_v63, %v8653_v58  ;;  %v8795_v37 = vadd.f32 %v3617_v60, %v3393_v11 }
 0x354   : > { %v3404_v41 = vpop.f32.mrf.mxu1  ;;  %v5356_v50 = vpop.f32.mrf.mxu0 }
 0x356   : > { %v3407_v29 = vpop.f32.mrf.mxu1  ;;  %v3627_v8 = vpop.f32.mrf.mxu0 }
 0x357   : > { %v3408_v39 = vadd.f32 %v3407_v29, %v8661_v27  ;;  %v8798_v62 = vadd.f32 %v3627_v8, %v3403_v13 }
 0x358   : > { %v3409_v38 = vpop.f32.mrf.mxu1  ;;  %v5359_v31 = vpop.f32.mrf.mxu0 }
 0x359   : > { %v8800_v0 = vadd.f32 %v5356_v50, %v3408_v39 }
 0x35a   : > { %v3412_v44 = vpop.f32.mrf.mxu1  ;;  %v3637_v48 = vpop.f32.mrf.mxu0 }
 0x35b   : > { %v3413_v12 = vadd.f32 %v3412_v44, %v8668_v24 }
 0x35c   : > { %v3414_v9 = vpop.f32.mrf.mxu1  ;;  %v5362_v58 = vpop.f32.mrf.mxu0 }
 0x35d   : > { %v8803_v17 = vadd.f32 %v3637_v48, %v3413_v12 }
 0x35e   : > { %v3417_v34 = vpop.f32.mrf.mxu1  ;;  %v3647_v23 = vpop.f32.mrf.mxu0 }
 0x35f   : > { %v3418_v46 = vadd.f32 %v3417_v34, %v8673_v2 }
 0x360   : > { %v3419_v51 = vpop.f32.mrf.mxu1  ;;  %v5365_v27 = vpop.f32.mrf.mxu0 }
 0x361   : > { %v8806_v33 = vadd.f32 %v5359_v31, %v3418_v46 }
 0x362   : > { %v3422_v3 = vpop.f32.mrf.mxu1  ;;  %v3657_v47 = vpop.f32.mrf.mxu0 }
 0x363   : > { %v3423_v11 = vadd.f32 %v3422_v3, %v8682_v54 }
 0x364   : > { %v3424_v19 = vpop.f32.mrf.mxu1  ;;  %v5368_v4 = vpop.f32.mrf.mxu0 }
 0x365   : > { %v8809_v52 = vadd.f32 %v3647_v23, %v3423_v11 }
 0x366   : > { %v3427_v24 = vpop.f32.mrf.mxu1  ;;  %v3667_v59 = vpop.f32.mrf.mxu0 }
 0x367   : > { %v3428_v15 = vadd.f32 %v3427_v24, %v8690_v57 }
 0x368   : > { %v3429_v35 = vpop.f32.mrf.mxu1  ;;  %v5371_v26 = vpop.f32.mrf.mxu0 }
 0x369   : > { %v8812_v63 = vadd.f32 %v5362_v58, %v3428_v15 }
 0x36a   : > { %v3432_v2 = vpop.f32.mrf.mxu1  ;;  %v3677_v60 = vpop.f32.mrf.mxu0 }
 0x36b   : > { %v3433_v13 = vadd.f32 %v3432_v2, %v8697_v16 }
 0x36c   : > { %v3434_v41 = vpop.f32.mrf.mxu1  ;;  %v5374_v50 = vpop.f32.mrf.mxu0 }
 0x36d   : > { %v8815_v29 = vadd.f32 %v3657_v47, %v3433_v13 }
 0x36e   : > { %v3437_v54 = vpop.f32.mrf.mxu1  ;;  %v3687_v8 = vpop.f32.mrf.mxu0 }
 0x36f   : > { %v3438_v39 = vadd.f32 %v3437_v54, %v8705_v42 }
 0x370   : > { %v3439_v38 = vpop.f32.mrf.mxu1  ;;  %v5377_v31 = vpop.f32.mrf.mxu0 }
 0x371   : > { %v8818_v44 = vadd.f32 %v5365_v27, %v3438_v39 }
 0x372   : > { %v3442_v57 = vpop.f32.mrf.mxu1  ;;  %v3697_v48 = vpop.f32.mrf.mxu0 }
 0x373   : > { %v3443_v12 = vadd.f32 %v3442_v57, %v8711_v20 }
 0x374   : > { %v3444_v9 = vpop.f32.mrf.mxu1  ;;  %v3838_v58 = vpop.f32.mrf.mxu0 }
 0x375   : > { %v8821_v34 = vadd.f32 %v3667_v59, %v3443_v12 }
 0x376   : > { %v3447_v16 = vpop.f32.mrf.mxu1  ;;  %v3840_v23 = vpop.f32.mrf.mxu0 }
 0x377   : > { %v3448_v46 = vadd.f32 %v3447_v16, %v8718_v7 }
 0x378   : > { %v3449_v51 = vpop.f32.mrf.mxu1  ;;  %v3843_v3 = vpop.f32.mrf.mxu0 }
 0x379   : > { %v8824_v47 = vadd.f32 %v5368_v4, %v3448_v46 }
 0x37a   : > { %v3452_v42 = vpop.f32.mrf.mxu1  ;;  %v3845_v11 = vpop.f32.mrf.mxu0 }
 0x37b   : > { %v3453_v27 = vadd.f32 %v3452_v42, %v8724_v55 }
 0x37c   : > { %v3454_v19 = vpop.f32.mrf.mxu1  ;;  %v3848_v24 = vpop.f32.mrf.mxu0 }
 0x37d   : > { %v8827_v15 = vadd.f32 %v3677_v60, %v3453_v27 }
 0x37e   : > { %v3457_v20 = vpop.f32.mrf.mxu1  ;;  %v3850_v35 = vpop.f32.mrf.mxu0 }
 0x37f   : > { %v3458_v59 = vadd.f32 %v3457_v20, %v8729_v28 }
 0x380   : > { %v3459_v2 = vpop.f32.mrf.mxu1  ;;  %v3853_v13 = vpop.f32.mrf.mxu0 }
 0x381   : > { %v8830_v41 = vadd.f32 %v5371_v26, %v3458_v59 }
 0x382   : > { %v3462_v7 = vpop.f32.mrf.mxu1  ;;  %v3855_v54 = vpop.f32.mrf.mxu0 }
 0x383   : > { %v3463_v4 = vadd.f32 %v3462_v7, %v8734_v21 }
 0x384   : > { %v3464_v39 = vpop.f32.mrf.mxu1  ;;  %v3858_v38 = vpop.f32.mrf.mxu0 }
 0x385   : > { %v8833_v57 = vadd.f32 %v3687_v8, %v3463_v4 }
 0x386   : > { %v3467_v55 = vpop.f32.mrf.mxu1  ;;  %v3860_v12 = vpop.f32.mrf.mxu0 }
 0x387   : > { %v3468_v60 = vadd.f32 %v3467_v55, %v8740_v6 }
 0x388   : > { %v3469_v9 = vpop.f32.mrf.mxu1  ;;  %v3863_v16 = vpop.f32.mrf.mxu0 }
 0x389   : > { %v8836_v23 = vadd.f32 %v5374_v50, %v3468_v60 }
 0x38a   : > { %v3472_v28 = vpop.f32.mrf.mxu1  ;;  %v3865_v46 = vpop.f32.mrf.mxu0 }
 0x38b   : > { %v3473_v26 = vadd.f32 %v3472_v28, %v8746_v18  ;;  %v8847_v18 = vld [vmem:[%s9031_s5] ss:$0 sm:$0xff] }
 0x38c   : > { %v3474_v51 = vpop.f32.mrf.mxu1  ;;  %v3868_v42 = vpop.f32.mrf.mxu0 }
 0x38d   : > { %v8839_v11 = vadd.f32 %v3697_v48, %v3473_v26  ;;  %v9423_v51 = vld [vmem:[#allocation22_spill] sm:$0xff] }
 0x38e   : > { %v3477_v21 = vpop.f32.mrf.mxu1  ;;  %v3870_v27 = vpop.f32.mrf.mxu0 }
 0x38f   : > { %v3478_v8 = vadd.f32 %v3477_v21, %v8751_v22  ;;  %v8855_v22 = vld [vmem:[%s9032_s6] ss:$0 sm:$0xff] }
 0x390   : > { %v3479_v19 = vpop.f32.mrf.mxu1  ;;  %v3873_v20 = vpop.f32.mrf.mxu0 }
 0x391   : > { %v8842_v35 = vadd.f32 %v5377_v31, %v3478_v8 }
 0x392   : > { %v3875_v6 = vpop.f32.mrf.mxu0  ;;  %v5412_v50 = vpop.f32.mrf.mxu1 }
 0x393   : > { %v4069_v59 = vadd.f32 %v5412_v50, %v3843_v3  ;;  %v9424_v6 = vld [vmem:[#allocation19_spill] sm:$0xff] }
 0x394   : > { %v8849_v2 = vpop.f32.mrf.mxu0  ;;  %v4063_v48 = vpop.f32.mrf.mxu1 }
 0x395   : > { %v4223_v7 = vadd.f32 %v4069_v59, %v8755_v43  ;;  %v4064_v54 = vadd.f32 %v4063_v48, %v3838_v58 }
 0x396   : > { %v3880_v31 = vpop.f32.mrf.mxu0  ;;  %v5415_v4 = vpop.f32.mrf.mxu1 }
 0x397   : > { %v4262_v3 = vmul.f32 %v8847_v18, %v4223_v7  ;;  %v4222_v39 = vadd.f32 %v4064_v54, %v8759_v10  ;;  %v4079_v55 = vadd.f32 %v5415_v4, %v3853_v13 }
 0x398   : > { %v3883_v12 = vpop.f32.mrf.mxu0  ;;  %v4073_v60 = vpop.f32.mrf.mxu1 }
 0x399   : > { %v4301_v9 = vadd.f32 %v8855_v22, %v4262_v3  ;;  %v4261_v43 = vmul.f32 %v8847_v18, %v4222_v39  ;;  %v4225_v58 = vadd.f32 %v4079_v55, %v8761_v14  ;;  %v4074_v28 = vadd.f32 %v4073_v60, %v3848_v24  ;;  %v9425_v3 = vld [vmem:[#allocation28_spill] sm:$0xff] }
 0x39a   : > { %v3885_v46 = vpop.f32.mrf.mxu0  ;;  %v5418_v26 = vpop.f32.mrf.mxu1 }
 0x39b   : > { %v4333_v21 = vadd.f32 %v4301_v9, %v9423_v51  ;;  %v4300_v27 = vadd.f32 %v8855_v22, %v4261_v43  ;;  %v4264_v8 = vmul.f32 %v8847_v18, %v4225_v58  ;;  %v4224_v10 = vadd.f32 %v4074_v28, %v8765_v49 }
 0x39c   : > { %v4089_v13 = vadd.f32 %v5418_v26, %v3863_v16  ;;  %v3888_v19 = vpop.f32.mrf.mxu0  ;;  %v4083_v14 = vpop.f32.mrf.mxu1 }
 0x39d   : > { %v4365_v24 = vmax.f32 %v4333_v21, 0.0  ;;  %v4332_v50 = vadd.f32 %v4300_v27, %v9424_v6  ;;  %v4303_v59 = vadd.f32 %v8855_v22, %v4264_v8  ;;  %v4263_v48 = vmul.f32 %v8847_v18, %v4224_v10 }
 0x39e   : > { %v4227_v7 = vadd.f32 %v4089_v13, %v8767_v32  ;;  %v4084_v49 = vadd.f32 %v4083_v14, %v3858_v38  ;;  %v3890_v54 = vpop.f32.mrf.mxu0  ;;  %v5421_v31 = vpop.f32.mrf.mxu1  ;;  %v9426_v32 = vld [vmem:[#allocation25_spill] sm:$0xff]  ;;  %v9427_v14 = vld [vmem:[#allocation36_spill] sm:$0xff] }
 0x39f   : > { %4397 = vst [vmem:[%s8870_s25 + $0x8] sm:$0xff] %v4365_v24  ;;  %v4364_v4 = vmax.f32 %v4332_v50, 0.0  ;;  %v4335_v39 = vadd.f32 %v4303_v59, %v9425_v3  ;;  %v4302_v16 = vadd.f32 %v8855_v22, %v4263_v48  ;;  %v4099_v55 = vadd.f32 %v5421_v31, %v3873_v20  ;;  %v9428_v54 = vld [vmem:[#allocation31_spill] sm:$0xff] }
 0x3a0   : > { %v4266_v60 = vmul.f32 %v8847_v18, %v4227_v7  ;;  %v4226_v9 = vadd.f32 %v4084_v49, %v8770_v1  ;;  %v3893_v43 = vpop.f32.mrf.mxu0  ;;  %v4093_v58 = vpop.f32.mrf.mxu1 }
 0x3a1   : > { %4396 = vst [vmem:[%s8870_s25] sm:$0xff] %v4364_v4  ;;  %v4367_v28 = vmax.f32 %v4335_v39, 0.0  ;;  %v4334_v38 = vadd.f32 %v4302_v16, %v9426_v32  ;;  %v4229_v46 = vadd.f32 %v4099_v55, %v8772_v25  ;;  %v4094_v26 = vadd.f32 %v4093_v58, %v3868_v42  ;;  %v9429_v4 = vld [vmem:[#allocation45_spill] sm:$0xff] }
 0x3a2   : > { %v4305_v51 = vadd.f32 %v8855_v22, %v4266_v60  ;;  %v4265_v21 = vmul.f32 %v8847_v18, %v4226_v9  ;;  %v3895_v27 = vpop.f32.mrf.mxu0  ;;  %v5424_v20 = vpop.f32.mrf.mxu1 }
 0x3a3   : > { %4399 = vst [vmem:[%s8870_s25 + $0x18] sm:$0xff] %v4367_v28  ;;  %v4366_v8 = vmax.f32 %v4334_v38, 0.0  ;;  %v4268_v1 = vmul.f32 %v8847_v18, %v4229_v46  ;;  %v4228_v10 = vadd.f32 %v4094_v26, %v8775_v36  ;;  %v4109_v13 = vadd.f32 %v5424_v20, %v3883_v12  ;;  %v9430_v28 = vld [vmem:[#allocation40_spill] sm:$0xff]  ;;  %v9431_v20 = vld [vmem:[#allocation49_spill] sm:$0xff] }
 0x3a4   : > { %v4337_v24 = vadd.f32 %v4305_v51, %v9427_v14  ;;  %v4304_v6 = vadd.f32 %v8855_v22, %v4265_v21  ;;  %v3898_v25 = vpop.f32.mrf.mxu0  ;;  %v4103_v42 = vpop.f32.mrf.mxu1 }
 0x3a5   : > { %4398 = vst [vmem:[%s8870_s25 + $0x10] sm:$0xff] %v4366_v8  ;;  %v4307_v50 = vadd.f32 %v8855_v22, %v4268_v1  ;;  %v4267_v59 = vmul.f32 %v8847_v18, %v4228_v10  ;;  %v4231_v48 = vadd.f32 %v4109_v13, %v8777_v53  ;;  %v4104_v7 = vadd.f32 %v4103_v42, %v8849_v2 }
 0x3a6   : > { %v4369_v49 = vmax.f32 %v4337_v24, 0.0  ;;  %v4336_v36 = vadd.f32 %v4304_v6, %v9428_v54  ;;  %v3900_v12 = vpop.f32.mrf.mxu0  ;;  %v5427_v31 = vpop.f32.mrf.mxu1 }
 0x3a7   : > { %v4339_v3 = vadd.f32 %v4307_v50, %v9429_v4  ;;  %v4306_v39 = vadd.f32 %v8855_v22, %v4267_v59  ;;  %v4270_v16 = vmul.f32 %v8847_v18, %v4231_v48  ;;  %v4230_v55 = vadd.f32 %v4104_v7, %v8780_v40  ;;  %v9433_v12 = vld [vmem:[#allocation51_spill] sm:$0xff] }
 0x3a8   : > { %4401 = vst [vmem:[%s8870_s25 + $0x28] sm:$0xff] %v4369_v49  ;;  %v4368_v60 = vmax.f32 %v4336_v36, 0.0  ;;  %v4119_v53 = vadd.f32 %v5427_v31, %v3893_v43  ;;  %v3903_v9 = vpop.f32.mrf.mxu0  ;;  %v4113_v2 = vpop.f32.mrf.mxu1 }
 0x3a9   : > { %v4371_v58 = vmax.f32 %v4339_v3, 0.0  ;;  %v4338_v32 = vadd.f32 %v4306_v39, %v9430_v28  ;;  %v4309_v38 = vadd.f32 %v8855_v22, %v4270_v16  ;;  %v4269_v46 = vmul.f32 %v8847_v18, %v4230_v55 }
 0x3aa   : > { %4400 = vst [vmem:[%s8870_s25 + $0x20] sm:$0xff] %v4368_v60  ;;  %v4233_v26 = vadd.f32 %v4119_v53, %v8782_v45  ;;  %v4114_v51 = vadd.f32 %v4113_v2, %v3888_v19  ;;  %v3905_v21 = vpop.f32.mrf.mxu0  ;;  %v5430_v27 = vpop.f32.mrf.mxu1  ;;  %v9432_v45 = vld [vmem:[#allocation48_spill] sm:$0xff]  ;;  %v9434_v53 = vld [vmem:[#allocation50_spill] sm:$0xff] }
 0x3ab   : > { %4403 = vst [vmem:[%s8870_s25 + $0x38] sm:$0xff] %v4371_v58  ;;  %v4370_v40 = vmax.f32 %v4338_v32, 0.0  ;;  %v4341_v43 = vadd.f32 %v4309_v38, %v9431_v20  ;;  %v4308_v8 = vadd.f32 %v8855_v22, %v4269_v46  ;;  %v4129_v1 = vadd.f32 %v5430_v27, %v3903_v9  ;;  %v9435_v58 = vld [vmem:[#allocation53_spill] sm:$0xff] }
 0x3ac   : > { %v4272_v10 = vmul.f32 %v8847_v18, %v4233_v26  ;;  %v4232_v13 = vadd.f32 %v4114_v51, %v8785_v56  ;;  %v3908_v14 = vpop.f32.mrf.mxu0  ;;  %v4123_v24 = vpop.f32.mrf.mxu1 }
 0x3ad   : > { %4402 = vst [vmem:[%s8870_s25 + $0x30] sm:$0xff] %v4370_v40  ;;  %v4373_v6 = vmax.f32 %v4341_v43, 0.0  ;;  %v4340_v19 = vadd.f32 %v4308_v8, %v9432_v45  ;;  %v4235_v42 = vadd.f32 %v4129_v1, %v8787_v61  ;;  %v4124_v50 = vadd.f32 %v4123_v24, %v3898_v25  ;;  %v9436_v40 = vld [vmem:[#allocation52_spill] sm:$0xff]  ;;  %v9437_v45 = vld [vmem:[#allocation55_spill] sm:$0xff] }
 0x3ae   : > { %v4311_v59 = vadd.f32 %v8855_v22, %v4272_v10  ;;  %v4271_v48 = vmul.f32 %v8847_v18, %v4232_v13  ;;  %v3910_v7 = vpop.f32.mrf.mxu0  ;;  %v5433_v49 = vpop.f32.mrf.mxu1 }
 0x3af   : > { %4405 = vst [vmem:[%s8870_s25 + $0x48] sm:$0xff] %v4373_v6  ;;  %v4372_v54 = vmax.f32 %v4340_v19, 0.0  ;;  %v4274_v56 = vmul.f32 %v8847_v18, %v4235_v42  ;;  %v4234_v36 = vadd.f32 %v4124_v50, %v8790_v30  ;;  %v9438_v42 = vld [vmem:[#allocation54_spill] sm:$0xff] }
 0x3b0   : > { %v4343_v31 = vadd.f32 %v4311_v59, %v9433_v12  ;;  %v4310_v4 = vadd.f32 %v8855_v22, %v4271_v48  ;;  %v3913_v3 = vpop.f32.mrf.mxu0  ;;  %v4133_v61 = vpop.f32.mrf.mxu1 }
 0x3b1   : > { %4404 = vst [vmem:[%s8870_s25 + $0x40] sm:$0xff] %v4372_v54  ;;  %v4313_v25 = vadd.f32 %v8855_v22, %v4274_v56  ;;  %v4273_v39 = vmul.f32 %v8847_v18, %v4234_v36  ;;  %v4139_v16 = vadd.f32 %v5433_v49, %v3913_v3  ;;  %v4134_v55 = vadd.f32 %v4133_v61, %v3908_v14  ;;  %v9439_v3 = vld [vmem:[#allocation56_spill] sm:$0xff] }
 0x3b2   : > { %v4375_v60 = vmax.f32 %v4343_v31, 0.0  ;;  %v4342_v9 = vadd.f32 %v4310_v4, %v9434_v53  ;;  %v3915_v2 = vpop.f32.mrf.mxu0  ;;  %v5436_v30 = vpop.f32.mrf.mxu1  ;;  %v9440_v53 = vld [vmem:[#allocation57_spill] sm:$0xff] }
 0x3b3   : > { %v4345_v28 = vadd.f32 %v4313_v25, %v9435_v58  ;;  %v4312_v32 = vadd.f32 %v8855_v22, %v4273_v39  ;;  %v4237_v38 = vadd.f32 %v4139_v16, %v8792_v5  ;;  %v4236_v46 = vadd.f32 %v4134_v55, %v8795_v37 }
 0x3b4   : > { %4407 = vst [vmem:[%s8870_s25 + $0x58] sm:$0xff] %v4375_v60  ;;  %v4374_v26 = vmax.f32 %v4342_v9, 0.0  ;;  %v3918_v51 = vpop.f32.mrf.mxu0  ;;  %v4143_v21 = vpop.f32.mrf.mxu1 }
 0x3b5   : > { %v4377_v27 = vmax.f32 %v4345_v28, 0.0  ;;  %v4344_v20 = vadd.f32 %v4312_v32, %v9436_v40  ;;  %v4276_v43 = vmul.f32 %v8847_v18, %v4237_v38  ;;  %v4275_v8 = vmul.f32 %v8847_v18, %v4236_v46 }
 0x3b6   : > { %4406 = vst [vmem:[%s8870_s25 + $0x50] sm:$0xff] %v4374_v26  ;;  %v4144_v1 = vadd.f32 %v4143_v21, %v3918_v51  ;;  %v3920_v10 = vpop.f32.mrf.mxu0  ;;  %v5439_v24 = vpop.f32.mrf.mxu1 }
 0x3b7   : > { %4409 = vst [vmem:[%s8870_s25 + $0x68] sm:$0xff] %v4377_v27  ;;  %v4376_v13 = vmax.f32 %v4344_v20, 0.0  ;;  %v4315_v5 = vadd.f32 %v8855_v22, %v4276_v43  ;;  %v4314_v37 = vadd.f32 %v8855_v22, %v4275_v8 }
 0x3b8   : > { %v4238_v14 = vadd.f32 %v4144_v1, %v8798_v62  ;;  %v3923_v6 = vpop.f32.mrf.mxu0  ;;  %v4153_v12 = vpop.f32.mrf.mxu1 }
 0x3b9   : > { %4408 = vst [vmem:[%s8870_s25 + $0x60] sm:$0xff] %v4376_v13  ;;  %v4347_v19 = vadd.f32 %v4315_v5, %v9437_v45  ;;  %v4346_v50 = vadd.f32 %v4314_v37, %v9438_v42  ;;  %v4149_v59 = vadd.f32 %v5436_v30, %v3923_v6  ;;  %v9442_v13 = vld [vmem:[#allocation59_spill] sm:$0xff] }
 0x3ba   : > { %v4277_v48 = vmul.f32 %v8847_v18, %v4238_v14  ;;  %v3925_v7 = vpop.f32.mrf.mxu0 }
 0x3bb   : > { %v4379_v49 = vmax.f32 %v4347_v19, 0.0  ;;  %v4378_v54 = vmax.f32 %v4346_v50, 0.0  ;;  %v4239_v56 = vadd.f32 %v4149_v59, %v8800_v0  ;;  %v5442_v0 = vpop.f32.mrf.mxu1  ;;  %v9443_v50 = vld [vmem:[#allocation60_spill] sm:$0xff] }
 0x3bc   : > { %v4316_v36 = vadd.f32 %v8855_v22, %v4277_v48  ;;  %v3928_v62 = vpop.f32.mrf.mxu0 }
 0x3bd   : > { %4411 = vst [vmem:[%s8870_s25 + $0x78] sm:$0xff] %v4379_v49  ;;  %4410 = vst [vmem:[%s8870_s25 + $0x70] sm:$0xff] %v4378_v54  ;;  %v4278_v31 = vmul.f32 %v8847_v18, %v4239_v56  ;;  %v4154_v4 = vadd.f32 %v4153_v12, %v3928_v62  ;;  %v4163_v46 = vpop.f32.mrf.mxu1  ;;  %v9444_v62 = vld [vmem:[#allocation61_spill] sm:$0xff] }
 0x3be   : > { %v4348_v61 = vadd.f32 %v4316_v36, %v9439_v3  ;;  %v3930_v25 = vpop.f32.mrf.mxu0 }
 0x3bf   : > { %v4317_v39 = vadd.f32 %v8855_v22, %v4278_v31  ;;  %v4240_v16 = vadd.f32 %v4154_v4, %v8803_v17  ;;  %v9441_v17 = vld [vmem:[#allocation58_spill] sm:$0xff]  ;;  %v5445_v1 = vpop.f32.mrf.mxu1 }
 0x3c0   : > { %v4380_v55 = vmax.f32 %v4348_v61, 0.0  ;;  %v3933_v60 = vpop.f32.mrf.mxu0 }
 0x3c1   : > { %v4349_v9 = vadd.f32 %v4317_v39, %v9440_v53  ;;  %v4279_v2 = vmul.f32 %v8847_v18, %v4240_v16  ;;  %v4159_v30 = vadd.f32 %v5439_v24, %v3933_v60  ;;  %v4173_v19 = vpop.f32.mrf.mxu1 }
 0x3c2   : > { %4412 = vst [vmem:[%s8870_s25 + $0x80] sm:$0xff] %v4380_v55  ;;  %v3935_v58 = vpop.f32.mrf.mxu0 }
 0x3c3   : > { %v4381_v28 = vmax.f32 %v4349_v9, 0.0  ;;  %v4318_v32 = vadd.f32 %v8855_v22, %v4279_v2  ;;  %v4241_v38 = vadd.f32 %v4159_v30, %v8806_v33  ;;  %v5448_v36 = vpop.f32.mrf.mxu1 }
 0x3c4   : > { %v3938_v26 = vpop.f32.mrf.mxu0 }
 0x3c5   : > { %4413 = vst [vmem:[%s8870_s25 + $0x88] sm:$0xff] %v4381_v28  ;;  %v4350_v51 = vadd.f32 %v4318_v32, %v9441_v17  ;;  %v4280_v21 = vmul.f32 %v8847_v18, %v4241_v38  ;;  %v4164_v27 = vadd.f32 %v4163_v46, %v3938_v26  ;;  %v4183_v16 = vpop.f32.mrf.mxu1  ;;  %v9446_v38 = vld [vmem:[#allocation63_spill] sm:$0xff] }
 0x3c6   : > { %v3940_v40 = vpop.f32.mrf.mxu0 }
 0x3c7   : > { %v4382_v20 = vmax.f32 %v4350_v51, 0.0  ;;  %v4319_v43 = vadd.f32 %v8855_v22, %v4280_v21  ;;  %v4242_v8 = vadd.f32 %v4164_v27, %v8809_v52  ;;  %v5451_v28 = vpop.f32.mrf.mxu1 }
 0x3c8   : > { %v3943_v10 = vpop.f32.mrf.mxu0 }
 0x3c9   : > { %4414 = vst [vmem:[%s8870_s25 + $0x90] sm:$0xff] %v4382_v20  ;;  %v4351_v33 = vadd.f32 %v4319_v43, %v9442_v13  ;;  %v4281_v5 = vmul.f32 %v8847_v18, %v4242_v8  ;;  %v4169_v37 = vadd.f32 %v5442_v0, %v3943_v10  ;;  %v9445_v0 = vld [vmem:[#allocation62_spill] sm:$0xff]  ;;  %v4193_v40 = vpop.f32.mrf.mxu1  ;;  %v9447_v43 = vld [vmem:[#allocation64_spill] sm:$0xff] }
 0x3ca   : > { %v3945_v14 = vpop.f32.mrf.mxu0 }
 0x3cb   : > { %v4383_v24 = vmax.f32 %v4351_v33, 0.0  ;;  %v4320_v6 = vadd.f32 %v8855_v22, %v4281_v5  ;;  %v4243_v45 = vadd.f32 %v4169_v37, %v8812_v63  ;;  %v5454_v37 = vpop.f32.mrf.mxu1 }
 0x3cc   : > { %v3948_v42 = vpop.f32.mrf.mxu0 }
 0x3cd   : > { %4415 = vst [vmem:[%s8870_s25 + $0x98] sm:$0xff] %v4383_v24  ;;  %v4352_v52 = vadd.f32 %v4320_v6, %v9443_v50  ;;  %v4282_v59 = vmul.f32 %v8847_v18, %v4243_v45  ;;  %v4174_v48 = vadd.f32 %v4173_v19, %v3948_v42  ;;  %v9448_v24 = vld [vmem:[#allocation65_spill] sm:$0xff] }
 0x3ce   : > { %v3950_v7 = vpop.f32.mrf.mxu0 }
 0x3cf   : > { %v4384_v49 = vmax.f32 %v4352_v52, 0.0  ;;  %v4321_v54 = vadd.f32 %v8855_v22, %v4282_v59  ;;  %v4244_v56 = vadd.f32 %v4174_v48, %v8815_v29  ;;  %v4203_v59 = vpop.f32.mrf.mxu1  ;;  %v9449_v7 = vld [vmem:[#allocation66_spill] sm:$0xff] }
 0x3d0   : > { %v3953_v12 = vpop.f32.mrf.mxu0 }
 0x3d1   : > { %4416 = vst [vmem:[%s8870_s25 + $0xa0] sm:$0xff] %v4384_v49  ;;  %v4353_v63 = vadd.f32 %v4321_v54, %v9444_v62  ;;  %v4283_v31 = vmul.f32 %v8847_v18, %v4244_v56  ;;  %v4179_v4 = vadd.f32 %v5445_v1, %v3953_v12 }
 0x3d2   : > { %v3955_v3 = vpop.f32.mrf.mxu0 }
 0x3d3   : > { %v4385_v61 = vmax.f32 %v4353_v63, 0.0  ;;  %v4322_v25 = vadd.f32 %v8855_v22, %v4283_v31  ;;  %v4245_v39 = vadd.f32 %v4179_v4, %v8818_v44  ;;  %v9450_v4 = vld [vmem:[#allocation67_spill] sm:$0xff] }
 0x3d4   : > { %v3958_v55 = vpop.f32.mrf.mxu0 }
 0x3d5   : > { %4417 = vst [vmem:[%s8870_s25 + $0xa8] sm:$0xff] %v4385_v61  ;;  %v4354_v29 = vadd.f32 %v4322_v25, %v9445_v0  ;;  %v4284_v60 = vmul.f32 %v8847_v18, %v4245_v39  ;;  %v4184_v53 = vadd.f32 %v4183_v16, %v3958_v55 }
 0x3d6   : > { %v3960_v9 = vpop.f32.mrf.mxu0 }
 0x3d7   : > { %v4386_v2 = vmax.f32 %v4354_v29, 0.0  ;;  %v4323_v30 = vadd.f32 %v8855_v22, %v4284_v60  ;;  %v4246_v58 = vadd.f32 %v4184_v53, %v8821_v34  ;;  %v9451_v60 = vld [vmem:[#allocation33_spill] sm:$0xff] }
 0x3d8   : > { %v3963_v32 = vpop.f32.mrf.mxu0 }
 0x3d9   : > { %4418 = vst [vmem:[%s8870_s25 + $0xb0] sm:$0xff] %v4386_v2  ;;  %v4355_v44 = vadd.f32 %v4323_v30, %v9446_v38  ;;  %v4285_v46 = vmul.f32 %v8847_v18, %v4246_v58  ;;  %v4189_v26 = vadd.f32 %v5448_v36, %v3963_v32  ;;  %v5457_v36 = vpop.f32.mrf.mxu1  ;;  %v9452_v38 = vld [vmem:[#allocation34_spill] sm:$0xff] }
 0x3da   : > { %v3965_v17 = vpop.f32.mrf.mxu0 }
 0x3db   : > { %v4387_v51 = vmax.f32 %v4355_v44, 0.0  ;;  %v4324_v21 = vadd.f32 %v8855_v22, %v4285_v46  ;;  %v4247_v27 = vadd.f32 %v4189_v26, %v8824_v47  ;;  %v4213_v39 = vpop.f32.mrf.mxu1 }
 0x3dc   : > { %v3968_v20 = vpop.f32.mrf.mxu0 }
 0x3dd   : > { %4419 = vst [vmem:[%s8870_s25 + $0xb8] sm:$0xff] %v4387_v51  ;;  %v4356_v34 = vadd.f32 %v4324_v21, %v9447_v43  ;;  %v4286_v8 = vmul.f32 %v8847_v18, %v4247_v27  ;;  %v4194_v1 = vadd.f32 %v4193_v40, %v3968_v20  ;;  %v9453_v27 = vld [vmem:[#allocation37_spill] sm:$0xff] }
 0x3de   : > { %v3970_v10 = vpop.f32.mrf.mxu0 }
 0x3df   : > { %v4388_v13 = vmax.f32 %v4356_v34, 0.0  ;;  %v4325_v33 = vadd.f32 %v8855_v22, %v4286_v8  ;;  %v4248_v5 = vadd.f32 %v4194_v1, %v8827_v15  ;;  %v9454_v34 = vld [vmem:[#allocation41_spill] sm:$0xff] }
 0x3e0   : > { %v3973_v14 = vpop.f32.mrf.mxu0 }
 0x3e1   : > { %4420 = vst [vmem:[%s8870_s25 + $0xc0] sm:$0xff] %v4388_v13  ;;  %v4357_v47 = vadd.f32 %v4325_v33, %v9448_v24  ;;  %v4287_v6 = vmul.f32 %v8847_v18, %v4248_v5  ;;  %v4199_v45 = vadd.f32 %v5451_v28, %v3973_v14 }
 0x3e2   : > { %v3975_v19 = vpop.f32.mrf.mxu0 }
 0x3e3   : > { %v4389_v42 = vmax.f32 %v4357_v47, 0.0  ;;  %v4326_v50 = vadd.f32 %v8855_v22, %v4287_v6  ;;  %v4249_v52 = vadd.f32 %v4199_v45, %v8830_v41 }
 0x3e4   : > { %v3978_v48 = vpop.f32.mrf.mxu0 }
 0x3e5   : > { %4421 = vst [vmem:[%s8870_s25 + $0xc8] sm:$0xff] %v4389_v42  ;;  %v4358_v15 = vadd.f32 %v4326_v50, %v9449_v7  ;;  %v4288_v49 = vmul.f32 %v8847_v18, %v4249_v52  ;;  %v4204_v54 = vadd.f32 %v4203_v59, %v3978_v48 }
 0x3e6   : > { %v3980_v56 = vpop.f32.mrf.mxu0 }
 0x3e7   : > { %v4390_v12 = vmax.f32 %v4358_v15, 0.0  ;;  %v4327_v62 = vadd.f32 %v8855_v22, %v4288_v49  ;;  %v4250_v63 = vadd.f32 %v4204_v54, %v8833_v57 }
 0x3e8   : > { %v3983_v31 = vpop.f32.mrf.mxu0 }
 0x3e9   : > { %4422 = vst [vmem:[%s8870_s25 + $0xd0] sm:$0xff] %v4390_v12  ;;  %v4359_v41 = vadd.f32 %v4327_v62, %v9450_v4  ;;  %v4289_v3 = vmul.f32 %v8847_v18, %v4250_v63  ;;  %v4209_v61 = vadd.f32 %v5454_v37, %v3983_v31 }
 0x3ea   : > { %v3985_v25 = vpop.f32.mrf.mxu0 }
 0x3eb   : > { %v4391_v16 = vmax.f32 %v4359_v41, 0.0  ;;  %v4328_v55 = vadd.f32 %v8855_v22, %v4289_v3  ;;  %v4251_v0 = vadd.f32 %v4209_v61, %v8836_v23 }
 0x3ec   : > { %v3988_v29 = vpop.f32.mrf.mxu0 }
 0x3ed   : > { %4423 = vst [vmem:[%s8870_s25 + $0xd8] sm:$0xff] %v4391_v16  ;;  %v4360_v53 = vadd.f32 %v4328_v55, %v9451_v60  ;;  %v4290_v57 = vmul.f32 %v8847_v18, %v4251_v0  ;;  %v4214_v9 = vadd.f32 %v4213_v39, %v3988_v29 }
 0x3ee   : > { %v3990_v2 = vpop.f32.mrf.mxu0 }
 0x3ef   : > { %v4392_v30 = vmax.f32 %v4360_v53, 0.0  ;;  %v4329_v58 = vadd.f32 %v8855_v22, %v4290_v57  ;;  %v4252_v28 = vadd.f32 %v4214_v9, %v8839_v11 }
 0x3f0   : > { %v3993_v32 = vpop.f32.mrf.mxu0 }
 0x3f1   : > { %4424 = vst [vmem:[%s8870_s25 + $0xe0] sm:$0xff] %v4392_v30  ;;  %v4361_v23 = vadd.f32 %v4329_v58, %v9452_v38  ;;  %v4291_v44 = vmul.f32 %v8847_v18, %v4252_v28  ;;  %v4219_v46 = vadd.f32 %v5457_v36, %v3993_v32 }
 0x3f2   : > { %v3995_v26 = vpop.f32.mrf.mxu0 }
 0x3f3   : > { %v4393_v17 = vmax.f32 %v4361_v23, 0.0  ;;  %v4330_v51 = vadd.f32 %v8855_v22, %v4291_v44  ;;  %v4253_v21 = vadd.f32 %v4219_v46, %v8842_v35 }
 0x3f5   : > { %4425 = vst [vmem:[%s8870_s25 + $0xe8] sm:$0xff] %v4393_v17  ;;  %v4362_v40 = vadd.f32 %v4330_v51, %v9453_v27  ;;  %v4292_v20 = vmul.f32 %v8847_v18, %v4253_v21 }
 0x3f7   : > { %v4394_v11 = vmax.f32 %v4362_v40, 0.0  ;;  %v4331_v43 = vadd.f32 %v8855_v22, %v4292_v20 }
 0x3f9   : > { %4426 = vst [vmem:[%s8870_s25 + $0xf0] sm:$0xff] %v4394_v11  ;;  %v4363_v8 = vadd.f32 %v4331_v43, %v9454_v34 }
 0x3fb   : > { %v4395_v1 = vmax.f32 %v4363_v8, 0.0 }
 0x3fd   : > { %4427 = vst [vmem:[%s8870_s25 + $0xf8] sm:$0xff] %v4395_v1 }
 0x3fe PF: > { %s17_s24 = sadd.s32 1, %s5542_s24  }
 0x3ff   : > { %p14_p4 = scmp.ge.s32.totalorder %s17_s24, 4  }
 0x401   :  { %16 = sbr.rel (!%p14_p4) target bundleno = 1 (0x1), region = 83 }

</bundles_post_ra>
